<compile_context>
chip_gen: v7x
topology: tpu7x:2x2x1
jax: 0.10.0
libtpu: 0.0.40
codegen_flags: <defaults>
</compile_context>

<pallas_src>
import functools
import math

import numpy as np
import jax
import jax.numpy as jnp
from jax.experimental import pallas as pl
from jax.experimental.pallas import tpu as pltpu


# ----------------------------------------------------------------------------
# Pyramid helpers (pure numpy, mirror get_mask / refer_points of the reference)
# ----------------------------------------------------------------------------
def get_mask(input_size, window_size, inner_size):
    all_size = [input_size]
    for w in window_size:
        all_size.append(all_size[-1] // w)
    seq_length = sum(all_size)
    mask = np.zeros((seq_length, seq_length), dtype=np.float32)

    inner_window = inner_size // 2
    for layer_idx in range(len(all_size)):
        start = sum(all_size[:layer_idx])
        for i in range(start, start + all_size[layer_idx]):
            left = max(i - inner_window, start)
            right = min(i + inner_window + 1, start + all_size[layer_idx])
            mask[i, left:right] = 1

    for layer_idx in range(1, len(all_size)):
        start = sum(all_size[:layer_idx])
        for i in range(start, start + all_size[layer_idx]):
            left = (start - all_size[layer_idx - 1]) + (i - start) * window_size[layer_idx - 1]
            if i == start + all_size[layer_idx] - 1:
                right = start
            else:
                right = (start - all_size[layer_idx - 1]) + (i - start + 1) * window_size[layer_idx - 1]
            mask[i, left:right] = 1
            mask[left:right, i] = 1

    # 1.0 == masked (blocked) position, matching (1 - mask).bool()
    return (1.0 - mask).astype(np.float32), all_size


def refer_points(all_sizes, window_size):
    input_size = all_sizes[0]
    indexes = np.zeros((input_size, len(all_sizes)), dtype=np.int32)
    for i in range(input_size):
        indexes[i, 0] = i
        former = i
        for j in range(1, len(all_sizes)):
            start = sum(all_sizes[:j])
            inner = former - (start - all_sizes[j - 1])
            former = start + min(inner // window_size[j - 1], all_sizes[j] - 1)
            indexes[i, j] = former
    return indexes


def positional_encoding(L, D):
    pe = np.zeros((L, D), dtype=np.float32)
    position = np.arange(L, dtype=np.float32)[:, None]
    div_term = np.exp(np.arange(0, D, 2, dtype=np.float32) * -(math.log(10000.0) / D))
    pe[:, 0::2] = np.sin(position * div_term)
    pe[:, 1::2] = np.cos(position * div_term)
    return pe


# ----------------------------------------------------------------------------
# In-kernel helpers
# ----------------------------------------------------------------------------
def _ln(x, g, b, eps):
    mu = jnp.mean(x, axis=-1, keepdims=True)
    var = jnp.mean((x - mu) ** 2, axis=-1, keepdims=True)
    return (x - mu) * jax.lax.rsqrt(var + eps) * g + b


def _gelu(x):
    # TODO(synk): PyTorch F.gelu default is exact erf-GELU; tanh approximation used here.
    c = math.sqrt(2.0 / math.pi)
    return 0.5 * x * (1.0 + jnp.tanh(c * (x + 0.044715 * x * x * x)))


def _elu(x):
    return jnp.where(x > 0, x, jnp.exp(x) - 1.0)


# ----------------------------------------------------------------------------
# The fused forward kernel (one grid step == one batch element, whole model)
# ----------------------------------------------------------------------------
def _pyraformer_kernel(
    x_ref, xm_ref, pos_ref,
    tok_shift_ref, tok_w_ref, tw_ref, tb_ref,
    down_w_ref, down_b_ref, sel_ref, conv_w_ref, conv_b_ref,
    up_w_ref, up_b_ref, cg_ref, cb_ref,
    bias_ref,
    wq_ref, wk_ref, wv_ref, fc_w_ref, fc_b_ref, ln1_g_ref, ln1_b_ref,
    w1_ref, b1_ref, w2_ref, b2_ref, ln2_g_ref, ln2_b_ref,
    gm_ref, proj_ref,
    o_ref,
    *, n_layers, n_heads, win, n_levels):
    f32 = jnp.float32

    # -------- DataEmbedding: circular Conv1d(k=3) + temporal linear + positional ----------
    x = x_ref[...]                                                        # (L, C)
    val = jnp.dot(x, tok_w_ref[1], preferred_element_type=f32)           # center tap
    for j in (0, 2):                                                      # circular +/-1 taps
        xs = jnp.dot(tok_shift_ref[j], x, preferred_element_type=f32)    # constant shift matmul
        val = val + jnp.dot(xs, tok_w_ref[j], preferred_element_type=f32)
    tmp = jnp.dot(xm_ref[...], tw_ref[...], preferred_element_type=f32) + tb_ref[...]
    seq = val + tmp + pos_ref[...]                                        # (L, D)

    # -------- Bottleneck_Construct: down -> strided conv (BN folded) + ELU -> up -> cat -> LN
    down = jnp.dot(seq, down_w_ref[...], preferred_element_type=f32) + down_b_ref[...]  # (L, db)
    acc = None
    for j in range(win):                                                  # Conv1d(k=stride=win)
        dj = jnp.dot(sel_ref[j], down, preferred_element_type=f32)       # (Lc, db) rows j mod win
        term = jnp.dot(dj, conv_w_ref[j], preferred_element_type=f32)
        acc = term if acc is None else acc + term
    conv = _elu(acc + conv_b_ref[...])                                    # (Lc, db)
    up = jnp.dot(conv, up_w_ref[...], preferred_element_type=f32) + up_b_ref[...]       # (Lc, D)
    allx = _ln(jnp.concatenate([seq, up], axis=0), cg_ref[...], cb_ref[...], 1e-5)      # (Lp, D)

    # -------- Encoder layers (post-norm), layers and heads statically unrolled -------------
    bias = bias_ref[...]                                                  # (Lp, Lp) additive mask
    Lp, D = allx.shape
    for li in range(n_layers):
        xin = allx
        attn_out = jnp.zeros((Lp, D), f32)
        for h in range(n_heads):
            q = jnp.dot(xin, wq_ref[li, h], preferred_element_type=f32)  # 1/sqrt(dk) pre-folded
            k = jnp.dot(xin, wk_ref[li, h], preferred_element_type=f32)
            v = jnp.dot(xin, wv_ref[li, h], preferred_element_type=f32)
            s = jax.lax.dot_general(q, k, (((1,), (1,)), ((), ())),
                                    preferred_element_type=f32) + bias   # (Lp, Lp)
            s = s - jnp.max(s, axis=-1, keepdims=True)
            e = jnp.exp(s)
            p = e * pl.reciprocal(jnp.sum(e, axis=-1, keepdims=True), approx=True)
            head = jnp.dot(p, v, preferred_element_type=f32)             # (Lp, dv)
            # accumulate straight into the fc output (no head lane-concat)
            attn_out = attn_out + jnp.dot(head, fc_w_ref[li, h], preferred_element_type=f32)
        out = _ln(attn_out + fc_b_ref[li] + xin, ln1_g_ref[li], ln1_b_ref[li], 1e-6)
        h1 = _gelu(jnp.dot(out, w1_ref[li], preferred_element_type=f32) + b1_ref[li])
        h2 = jnp.dot(h1, w2_ref[li], preferred_element_type=f32) + b2_ref[li] + out
        allx = _ln(h2, ln2_g_ref[li], ln2_b_ref[li], 1e-6)

    # -------- Forecast head: gather last-step pyramid nodes (one-hot rows) + Predictor ------
    pred = jnp.zeros((1, o_ref.shape[-1]), f32)
    for l in range(n_levels):
        node = jnp.dot(gm_ref[l], allx, preferred_element_type=f32)      # (1, D)
        pred = pred + jnp.dot(node, proj_ref[l], preferred_element_type=f32)
    o_ref[...] = jnp.broadcast_to(pred, o_ref.shape)                     # (8, pred_pad) lane-dense


# ----------------------------------------------------------------------------
# Parameters + static structure constants (folding done here)
# ----------------------------------------------------------------------------
def init_params(key, cfg, *, mask_np, idx_last):
    D, C, H = cfg["d_model"], cfg["enc_in"], cfg["n_heads"]
    dk, dv = cfg["d_k"], cfg["d_v"]
    Mk, db = cfg["mark_dim"], cfg["d_bottleneck"]
    win = cfg["window"]
    L = cfg["seq_len"]
    Lc = L // win
    Lp = L + Lc
    n_levels = len(cfg["all_size"])
    nL = cfg["e_layers"]
    pred_out = cfg["pred_len"] * C
    pred_pad = ((pred_out + 127) // 128) * 128
    keys = iter(jax.random.split(key, 32))

    def xavier(shape):
        fan_in, fan_out = shape[-2], shape[-1]
        lim = math.sqrt(6.0 / (fan_in + fan_out))
        return jax.random.uniform(next(keys), shape, jnp.float32, -lim, lim)

    bn_scale = 1.0 / math.sqrt(1.0 + 1e-5)      # BatchNorm1d eval, fresh running stats
    temperature = float(dk) ** 0.5              # folded into W_q

    # Predictor: Linear(n_levels*D -> pred_out, bias=False), split per level, lane-padded.
    proj_w = np.asarray(xavier((n_levels * D, pred_out)))
    proj = np.zeros((n_levels, D, pred_pad), np.float32)
    proj[:, :, :pred_out] = proj_w.reshape(n_levels, D, pred_out)

    # Static structure constants (circular-shift, strided-conv row selection, last-step gather).
    tok_shift = np.zeros((3, L, L), np.float32)
    for i in range(L):
        tok_shift[0, i, (i - 1) % L] = 1.0      # x[i-1], circular
        tok_shift[1, i, i] = 1.0                # identity tap (unused in kernel)
        tok_shift[2, i, (i + 1) % L] = 1.0      # x[i+1], circular
    cscm_sel = np.zeros((win, Lc, L), np.float32)
    for j in range(win):
        for t in range(Lc):
            cscm_sel[j, t, t * win + j] = 1.0
    gather_rows = np.zeros((n_levels, 1, Lp), np.float32)
    for l, idx in enumerate(idx_last):
        gather_rows[l, 0, int(idx)] = 1.0
    mask_bias = (-1e9 * mask_np).astype(np.float32)       # additive attention bias

    params = dict(
        pos_emb=jnp.asarray(positional_encoding(L, D)),
        tok_shift=jnp.asarray(tok_shift),
        token_w=xavier((3, C, D)),                         # Conv1d(C->D,k=3,circular,no bias)
        temporal_w=xavier((Mk, D)),
        temporal_b=jnp.zeros((1, D), jnp.float32),
        down_w=xavier((D, db)),
        down_b=jnp.zeros((1, db), jnp.float32),
        cscm_sel=jnp.asarray(cscm_sel),
        conv_w=xavier((win, db, db)) * bn_scale,           # BN folded
        conv_b=jnp.zeros((1, db), jnp.float32),            # (bias * bn_scale == 0)
        up_w=xavier((db, D)),
        up_b=jnp.zeros((1, D), jnp.float32),
        cscm_ln_g=jnp.ones((1, D), jnp.float32),
        cscm_ln_b=jnp.zeros((1, D), jnp.float32),
        mask_bias=jnp.asarray(mask_bias),
        wq=xavier((nL, H, D, dk)) / temperature,           # temperature folded
        wk=xavier((nL, H, D, dk)),
        wv=xavier((nL, H, D, dv)),
        fc_w=xavier((nL, H, dv, D)),
        fc_b=jnp.zeros((nL, 1, D), jnp.float32),
        ln1_g=jnp.ones((nL, 1, D), jnp.float32),
        ln1_b=jnp.zeros((nL, 1, D), jnp.float32),
        w1=xavier((nL, D, D)),                             # d_inner == d_model per spec
        b1=jnp.zeros((nL, 1, D), jnp.float32),
        w2=xavier((nL, D, D)),
        b2=jnp.zeros((nL, 1, D), jnp.float32),
        ln2_g=jnp.ones((nL, 1, D), jnp.float32),
        ln2_b=jnp.zeros((nL, 1, D), jnp.float32),
        gather_rows=jnp.asarray(gather_rows),
        proj=jnp.asarray(proj),
    )
    return params


# ----------------------------------------------------------------------------
# Forward pass — a single pallas_call
# ----------------------------------------------------------------------------
def model_forward(params, x_enc, x_mark_enc, *, cfg):
    B, L, C = x_enc.shape
    D, H = cfg["d_model"], cfg["n_heads"]
    dk, dv = cfg["d_k"], cfg["d_v"]
    db, win = cfg["d_bottleneck"], cfg["window"]
    Mk = x_mark_enc.shape[-1]
    Lc = L // win
    Lp = L + Lc
    n_levels = len(cfg["all_size"])
    nL = cfg["e_layers"]
    pred_out = cfg["pred_len"] * cfg["enc_in"]
    pred_pad = params["proj"].shape[-1]

    kern = functools.partial(_pyraformer_kernel, n_layers=nL, n_heads=H,
                             win=win, n_levels=n_levels)

    const2 = lambda b: (0, 0)
    const3 = lambda b: (0, 0, 0)
    const4 = lambda b: (0, 0, 0, 0)
    batch3 = lambda b: (b, 0, 0)

    in_specs = [
        pl.BlockSpec((None, L, C), batch3),                  # x_enc
        pl.BlockSpec((None, L, Mk), batch3),                 # x_mark_enc
        pl.BlockSpec((L, D), const2),                        # positional encoding
        pl.BlockSpec((3, L, L), const3),                     # circular shift matrices
        pl.BlockSpec((3, C, D), const3),                     # token conv weights
        pl.BlockSpec((Mk, D), const2),                       # temporal_w
        pl.BlockSpec((1, D), const2),                        # temporal_b
        pl.BlockSpec((D, db), const2),                       # down_w
        pl.BlockSpec((1, db), const2),                       # down_b
        pl.BlockSpec((win, Lc, L), const3),                  # strided-conv row selectors
        pl.BlockSpec((win, db, db), const3),                 # conv_w (BN folded)
        pl.BlockSpec((1, db), const2),                       # conv_b
        pl.BlockSpec((db, D), const2),                       # up_w
        pl.BlockSpec((1, D), const2),                        # up_b
        pl.BlockSpec((1, D), const2),                        # cscm_ln_g
        pl.BlockSpec((1, D), const2),                        # cscm_ln_b
        pl.BlockSpec((Lp, Lp), const2),                      # mask_bias (loaded once per step)
        pl.BlockSpec((nL, H, D, dk), const4),                # wq
        pl.BlockSpec((nL, H, D, dk), const4),                # wk
        pl.BlockSpec((nL, H, D, dv), const4),                # wv
        pl.BlockSpec((nL, H, dv, D), const4),                # fc_w
        pl.BlockSpec((nL, 1, D), const3),                    # fc_b
        pl.BlockSpec((nL, 1, D), const3),                    # ln1_g
        pl.BlockSpec((nL, 1, D), const3),                    # ln1_b
        pl.BlockSpec((nL, D, D), const3),                    # w1
        pl.BlockSpec((nL, 1, D), const3),                    # b1
        pl.BlockSpec((nL, D, D), const3),                    # w2
        pl.BlockSpec((nL, 1, D), const3),                    # b2
        pl.BlockSpec((nL, 1, D), const3),                    # ln2_g
        pl.BlockSpec((nL, 1, D), const3),                    # ln2_b
        pl.BlockSpec((n_levels, 1, Lp), const3),             # last-step gather rows
        pl.BlockSpec((n_levels, D, pred_pad), const3),       # predictor weight (padded)
    ]

    out = pl.pallas_call(
        kern,
        out_shape=jax.ShapeDtypeStruct((B, 8, pred_pad), jnp.float32),
        grid=(B,),
        in_specs=in_specs,
        out_specs=pl.BlockSpec((None, 8, pred_pad), batch3),
        compiler_params=pltpu.CompilerParams(dimension_semantics=("parallel",)),
    )(x_enc, x_mark_enc, params["pos_emb"], params["tok_shift"], params["token_w"],
      params["temporal_w"], params["temporal_b"], params["down_w"], params["down_b"],
      params["cscm_sel"], params["conv_w"], params["conv_b"], params["up_w"], params["up_b"],
      params["cscm_ln_g"], params["cscm_ln_b"], params["mask_bias"],
      params["wq"], params["wk"], params["wv"], params["fc_w"], params["fc_b"],
      params["ln1_g"], params["ln1_b"], params["w1"], params["b1"],
      params["w2"], params["b2"], params["ln2_g"], params["ln2_b"],
      params["gather_rows"], params["proj"])

    pred = out[:, 0, :pred_out].reshape(B, cfg["pred_len"], cfg["enc_in"])
    return pred                                              # == dec_out[:, -pred_len:, :]


# ----------------------------------------------------------------------------
if __name__ == "__main__":
    cfg = dict(batch=2, seq_len=16, enc_in=4, mark_dim=4, d_model=32, n_heads=4,
               d_k=64, d_v=64, e_layers=2, pred_len=4, d_bottleneck=64,
               window=2, inner_size=5)
    window_size = [cfg["window"]]                            # long_term_forecast -> [2]
    mask_np, all_size = get_mask(cfg["seq_len"], window_size, cfg["inner_size"])
    idx_np = refer_points(all_size, window_size)
    cfg["all_size"] = all_size
    idx_last = tuple(int(i) for i in idx_np[-1])             # pyramid nodes of last time step

    key = jax.random.PRNGKey(0)
    kp, kx, km = jax.random.split(key, 3)
    params = init_params(kp, cfg, mask_np=mask_np, idx_last=idx_last)

    x_enc = jax.random.normal(kx, (cfg["batch"], cfg["seq_len"], cfg["enc_in"]), jnp.float32)
    x_mark_enc = jax.random.normal(km, (cfg["batch"], cfg["seq_len"], cfg["mark_dim"]), jnp.float32)

    fwd = jax.jit(functools.partial(model_forward, cfg=cfg))
    out = fwd(params, x_enc, x_mark_enc)
    jax.block_until_ready(out)
    assert out.shape == (cfg["batch"], cfg["pred_len"], cfg["enc_in"])
    assert bool(jnp.all(jnp.isfinite(out)))
    print("KERNEL_OK")
</pallas_src>

<mosaic_0001>
module attributes {stable_mosaic.version = 11 : i64} {
  func.func @_pyraformer_kernel(%arg0: i32, %arg1: memref<1x16x4xf32, #tpu.memory_space<vmem>>, %arg2: memref<1x16x4xf32, #tpu.memory_space<vmem>>, %arg3: memref<16x32xf32, #tpu.memory_space<vmem>>, %arg4: memref<3x16x16xf32, #tpu.memory_space<vmem>>, %arg5: memref<3x4x32xf32, #tpu.memory_space<vmem>>, %arg6: memref<4x32xf32, #tpu.memory_space<vmem>>, %arg7: memref<1x32xf32, #tpu.memory_space<vmem>>, %arg8: memref<32x64xf32, #tpu.memory_space<vmem>>, %arg9: memref<1x64xf32, #tpu.memory_space<vmem>>, %arg10: memref<2x8x16xf32, #tpu.memory_space<vmem>>, %arg11: memref<2x64x64xf32, #tpu.memory_space<vmem>>, %arg12: memref<1x64xf32, #tpu.memory_space<vmem>>, %arg13: memref<64x32xf32, #tpu.memory_space<vmem>>, %arg14: memref<1x32xf32, #tpu.memory_space<vmem>>, %arg15: memref<1x32xf32, #tpu.memory_space<vmem>>, %arg16: memref<1x32xf32, #tpu.memory_space<vmem>>, %arg17: memref<24x24xf32, #tpu.memory_space<vmem>>, %arg18: memref<2x4x32x64xf32, #tpu.memory_space<vmem>>, %arg19: memref<2x4x32x64xf32, #tpu.memory_space<vmem>>, %arg20: memref<2x4x32x64xf32, #tpu.memory_space<vmem>>, %arg21: memref<2x4x64x32xf32, #tpu.memory_space<vmem>>, %arg22: memref<2x1x32xf32, #tpu.memory_space<vmem>>, %arg23: memref<2x1x32xf32, #tpu.memory_space<vmem>>, %arg24: memref<2x1x32xf32, #tpu.memory_space<vmem>>, %arg25: memref<2x32x32xf32, #tpu.memory_space<vmem>>, %arg26: memref<2x1x32xf32, #tpu.memory_space<vmem>>, %arg27: memref<2x32x32xf32, #tpu.memory_space<vmem>>, %arg28: memref<2x1x32xf32, #tpu.memory_space<vmem>>, %arg29: memref<2x1x32xf32, #tpu.memory_space<vmem>>, %arg30: memref<2x1x32xf32, #tpu.memory_space<vmem>>, %arg31: memref<2x1x24xf32, #tpu.memory_space<vmem>>, %arg32: memref<2x32x128xf32, #tpu.memory_space<vmem>>, %arg33: memref<1x8x128xf32, #tpu.memory_space<vmem>>) attributes {dimension_semantics = [#tpu.dimension_semantics<parallel>], iteration_bounds = array<i64: 2>, scalar_prefetch = 0 : i64, scratch_operands = 0 : i64, tpu.core_type = #tpu.core_type<tc>, window_params = [{transform_indices = @transform_0, window_bounds = array<i64: 1, 16, 4>}, {transform_indices = @transform_1, window_bounds = array<i64: 1, 16, 4>}, {pipeline_mode = #tpu.pipeline_mode<synchronous>, transform_indices = @transform_2, window_bounds = array<i64: 16, 32>}, {pipeline_mode = #tpu.pipeline_mode<synchronous>, transform_indices = @transform_3, window_bounds = array<i64: 3, 16, 16>}, {pipeline_mode = #tpu.pipeline_mode<synchronous>, transform_indices = @transform_4, window_bounds = array<i64: 3, 4, 32>}, {pipeline_mode = #tpu.pipeline_mode<synchronous>, transform_indices = @transform_5, window_bounds = array<i64: 4, 32>}, {pipeline_mode = #tpu.pipeline_mode<synchronous>, transform_indices = @transform_6, window_bounds = array<i64: 1, 32>}, {pipeline_mode = #tpu.pipeline_mode<synchronous>, transform_indices = @transform_7, window_bounds = array<i64: 32, 64>}, {pipeline_mode = #tpu.pipeline_mode<synchronous>, transform_indices = @transform_8, window_bounds = array<i64: 1, 64>}, {pipeline_mode = #tpu.pipeline_mode<synchronous>, transform_indices = @transform_9, window_bounds = array<i64: 2, 8, 16>}, {pipeline_mode = #tpu.pipeline_mode<synchronous>, transform_indices = @transform_10, window_bounds = array<i64: 2, 64, 64>}, {pipeline_mode = #tpu.pipeline_mode<synchronous>, transform_indices = @transform_11, window_bounds = array<i64: 1, 64>}, {pipeline_mode = #tpu.pipeline_mode<synchronous>, transform_indices = @transform_12, window_bounds = array<i64: 64, 32>}, {pipeline_mode = #tpu.pipeline_mode<synchronous>, transform_indices = @transform_13, window_bounds = array<i64: 1, 32>}, {pipeline_mode = #tpu.pipeline_mode<synchronous>, transform_indices = @transform_14, window_bounds = array<i64: 1, 32>}, {pipeline_mode = #tpu.pipeline_mode<synchronous>, transform_indices = @transform_15, window_bounds = array<i64: 1, 32>}, {pipeline_mode = #tpu.pipeline_mode<synchronous>, transform_indices = @transform_16, window_bounds = array<i64: 24, 24>}, {pipeline_mode = #tpu.pipeline_mode<synchronous>, transform_indices = @transform_17, window_bounds = array<i64: 2, 4, 32, 64>}, {pipeline_mode = #tpu.pipeline_mode<synchronous>, transform_indices = @transform_18, window_bounds = array<i64: 2, 4, 32, 64>}, {pipeline_mode = #tpu.pipeline_mode<synchronous>, transform_indices = @transform_19, window_bounds = array<i64: 2, 4, 32, 64>}, {pipeline_mode = #tpu.pipeline_mode<synchronous>, transform_indices = @transform_20, window_bounds = array<i64: 2, 4, 64, 32>}, {pipeline_mode = #tpu.pipeline_mode<synchronous>, transform_indices = @transform_21, window_bounds = array<i64: 2, 1, 32>}, {pipeline_mode = #tpu.pipeline_mode<synchronous>, transform_indices = @transform_22, window_bounds = array<i64: 2, 1, 32>}, {pipeline_mode = #tpu.pipeline_mode<synchronous>, transform_indices = @transform_23, window_bounds = array<i64: 2, 1, 32>}, {pipeline_mode = #tpu.pipeline_mode<synchronous>, transform_indices = @transform_24, window_bounds = array<i64: 2, 32, 32>}, {pipeline_mode = #tpu.pipeline_mode<synchronous>, transform_indices = @transform_25, window_bounds = array<i64: 2, 1, 32>}, {pipeline_mode = #tpu.pipeline_mode<synchronous>, transform_indices = @transform_26, window_bounds = array<i64: 2, 32, 32>}, {pipeline_mode = #tpu.pipeline_mode<synchronous>, transform_indices = @transform_27, window_bounds = array<i64: 2, 1, 32>}, {pipeline_mode = #tpu.pipeline_mode<synchronous>, transform_indices = @transform_28, window_bounds = array<i64: 2, 1, 32>}, {pipeline_mode = #tpu.pipeline_mode<synchronous>, transform_indices = @transform_29, window_bounds = array<i64: 2, 1, 32>}, {pipeline_mode = #tpu.pipeline_mode<synchronous>, transform_indices = @transform_30, window_bounds = array<i64: 2, 1, 24>}, {pipeline_mode = #tpu.pipeline_mode<synchronous>, transform_indices = @transform_31, window_bounds = array<i64: 2, 32, 128>}, {transform_indices = @transform_32, window_bounds = array<i64: 1, 8, 128>}]} {
    %c0 = arith.constant 0 : index
    %c0_0 = arith.constant 0 : index
    %c0_1 = arith.constant 0 : index
    %0 = vector.load %arg1[%c0, %c0_0, %c0_1] : memref<1x16x4xf32, #tpu.memory_space<vmem>>, vector<1x16x4xf32>
    %1 = vector.shape_cast %0 : vector<1x16x4xf32> to vector<16x4xf32>
    %c1 = arith.constant 1 : index
    %c0_2 = arith.constant 0 : index
    %c0_3 = arith.constant 0 : index
    %2 = vector.load %arg5[%c1, %c0_2, %c0_3] : memref<3x4x32xf32, #tpu.memory_space<vmem>>, vector<1x4x32xf32>
    %3 = vector.shape_cast %2 : vector<1x4x32xf32> to vector<4x32xf32>
    %cst = arith.constant dense<0.000000e+00> : vector<16x32xf32>
    %4 = tpu.matmul %1, %3, %cst {dimension_numbers = #tpu.dot_dimension_numbers<[1], [0], [0], [1], [0, 0, 1, 1], [], []>} : vector<16x4xf32>, vector<4x32xf32>, vector<16x32xf32> -> vector<16x32xf32>
    %c0_4 = arith.constant 0 : index
    %c0_5 = arith.constant 0 : index
    %c0_6 = arith.constant 0 : index
    %5 = vector.load %arg4[%c0_4, %c0_5, %c0_6] : memref<3x16x16xf32, #tpu.memory_space<vmem>>, vector<1x16x16xf32>
    %6 = vector.shape_cast %5 : vector<1x16x16xf32> to vector<16x16xf32>
    %cst_7 = arith.constant dense<0.000000e+00> : vector<16x4xf32>
    %7 = tpu.matmul %6, %1, %cst_7 {dimension_numbers = #tpu.dot_dimension_numbers<[1], [0], [0], [1], [0, 0, 1, 1], [], []>} : vector<16x16xf32>, vector<16x4xf32>, vector<16x4xf32> -> vector<16x4xf32>
    %c0_8 = arith.constant 0 : index
    %c0_9 = arith.constant 0 : index
    %c0_10 = arith.constant 0 : index
    %8 = vector.load %arg5[%c0_8, %c0_9, %c0_10] : memref<3x4x32xf32, #tpu.memory_space<vmem>>, vector<1x4x32xf32>
    %9 = vector.shape_cast %8 : vector<1x4x32xf32> to vector<4x32xf32>
    %cst_11 = arith.constant dense<0.000000e+00> : vector<16x32xf32>
    %10 = tpu.matmul %7, %9, %cst_11 {dimension_numbers = #tpu.dot_dimension_numbers<[1], [0], [0], [1], [0, 0, 1, 1], [], []>} : vector<16x4xf32>, vector<4x32xf32>, vector<16x32xf32> -> vector<16x32xf32>
    %11 = arith.addf %4, %10 : vector<16x32xf32>
    %c2 = arith.constant 2 : index
    %c0_12 = arith.constant 0 : index
    %c0_13 = arith.constant 0 : index
    %12 = vector.load %arg4[%c2, %c0_12, %c0_13] : memref<3x16x16xf32, #tpu.memory_space<vmem>>, vector<1x16x16xf32>
    %13 = vector.shape_cast %12 : vector<1x16x16xf32> to vector<16x16xf32>
    %cst_14 = arith.constant dense<0.000000e+00> : vector<16x4xf32>
    %14 = tpu.matmul %13, %1, %cst_14 {dimension_numbers = #tpu.dot_dimension_numbers<[1], [0], [0], [1], [0, 0, 1, 1], [], []>} : vector<16x16xf32>, vector<16x4xf32>, vector<16x4xf32> -> vector<16x4xf32>
    %c2_15 = arith.constant 2 : index
    %c0_16 = arith.constant 0 : index
    %c0_17 = arith.constant 0 : index
    %15 = vector.load %arg5[%c2_15, %c0_16, %c0_17] : memref<3x4x32xf32, #tpu.memory_space<vmem>>, vector<1x4x32xf32>
    %16 = vector.shape_cast %15 : vector<1x4x32xf32> to vector<4x32xf32>
    %cst_18 = arith.constant dense<0.000000e+00> : vector<16x32xf32>
    %17 = tpu.matmul %14, %16, %cst_18 {dimension_numbers = #tpu.dot_dimension_numbers<[1], [0], [0], [1], [0, 0, 1, 1], [], []>} : vector<16x4xf32>, vector<4x32xf32>, vector<16x32xf32> -> vector<16x32xf32>
    %18 = arith.addf %11, %17 : vector<16x32xf32>
    %c0_19 = arith.constant 0 : index
    %c0_20 = arith.constant 0 : index
    %c0_21 = arith.constant 0 : index
    %19 = vector.load %arg2[%c0_19, %c0_20, %c0_21] : memref<1x16x4xf32, #tpu.memory_space<vmem>>, vector<1x16x4xf32>
    %20 = vector.shape_cast %19 : vector<1x16x4xf32> to vector<16x4xf32>
    %c0_22 = arith.constant 0 : index
    %c0_23 = arith.constant 0 : index
    %21 = vector.load %arg6[%c0_22, %c0_23] : memref<4x32xf32, #tpu.memory_space<vmem>>, vector<4x32xf32>
    %cst_24 = arith.constant dense<0.000000e+00> : vector<16x32xf32>
    %22 = tpu.matmul %20, %21, %cst_24 {dimension_numbers = #tpu.dot_dimension_numbers<[1], [0], [0], [1], [0, 0, 1, 1], [], []>} : vector<16x4xf32>, vector<4x32xf32>, vector<16x32xf32> -> vector<16x32xf32>
    %c0_25 = arith.constant 0 : index
    %c0_26 = arith.constant 0 : index
    %23 = vector.load %arg7[%c0_25, %c0_26] : memref<1x32xf32, #tpu.memory_space<vmem>>, vector<1x32xf32>
    %24 = vector.broadcast %23 : vector<1x32xf32> to vector<16x32xf32>
    %25 = arith.addf %22, %24 : vector<16x32xf32>
    %26 = arith.addf %18, %25 : vector<16x32xf32>
    %c0_27 = arith.constant 0 : index
    %c0_28 = arith.constant 0 : index
    %27 = vector.load %arg3[%c0_27, %c0_28] : memref<16x32xf32, #tpu.memory_space<vmem>>, vector<16x32xf32>
    %28 = arith.addf %26, %27 : vector<16x32xf32>
    %c0_29 = arith.constant 0 : index
    %c0_30 = arith.constant 0 : index
    %29 = vector.load %arg8[%c0_29, %c0_30] : memref<32x64xf32, #tpu.memory_space<vmem>>, vector<32x64xf32>
    %cst_31 = arith.constant dense<0.000000e+00> : vector<16x64xf32>
    %30 = tpu.matmul %28, %29, %cst_31 {dimension_numbers = #tpu.dot_dimension_numbers<[1], [0], [0], [1], [0, 0, 1, 1], [], []>} : vector<16x32xf32>, vector<32x64xf32>, vector<16x64xf32> -> vector<16x64xf32>
    %c0_32 = arith.constant 0 : index
    %c0_33 = arith.constant 0 : index
    %31 = vector.load %arg9[%c0_32, %c0_33] : memref<1x64xf32, #tpu.memory_space<vmem>>, vector<1x64xf32>
    %32 = vector.broadcast %31 : vector<1x64xf32> to vector<16x64xf32>
    %33 = arith.addf %30, %32 : vector<16x64xf32>
    %c0_34 = arith.constant 0 : index
    %c0_35 = arith.constant 0 : index
    %c0_36 = arith.constant 0 : index
    %34 = vector.load %arg10[%c0_34, %c0_35, %c0_36] : memref<2x8x16xf32, #tpu.memory_space<vmem>>, vector<1x8x16xf32>
    %35 = vector.shape_cast %34 : vector<1x8x16xf32> to vector<8x16xf32>
    %cst_37 = arith.constant dense<0.000000e+00> : vector<8x64xf32>
    %36 = tpu.matmul %35, %33, %cst_37 {dimension_numbers = #tpu.dot_dimension_numbers<[1], [0], [0], [1], [0, 0, 1, 1], [], []>} : vector<8x16xf32>, vector<16x64xf32>, vector<8x64xf32> -> vector<8x64xf32>
    %c0_38 = arith.constant 0 : index
    %c0_39 = arith.constant 0 : index
    %c0_40 = arith.constant 0 : index
    %37 = vector.load %arg11[%c0_38, %c0_39, %c0_40] : memref<2x64x64xf32, #tpu.memory_space<vmem>>, vector<1x64x64xf32>
    %38 = vector.shape_cast %37 : vector<1x64x64xf32> to vector<64x64xf32>
    %cst_41 = arith.constant dense<0.000000e+00> : vector<8x64xf32>
    %39 = tpu.matmul %36, %38, %cst_41 {dimension_numbers = #tpu.dot_dimension_numbers<[1], [0], [0], [1], [0, 0, 1, 1], [], []>} : vector<8x64xf32>, vector<64x64xf32>, vector<8x64xf32> -> vector<8x64xf32>
    %c1_42 = arith.constant 1 : index
    %c0_43 = arith.constant 0 : index
    %c0_44 = arith.constant 0 : index
    %40 = vector.load %arg10[%c1_42, %c0_43, %c0_44] : memref<2x8x16xf32, #tpu.memory_space<vmem>>, vector<1x8x16xf32>
    %41 = vector.shape_cast %40 : vector<1x8x16xf32> to vector<8x16xf32>
    %cst_45 = arith.constant dense<0.000000e+00> : vector<8x64xf32>
    %42 = tpu.matmul %41, %33, %cst_45 {dimension_numbers = #tpu.dot_dimension_numbers<[1], [0], [0], [1], [0, 0, 1, 1], [], []>} : vector<8x16xf32>, vector<16x64xf32>, vector<8x64xf32> -> vector<8x64xf32>
    %c1_46 = arith.constant 1 : index
    %c0_47 = arith.constant 0 : index
    %c0_48 = arith.constant 0 : index
    %43 = vector.load %arg11[%c1_46, %c0_47, %c0_48] : memref<2x64x64xf32, #tpu.memory_space<vmem>>, vector<1x64x64xf32>
    %44 = vector.shape_cast %43 : vector<1x64x64xf32> to vector<64x64xf32>
    %cst_49 = arith.constant dense<0.000000e+00> : vector<8x64xf32>
    %45 = tpu.matmul %42, %44, %cst_49 {dimension_numbers = #tpu.dot_dimension_numbers<[1], [0], [0], [1], [0, 0, 1, 1], [], []>} : vector<8x64xf32>, vector<64x64xf32>, vector<8x64xf32> -> vector<8x64xf32>
    %46 = arith.addf %39, %45 : vector<8x64xf32>
    %c0_50 = arith.constant 0 : index
    %c0_51 = arith.constant 0 : index
    %47 = vector.load %arg12[%c0_50, %c0_51] : memref<1x64xf32, #tpu.memory_space<vmem>>, vector<1x64xf32>
    %48 = vector.broadcast %47 : vector<1x64xf32> to vector<8x64xf32>
    %49 = arith.addf %46, %48 : vector<8x64xf32>
    %cst_52 = arith.constant 0.000000e+00 : f32
    %50 = vector.broadcast %cst_52 : f32 to vector<8x64xf32>
    %51 = arith.cmpf ogt, %49, %50 : vector<8x64xf32>
    %52 = math.exp %49 : vector<8x64xf32>
    %cst_53 = arith.constant 1.000000e+00 : f32
    %53 = vector.broadcast %cst_53 : f32 to vector<8x64xf32>
    %54 = arith.subf %52, %53 : vector<8x64xf32>
    %55 = arith.select %51, %49, %54 : vector<8x64xi1>, vector<8x64xf32>
    %c0_54 = arith.constant 0 : index
    %c0_55 = arith.constant 0 : index
    %56 = vector.load %arg13[%c0_54, %c0_55] : memref<64x32xf32, #tpu.memory_space<vmem>>, vector<64x32xf32>
    %cst_56 = arith.constant dense<0.000000e+00> : vector<8x32xf32>
    %57 = tpu.matmul %55, %56, %cst_56 {dimension_numbers = #tpu.dot_dimension_numbers<[1], [0], [0], [1], [0, 0, 1, 1], [], []>} : vector<8x64xf32>, vector<64x32xf32>, vector<8x32xf32> -> vector<8x32xf32>
    %c0_57 = arith.constant 0 : index
    %c0_58 = arith.constant 0 : index
    %58 = vector.load %arg14[%c0_57, %c0_58] : memref<1x32xf32, #tpu.memory_space<vmem>>, vector<1x32xf32>
    %59 = vector.broadcast %58 : vector<1x32xf32> to vector<8x32xf32>
    %60 = arith.addf %57, %59 : vector<8x32xf32>
    %61 = tpu.concatenate %28, %60 in 0 : vector<16x32xf32>, vector<8x32xf32> -> vector<24x32xf32>
    %c0_59 = arith.constant 0 : index
    %c0_60 = arith.constant 0 : index
    %62 = vector.load %arg15[%c0_59, %c0_60] : memref<1x32xf32, #tpu.memory_space<vmem>>, vector<1x32xf32>
    %c0_61 = arith.constant 0 : index
    %c0_62 = arith.constant 0 : index
    %63 = vector.load %arg16[%c0_61, %c0_62] : memref<1x32xf32, #tpu.memory_space<vmem>>, vector<1x32xf32>
    %cst_63 = arith.constant dense<0.000000e+00> : vector<24xf32>
    %64 = vector.multi_reduction <add>, %61, %cst_63 [1] : vector<24x32xf32> to vector<24xf32>
    %65 = vector.shape_cast %64 : vector<24xf32> to vector<24x1xf32>
    %cst_64 = arith.constant 3.200000e+01 : f32
    %66 = vector.broadcast %cst_64 : f32 to vector<24x1xf32>
    %67 = arith.divf %65, %66 : vector<24x1xf32>
    %68 = vector.broadcast %67 : vector<24x1xf32> to vector<24x32xf32>
    %69 = arith.subf %61, %68 : vector<24x32xf32>
    %70 = arith.mulf %69, %69 : vector<24x32xf32>
    %cst_65 = arith.constant dense<0.000000e+00> : vector<24xf32>
    %71 = vector.multi_reduction <add>, %70, %cst_65 [1] : vector<24x32xf32> to vector<24xf32>
    %72 = vector.shape_cast %71 : vector<24xf32> to vector<24x1xf32>
    %cst_66 = arith.constant 3.200000e+01 : f32
    %73 = vector.broadcast %cst_66 : f32 to vector<24x1xf32>
    %74 = arith.divf %72, %73 : vector<24x1xf32>
    %75 = vector.broadcast %67 : vector<24x1xf32> to vector<24x32xf32>
    %76 = arith.subf %61, %75 : vector<24x32xf32>
    %cst_67 = arith.constant 9.99999974E-6 : f32
    %77 = vector.broadcast %cst_67 : f32 to vector<24x1xf32>
    %78 = arith.addf %74, %77 : vector<24x1xf32>
    %79 = math.rsqrt %78 : vector<24x1xf32>
    %80 = vector.broadcast %79 : vector<24x1xf32> to vector<24x32xf32>
    %81 = arith.mulf %76, %80 : vector<24x32xf32>
    %82 = vector.broadcast %62 : vector<1x32xf32> to vector<24x32xf32>
    %83 = arith.mulf %81, %82 : vector<24x32xf32>
    %84 = vector.broadcast %63 : vector<1x32xf32> to vector<24x32xf32>
    %85 = arith.addf %83, %84 : vector<24x32xf32>
    %c0_68 = arith.constant 0 : index
    %c0_69 = arith.constant 0 : index
    %86 = vector.load %arg17[%c0_68, %c0_69] : memref<24x24xf32, #tpu.memory_space<vmem>>, vector<24x24xf32>
    %cst_70 = arith.constant 0.000000e+00 : f32
    %87 = vector.broadcast %cst_70 : f32 to vector<24x32xf32>
    %c0_71 = arith.constant 0 : index
    %c0_72 = arith.constant 0 : index
    %c0_73 = arith.constant 0 : index
    %c0_74 = arith.constant 0 : index
    %88 = vector.load %arg18[%c0_71, %c0_72, %c0_73, %c0_74] : memref<2x4x32x64xf32, #tpu.memory_space<vmem>>, vector<1x1x32x64xf32>
    %89 = vector.shape_cast %88 : vector<1x1x32x64xf32> to vector<32x64xf32>
    %cst_75 = arith.constant dense<0.000000e+00> : vector<24x64xf32>
    %90 = tpu.matmul %85, %89, %cst_75 {dimension_numbers = #tpu.dot_dimension_numbers<[1], [0], [0], [1], [0, 0, 1, 1], [], []>} : vector<24x32xf32>, vector<32x64xf32>, vector<24x64xf32> -> vector<24x64xf32>
    %c0_76 = arith.constant 0 : index
    %c0_77 = arith.constant 0 : index
    %c0_78 = arith.constant 0 : index
    %c0_79 = arith.constant 0 : index
    %91 = vector.load %arg19[%c0_76, %c0_77, %c0_78, %c0_79] : memref<2x4x32x64xf32, #tpu.memory_space<vmem>>, vector<1x1x32x64xf32>
    %92 = vector.shape_cast %91 : vector<1x1x32x64xf32> to vector<32x64xf32>
    %cst_80 = arith.constant dense<0.000000e+00> : vector<24x64xf32>
    %93 = tpu.matmul %85, %92, %cst_80 {dimension_numbers = #tpu.dot_dimension_numbers<[1], [0], [0], [1], [0, 0, 1, 1], [], []>} : vector<24x32xf32>, vector<32x64xf32>, vector<24x64xf32> -> vector<24x64xf32>
    %c0_81 = arith.constant 0 : index
    %c0_82 = arith.constant 0 : index
    %c0_83 = arith.constant 0 : index
    %c0_84 = arith.constant 0 : index
    %94 = vector.load %arg20[%c0_81, %c0_82, %c0_83, %c0_84] : memref<2x4x32x64xf32, #tpu.memory_space<vmem>>, vector<1x1x32x64xf32>
    %95 = vector.shape_cast %94 : vector<1x1x32x64xf32> to vector<32x64xf32>
    %cst_85 = arith.constant dense<0.000000e+00> : vector<24x64xf32>
    %96 = tpu.matmul %85, %95, %cst_85 {dimension_numbers = #tpu.dot_dimension_numbers<[1], [0], [0], [1], [0, 0, 1, 1], [], []>} : vector<24x32xf32>, vector<32x64xf32>, vector<24x64xf32> -> vector<24x64xf32>
    %cst_86 = arith.constant dense<0.000000e+00> : vector<24x24xf32>
    %97 = tpu.matmul %90, %93, %cst_86 {dimension_numbers = #tpu.dot_dimension_numbers<[1], [1], [0], [0], [0, 0, 1, 0], [], []>} : vector<24x64xf32>, vector<24x64xf32>, vector<24x24xf32> -> vector<24x24xf32>
    %98 = arith.addf %97, %86 : vector<24x24xf32>
    %cst_87 = arith.constant dense<0xFF800000> : vector<24xf32>
    %99 = vector.multi_reduction <maximumf>, %98, %cst_87 [1] : vector<24x24xf32> to vector<24xf32>
    %100 = vector.shape_cast %99 : vector<24xf32> to vector<24x1xf32>
    %101 = vector.broadcast %100 : vector<24x1xf32> to vector<24x24xf32>
    %102 = arith.subf %98, %101 : vector<24x24xf32>
    %103 = math.exp %102 : vector<24x24xf32>
    %cst_88 = arith.constant dense<0.000000e+00> : vector<24xf32>
    %104 = vector.multi_reduction <add>, %103, %cst_88 [1] : vector<24x24xf32> to vector<24xf32>
    %105 = vector.shape_cast %104 : vector<24xf32> to vector<24x1xf32>
    %106 = tpu.reciprocal %105 {approx = true} : vector<24x1xf32> -> vector<24x1xf32>
    %107 = vector.broadcast %106 : vector<24x1xf32> to vector<24x24xf32>
    %108 = arith.mulf %103, %107 : vector<24x24xf32>
    %cst_89 = arith.constant dense<0.000000e+00> : vector<24x64xf32>
    %109 = tpu.matmul %108, %96, %cst_89 {dimension_numbers = #tpu.dot_dimension_numbers<[1], [0], [0], [1], [0, 0, 1, 1], [], []>} : vector<24x24xf32>, vector<24x64xf32>, vector<24x64xf32> -> vector<24x64xf32>
    %c0_90 = arith.constant 0 : index
    %c0_91 = arith.constant 0 : index
    %c0_92 = arith.constant 0 : index
    %c0_93 = arith.constant 0 : index
    %110 = vector.load %arg21[%c0_90, %c0_91, %c0_92, %c0_93] : memref<2x4x64x32xf32, #tpu.memory_space<vmem>>, vector<1x1x64x32xf32>
    %111 = vector.shape_cast %110 : vector<1x1x64x32xf32> to vector<64x32xf32>
    %cst_94 = arith.constant dense<0.000000e+00> : vector<24x32xf32>
    %112 = tpu.matmul %109, %111, %cst_94 {dimension_numbers = #tpu.dot_dimension_numbers<[1], [0], [0], [1], [0, 0, 1, 1], [], []>} : vector<24x64xf32>, vector<64x32xf32>, vector<24x32xf32> -> vector<24x32xf32>
    %113 = arith.addf %87, %112 : vector<24x32xf32>
    %c0_95 = arith.constant 0 : index
    %c1_96 = arith.constant 1 : index
    %c0_97 = arith.constant 0 : index
    %c0_98 = arith.constant 0 : index
    %114 = vector.load %arg18[%c0_95, %c1_96, %c0_97, %c0_98] : memref<2x4x32x64xf32, #tpu.memory_space<vmem>>, vector<1x1x32x64xf32>
    %115 = vector.shape_cast %114 : vector<1x1x32x64xf32> to vector<32x64xf32>
    %cst_99 = arith.constant dense<0.000000e+00> : vector<24x64xf32>
    %116 = tpu.matmul %85, %115, %cst_99 {dimension_numbers = #tpu.dot_dimension_numbers<[1], [0], [0], [1], [0, 0, 1, 1], [], []>} : vector<24x32xf32>, vector<32x64xf32>, vector<24x64xf32> -> vector<24x64xf32>
    %c0_100 = arith.constant 0 : index
    %c1_101 = arith.constant 1 : index
    %c0_102 = arith.constant 0 : index
    %c0_103 = arith.constant 0 : index
    %117 = vector.load %arg19[%c0_100, %c1_101, %c0_102, %c0_103] : memref<2x4x32x64xf32, #tpu.memory_space<vmem>>, vector<1x1x32x64xf32>
    %118 = vector.shape_cast %117 : vector<1x1x32x64xf32> to vector<32x64xf32>
    %cst_104 = arith.constant dense<0.000000e+00> : vector<24x64xf32>
    %119 = tpu.matmul %85, %118, %cst_104 {dimension_numbers = #tpu.dot_dimension_numbers<[1], [0], [0], [1], [0, 0, 1, 1], [], []>} : vector<24x32xf32>, vector<32x64xf32>, vector<24x64xf32> -> vector<24x64xf32>
    %c0_105 = arith.constant 0 : index
    %c1_106 = arith.constant 1 : index
    %c0_107 = arith.constant 0 : index
    %c0_108 = arith.constant 0 : index
    %120 = vector.load %arg20[%c0_105, %c1_106, %c0_107, %c0_108] : memref<2x4x32x64xf32, #tpu.memory_space<vmem>>, vector<1x1x32x64xf32>
    %121 = vector.shape_cast %120 : vector<1x1x32x64xf32> to vector<32x64xf32>
    %cst_109 = arith.constant dense<0.000000e+00> : vector<24x64xf32>
    %122 = tpu.matmul %85, %121, %cst_109 {dimension_numbers = #tpu.dot_dimension_numbers<[1], [0], [0], [1], [0, 0, 1, 1], [], []>} : vector<24x32xf32>, vector<32x64xf32>, vector<24x64xf32> -> vector<24x64xf32>
    %cst_110 = arith.constant dense<0.000000e+00> : vector<24x24xf32>
    %123 = tpu.matmul %116, %119, %cst_110 {dimension_numbers = #tpu.dot_dimension_numbers<[1], [1], [0], [0], [0, 0, 1, 0], [], []>} : vector<24x64xf32>, vector<24x64xf32>, vector<24x24xf32> -> vector<24x24xf32>
    %124 = arith.addf %123, %86 : vector<24x24xf32>
    %cst_111 = arith.constant dense<0xFF800000> : vector<24xf32>
    %125 = vector.multi_reduction <maximumf>, %124, %cst_111 [1] : vector<24x24xf32> to vector<24xf32>
    %126 = vector.shape_cast %125 : vector<24xf32> to vector<24x1xf32>
    %127 = vector.broadcast %126 : vector<24x1xf32> to vector<24x24xf32>
    %128 = arith.subf %124, %127 : vector<24x24xf32>
    %129 = math.exp %128 : vector<24x24xf32>
    %cst_112 = arith.constant dense<0.000000e+00> : vector<24xf32>
    %130 = vector.multi_reduction <add>, %129, %cst_112 [1] : vector<24x24xf32> to vector<24xf32>
    %131 = vector.shape_cast %130 : vector<24xf32> to vector<24x1xf32>
    %132 = tpu.reciprocal %131 {approx = true} : vector<24x1xf32> -> vector<24x1xf32>
    %133 = vector.broadcast %132 : vector<24x1xf32> to vector<24x24xf32>
    %134 = arith.mulf %129, %133 : vector<24x24xf32>
    %cst_113 = arith.constant dense<0.000000e+00> : vector<24x64xf32>
    %135 = tpu.matmul %134, %122, %cst_113 {dimension_numbers = #tpu.dot_dimension_numbers<[1], [0], [0], [1], [0, 0, 1, 1], [], []>} : vector<24x24xf32>, vector<24x64xf32>, vector<24x64xf32> -> vector<24x64xf32>
    %c0_114 = arith.constant 0 : index
    %c1_115 = arith.constant 1 : index
    %c0_116 = arith.constant 0 : index
    %c0_117 = arith.constant 0 : index
    %136 = vector.load %arg21[%c0_114, %c1_115, %c0_116, %c0_117] : memref<2x4x64x32xf32, #tpu.memory_space<vmem>>, vector<1x1x64x32xf32>
    %137 = vector.shape_cast %136 : vector<1x1x64x32xf32> to vector<64x32xf32>
    %cst_118 = arith.constant dense<0.000000e+00> : vector<24x32xf32>
    %138 = tpu.matmul %135, %137, %cst_118 {dimension_numbers = #tpu.dot_dimension_numbers<[1], [0], [0], [1], [0, 0, 1, 1], [], []>} : vector<24x64xf32>, vector<64x32xf32>, vector<24x32xf32> -> vector<24x32xf32>
    %139 = arith.addf %113, %138 : vector<24x32xf32>
    %c0_119 = arith.constant 0 : index
    %c2_120 = arith.constant 2 : index
    %c0_121 = arith.constant 0 : index
    %c0_122 = arith.constant 0 : index
    %140 = vector.load %arg18[%c0_119, %c2_120, %c0_121, %c0_122] : memref<2x4x32x64xf32, #tpu.memory_space<vmem>>, vector<1x1x32x64xf32>
    %141 = vector.shape_cast %140 : vector<1x1x32x64xf32> to vector<32x64xf32>
    %cst_123 = arith.constant dense<0.000000e+00> : vector<24x64xf32>
    %142 = tpu.matmul %85, %141, %cst_123 {dimension_numbers = #tpu.dot_dimension_numbers<[1], [0], [0], [1], [0, 0, 1, 1], [], []>} : vector<24x32xf32>, vector<32x64xf32>, vector<24x64xf32> -> vector<24x64xf32>
    %c0_124 = arith.constant 0 : index
    %c2_125 = arith.constant 2 : index
    %c0_126 = arith.constant 0 : index
    %c0_127 = arith.constant 0 : index
    %143 = vector.load %arg19[%c0_124, %c2_125, %c0_126, %c0_127] : memref<2x4x32x64xf32, #tpu.memory_space<vmem>>, vector<1x1x32x64xf32>
    %144 = vector.shape_cast %143 : vector<1x1x32x64xf32> to vector<32x64xf32>
    %cst_128 = arith.constant dense<0.000000e+00> : vector<24x64xf32>
    %145 = tpu.matmul %85, %144, %cst_128 {dimension_numbers = #tpu.dot_dimension_numbers<[1], [0], [0], [1], [0, 0, 1, 1], [], []>} : vector<24x32xf32>, vector<32x64xf32>, vector<24x64xf32> -> vector<24x64xf32>
    %c0_129 = arith.constant 0 : index
    %c2_130 = arith.constant 2 : index
    %c0_131 = arith.constant 0 : index
    %c0_132 = arith.constant 0 : index
    %146 = vector.load %arg20[%c0_129, %c2_130, %c0_131, %c0_132] : memref<2x4x32x64xf32, #tpu.memory_space<vmem>>, vector<1x1x32x64xf32>
    %147 = vector.shape_cast %146 : vector<1x1x32x64xf32> to vector<32x64xf32>
    %cst_133 = arith.constant dense<0.000000e+00> : vector<24x64xf32>
    %148 = tpu.matmul %85, %147, %cst_133 {dimension_numbers = #tpu.dot_dimension_numbers<[1], [0], [0], [1], [0, 0, 1, 1], [], []>} : vector<24x32xf32>, vector<32x64xf32>, vector<24x64xf32> -> vector<24x64xf32>
    %cst_134 = arith.constant dense<0.000000e+00> : vector<24x24xf32>
    %149 = tpu.matmul %142, %145, %cst_134 {dimension_numbers = #tpu.dot_dimension_numbers<[1], [1], [0], [0], [0, 0, 1, 0], [], []>} : vector<24x64xf32>, vector<24x64xf32>, vector<24x24xf32> -> vector<24x24xf32>
    %150 = arith.addf %149, %86 : vector<24x24xf32>
    %cst_135 = arith.constant dense<0xFF800000> : vector<24xf32>
    %151 = vector.multi_reduction <maximumf>, %150, %cst_135 [1] : vector<24x24xf32> to vector<24xf32>
    %152 = vector.shape_cast %151 : vector<24xf32> to vector<24x1xf32>
    %153 = vector.broadcast %152 : vector<24x1xf32> to vector<24x24xf32>
    %154 = arith.subf %150, %153 : vector<24x24xf32>
    %155 = math.exp %154 : vector<24x24xf32>
    %cst_136 = arith.constant dense<0.000000e+00> : vector<24xf32>
    %156 = vector.multi_reduction <add>, %155, %cst_136 [1] : vector<24x24xf32> to vector<24xf32>
    %157 = vector.shape_cast %156 : vector<24xf32> to vector<24x1xf32>
    %158 = tpu.reciprocal %157 {approx = true} : vector<24x1xf32> -> vector<24x1xf32>
    %159 = vector.broadcast %158 : vector<24x1xf32> to vector<24x24xf32>
    %160 = arith.mulf %155, %159 : vector<24x24xf32>
    %cst_137 = arith.constant dense<0.000000e+00> : vector<24x64xf32>
    %161 = tpu.matmul %160, %148, %cst_137 {dimension_numbers = #tpu.dot_dimension_numbers<[1], [0], [0], [1], [0, 0, 1, 1], [], []>} : vector<24x24xf32>, vector<24x64xf32>, vector<24x64xf32> -> vector<24x64xf32>
    %c0_138 = arith.constant 0 : index
    %c2_139 = arith.constant 2 : index
    %c0_140 = arith.constant 0 : index
    %c0_141 = arith.constant 0 : index
    %162 = vector.load %arg21[%c0_138, %c2_139, %c0_140, %c0_141] : memref<2x4x64x32xf32, #tpu.memory_space<vmem>>, vector<1x1x64x32xf32>
    %163 = vector.shape_cast %162 : vector<1x1x64x32xf32> to vector<64x32xf32>
    %cst_142 = arith.constant dense<0.000000e+00> : vector<24x32xf32>
    %164 = tpu.matmul %161, %163, %cst_142 {dimension_numbers = #tpu.dot_dimension_numbers<[1], [0], [0], [1], [0, 0, 1, 1], [], []>} : vector<24x64xf32>, vector<64x32xf32>, vector<24x32xf32> -> vector<24x32xf32>
    %165 = arith.addf %139, %164 : vector<24x32xf32>
    %c0_143 = arith.constant 0 : index
    %c3 = arith.constant 3 : index
    %c0_144 = arith.constant 0 : index
    %c0_145 = arith.constant 0 : index
    %166 = vector.load %arg18[%c0_143, %c3, %c0_144, %c0_145] : memref<2x4x32x64xf32, #tpu.memory_space<vmem>>, vector<1x1x32x64xf32>
    %167 = vector.shape_cast %166 : vector<1x1x32x64xf32> to vector<32x64xf32>
    %cst_146 = arith.constant dense<0.000000e+00> : vector<24x64xf32>
    %168 = tpu.matmul %85, %167, %cst_146 {dimension_numbers = #tpu.dot_dimension_numbers<[1], [0], [0], [1], [0, 0, 1, 1], [], []>} : vector<24x32xf32>, vector<32x64xf32>, vector<24x64xf32> -> vector<24x64xf32>
    %c0_147 = arith.constant 0 : index
    %c3_148 = arith.constant 3 : index
    %c0_149 = arith.constant 0 : index
    %c0_150 = arith.constant 0 : index
    %169 = vector.load %arg19[%c0_147, %c3_148, %c0_149, %c0_150] : memref<2x4x32x64xf32, #tpu.memory_space<vmem>>, vector<1x1x32x64xf32>
    %170 = vector.shape_cast %169 : vector<1x1x32x64xf32> to vector<32x64xf32>
    %cst_151 = arith.constant dense<0.000000e+00> : vector<24x64xf32>
    %171 = tpu.matmul %85, %170, %cst_151 {dimension_numbers = #tpu.dot_dimension_numbers<[1], [0], [0], [1], [0, 0, 1, 1], [], []>} : vector<24x32xf32>, vector<32x64xf32>, vector<24x64xf32> -> vector<24x64xf32>
    %c0_152 = arith.constant 0 : index
    %c3_153 = arith.constant 3 : index
    %c0_154 = arith.constant 0 : index
    %c0_155 = arith.constant 0 : index
    %172 = vector.load %arg20[%c0_152, %c3_153, %c0_154, %c0_155] : memref<2x4x32x64xf32, #tpu.memory_space<vmem>>, vector<1x1x32x64xf32>
    %173 = vector.shape_cast %172 : vector<1x1x32x64xf32> to vector<32x64xf32>
    %cst_156 = arith.constant dense<0.000000e+00> : vector<24x64xf32>
    %174 = tpu.matmul %85, %173, %cst_156 {dimension_numbers = #tpu.dot_dimension_numbers<[1], [0], [0], [1], [0, 0, 1, 1], [], []>} : vector<24x32xf32>, vector<32x64xf32>, vector<24x64xf32> -> vector<24x64xf32>
    %cst_157 = arith.constant dense<0.000000e+00> : vector<24x24xf32>
    %175 = tpu.matmul %168, %171, %cst_157 {dimension_numbers = #tpu.dot_dimension_numbers<[1], [1], [0], [0], [0, 0, 1, 0], [], []>} : vector<24x64xf32>, vector<24x64xf32>, vector<24x24xf32> -> vector<24x24xf32>
    %176 = arith.addf %175, %86 : vector<24x24xf32>
    %cst_158 = arith.constant dense<0xFF800000> : vector<24xf32>
    %177 = vector.multi_reduction <maximumf>, %176, %cst_158 [1] : vector<24x24xf32> to vector<24xf32>
    %178 = vector.shape_cast %177 : vector<24xf32> to vector<24x1xf32>
    %179 = vector.broadcast %178 : vector<24x1xf32> to vector<24x24xf32>
    %180 = arith.subf %176, %179 : vector<24x24xf32>
    %181 = math.exp %180 : vector<24x24xf32>
    %cst_159 = arith.constant dense<0.000000e+00> : vector<24xf32>
    %182 = vector.multi_reduction <add>, %181, %cst_159 [1] : vector<24x24xf32> to vector<24xf32>
    %183 = vector.shape_cast %182 : vector<24xf32> to vector<24x1xf32>
    %184 = tpu.reciprocal %183 {approx = true} : vector<24x1xf32> -> vector<24x1xf32>
    %185 = vector.broadcast %184 : vector<24x1xf32> to vector<24x24xf32>
    %186 = arith.mulf %181, %185 : vector<24x24xf32>
    %cst_160 = arith.constant dense<0.000000e+00> : vector<24x64xf32>
    %187 = tpu.matmul %186, %174, %cst_160 {dimension_numbers = #tpu.dot_dimension_numbers<[1], [0], [0], [1], [0, 0, 1, 1], [], []>} : vector<24x24xf32>, vector<24x64xf32>, vector<24x64xf32> -> vector<24x64xf32>
    %c0_161 = arith.constant 0 : index
    %c3_162 = arith.constant 3 : index
    %c0_163 = arith.constant 0 : index
    %c0_164 = arith.constant 0 : index
    %188 = vector.load %arg21[%c0_161, %c3_162, %c0_163, %c0_164] : memref<2x4x64x32xf32, #tpu.memory_space<vmem>>, vector<1x1x64x32xf32>
    %189 = vector.shape_cast %188 : vector<1x1x64x32xf32> to vector<64x32xf32>
    %cst_165 = arith.constant dense<0.000000e+00> : vector<24x32xf32>
    %190 = tpu.matmul %187, %189, %cst_165 {dimension_numbers = #tpu.dot_dimension_numbers<[1], [0], [0], [1], [0, 0, 1, 1], [], []>} : vector<24x64xf32>, vector<64x32xf32>, vector<24x32xf32> -> vector<24x32xf32>
    %191 = arith.addf %165, %190 : vector<24x32xf32>
    %c0_166 = arith.constant 0 : index
    %c0_167 = arith.constant 0 : index
    %c0_168 = arith.constant 0 : index
    %192 = vector.load %arg22[%c0_166, %c0_167, %c0_168] : memref<2x1x32xf32, #tpu.memory_space<vmem>>, vector<1x1x32xf32>
    %193 = vector.shape_cast %192 : vector<1x1x32xf32> to vector<1x32xf32>
    %194 = vector.broadcast %193 : vector<1x32xf32> to vector<24x32xf32>
    %195 = arith.addf %191, %194 : vector<24x32xf32>
    %196 = arith.addf %195, %85 : vector<24x32xf32>
    %c0_169 = arith.constant 0 : index
    %c0_170 = arith.constant 0 : index
    %c0_171 = arith.constant 0 : index
    %197 = vector.load %arg23[%c0_169, %c0_170, %c0_171] : memref<2x1x32xf32, #tpu.memory_space<vmem>>, vector<1x1x32xf32>
    %198 = vector.shape_cast %197 : vector<1x1x32xf32> to vector<1x32xf32>
    %c0_172 = arith.constant 0 : index
    %c0_173 = arith.constant 0 : index
    %c0_174 = arith.constant 0 : index
    %199 = vector.load %arg24[%c0_172, %c0_173, %c0_174] : memref<2x1x32xf32, #tpu.memory_space<vmem>>, vector<1x1x32xf32>
    %200 = vector.shape_cast %199 : vector<1x1x32xf32> to vector<1x32xf32>
    %cst_175 = arith.constant dense<0.000000e+00> : vector<24xf32>
    %201 = vector.multi_reduction <add>, %196, %cst_175 [1] : vector<24x32xf32> to vector<24xf32>
    %202 = vector.shape_cast %201 : vector<24xf32> to vector<24x1xf32>
    %cst_176 = arith.constant 3.200000e+01 : f32
    %203 = vector.broadcast %cst_176 : f32 to vector<24x1xf32>
    %204 = arith.divf %202, %203 : vector<24x1xf32>
    %205 = vector.broadcast %204 : vector<24x1xf32> to vector<24x32xf32>
    %206 = arith.subf %196, %205 : vector<24x32xf32>
    %207 = arith.mulf %206, %206 : vector<24x32xf32>
    %cst_177 = arith.constant dense<0.000000e+00> : vector<24xf32>
    %208 = vector.multi_reduction <add>, %207, %cst_177 [1] : vector<24x32xf32> to vector<24xf32>
    %209 = vector.shape_cast %208 : vector<24xf32> to vector<24x1xf32>
    %cst_178 = arith.constant 3.200000e+01 : f32
    %210 = vector.broadcast %cst_178 : f32 to vector<24x1xf32>
    %211 = arith.divf %209, %210 : vector<24x1xf32>
    %212 = vector.broadcast %204 : vector<24x1xf32> to vector<24x32xf32>
    %213 = arith.subf %196, %212 : vector<24x32xf32>
    %cst_179 = arith.constant 9.99999997E-7 : f32
    %214 = vector.broadcast %cst_179 : f32 to vector<24x1xf32>
    %215 = arith.addf %211, %214 : vector<24x1xf32>
    %216 = math.rsqrt %215 : vector<24x1xf32>
    %217 = vector.broadcast %216 : vector<24x1xf32> to vector<24x32xf32>
    %218 = arith.mulf %213, %217 : vector<24x32xf32>
    %219 = vector.broadcast %198 : vector<1x32xf32> to vector<24x32xf32>
    %220 = arith.mulf %218, %219 : vector<24x32xf32>
    %221 = vector.broadcast %200 : vector<1x32xf32> to vector<24x32xf32>
    %222 = arith.addf %220, %221 : vector<24x32xf32>
    %c0_180 = arith.constant 0 : index
    %c0_181 = arith.constant 0 : index
    %c0_182 = arith.constant 0 : index
    %223 = vector.load %arg25[%c0_180, %c0_181, %c0_182] : memref<2x32x32xf32, #tpu.memory_space<vmem>>, vector<1x32x32xf32>
    %224 = vector.shape_cast %223 : vector<1x32x32xf32> to vector<32x32xf32>
    %cst_183 = arith.constant dense<0.000000e+00> : vector<24x32xf32>
    %225 = tpu.matmul %222, %224, %cst_183 {dimension_numbers = #tpu.dot_dimension_numbers<[1], [0], [0], [1], [0, 0, 1, 1], [], []>} : vector<24x32xf32>, vector<32x32xf32>, vector<24x32xf32> -> vector<24x32xf32>
    %c0_184 = arith.constant 0 : index
    %c0_185 = arith.constant 0 : index
    %c0_186 = arith.constant 0 : index
    %226 = vector.load %arg26[%c0_184, %c0_185, %c0_186] : memref<2x1x32xf32, #tpu.memory_space<vmem>>, vector<1x1x32xf32>
    %227 = vector.shape_cast %226 : vector<1x1x32xf32> to vector<1x32xf32>
    %228 = vector.broadcast %227 : vector<1x32xf32> to vector<24x32xf32>
    %229 = arith.addf %225, %228 : vector<24x32xf32>
    %cst_187 = arith.constant 5.000000e-01 : f32
    %230 = vector.broadcast %cst_187 : f32 to vector<24x32xf32>
    %231 = arith.mulf %230, %229 : vector<24x32xf32>
    %cst_188 = arith.constant 4.471500e-02 : f32
    %232 = vector.broadcast %cst_188 : f32 to vector<24x32xf32>
    %233 = arith.mulf %232, %229 : vector<24x32xf32>
    %234 = arith.mulf %233, %229 : vector<24x32xf32>
    %235 = arith.mulf %234, %229 : vector<24x32xf32>
    %236 = arith.addf %229, %235 : vector<24x32xf32>
    %cst_189 = arith.constant 0.797884583 : f32
    %237 = vector.broadcast %cst_189 : f32 to vector<24x32xf32>
    %238 = arith.mulf %237, %236 : vector<24x32xf32>
    %239 = math.tanh %238 : vector<24x32xf32>
    %cst_190 = arith.constant 1.000000e+00 : f32
    %240 = vector.broadcast %cst_190 : f32 to vector<24x32xf32>
    %241 = arith.addf %240, %239 : vector<24x32xf32>
    %242 = arith.mulf %231, %241 : vector<24x32xf32>
    %c0_191 = arith.constant 0 : index
    %c0_192 = arith.constant 0 : index
    %c0_193 = arith.constant 0 : index
    %243 = vector.load %arg27[%c0_191, %c0_192, %c0_193] : memref<2x32x32xf32, #tpu.memory_space<vmem>>, vector<1x32x32xf32>
    %244 = vector.shape_cast %243 : vector<1x32x32xf32> to vector<32x32xf32>
    %cst_194 = arith.constant dense<0.000000e+00> : vector<24x32xf32>
    %245 = tpu.matmul %242, %244, %cst_194 {dimension_numbers = #tpu.dot_dimension_numbers<[1], [0], [0], [1], [0, 0, 1, 1], [], []>} : vector<24x32xf32>, vector<32x32xf32>, vector<24x32xf32> -> vector<24x32xf32>
    %c0_195 = arith.constant 0 : index
    %c0_196 = arith.constant 0 : index
    %c0_197 = arith.constant 0 : index
    %246 = vector.load %arg28[%c0_195, %c0_196, %c0_197] : memref<2x1x32xf32, #tpu.memory_space<vmem>>, vector<1x1x32xf32>
    %247 = vector.shape_cast %246 : vector<1x1x32xf32> to vector<1x32xf32>
    %248 = vector.broadcast %247 : vector<1x32xf32> to vector<24x32xf32>
    %249 = arith.addf %245, %248 : vector<24x32xf32>
    %250 = arith.addf %249, %222 : vector<24x32xf32>
    %c0_198 = arith.constant 0 : index
    %c0_199 = arith.constant 0 : index
    %c0_200 = arith.constant 0 : index
    %251 = vector.load %arg29[%c0_198, %c0_199, %c0_200] : memref<2x1x32xf32, #tpu.memory_space<vmem>>, vector<1x1x32xf32>
    %252 = vector.shape_cast %251 : vector<1x1x32xf32> to vector<1x32xf32>
    %c0_201 = arith.constant 0 : index
    %c0_202 = arith.constant 0 : index
    %c0_203 = arith.constant 0 : index
    %253 = vector.load %arg30[%c0_201, %c0_202, %c0_203] : memref<2x1x32xf32, #tpu.memory_space<vmem>>, vector<1x1x32xf32>
    %254 = vector.shape_cast %253 : vector<1x1x32xf32> to vector<1x32xf32>
    %cst_204 = arith.constant dense<0.000000e+00> : vector<24xf32>
    %255 = vector.multi_reduction <add>, %250, %cst_204 [1] : vector<24x32xf32> to vector<24xf32>
    %256 = vector.shape_cast %255 : vector<24xf32> to vector<24x1xf32>
    %cst_205 = arith.constant 3.200000e+01 : f32
    %257 = vector.broadcast %cst_205 : f32 to vector<24x1xf32>
    %258 = arith.divf %256, %257 : vector<24x1xf32>
    %259 = vector.broadcast %258 : vector<24x1xf32> to vector<24x32xf32>
    %260 = arith.subf %250, %259 : vector<24x32xf32>
    %261 = arith.mulf %260, %260 : vector<24x32xf32>
    %cst_206 = arith.constant dense<0.000000e+00> : vector<24xf32>
    %262 = vector.multi_reduction <add>, %261, %cst_206 [1] : vector<24x32xf32> to vector<24xf32>
    %263 = vector.shape_cast %262 : vector<24xf32> to vector<24x1xf32>
    %cst_207 = arith.constant 3.200000e+01 : f32
    %264 = vector.broadcast %cst_207 : f32 to vector<24x1xf32>
    %265 = arith.divf %263, %264 : vector<24x1xf32>
    %266 = vector.broadcast %258 : vector<24x1xf32> to vector<24x32xf32>
    %267 = arith.subf %250, %266 : vector<24x32xf32>
    %cst_208 = arith.constant 9.99999997E-7 : f32
    %268 = vector.broadcast %cst_208 : f32 to vector<24x1xf32>
    %269 = arith.addf %265, %268 : vector<24x1xf32>
    %270 = math.rsqrt %269 : vector<24x1xf32>
    %271 = vector.broadcast %270 : vector<24x1xf32> to vector<24x32xf32>
    %272 = arith.mulf %267, %271 : vector<24x32xf32>
    %273 = vector.broadcast %252 : vector<1x32xf32> to vector<24x32xf32>
    %274 = arith.mulf %272, %273 : vector<24x32xf32>
    %275 = vector.broadcast %254 : vector<1x32xf32> to vector<24x32xf32>
    %276 = arith.addf %274, %275 : vector<24x32xf32>
    %cst_209 = arith.constant 0.000000e+00 : f32
    %277 = vector.broadcast %cst_209 : f32 to vector<24x32xf32>
    %c1_210 = arith.constant 1 : index
    %c0_211 = arith.constant 0 : index
    %c0_212 = arith.constant 0 : index
    %c0_213 = arith.constant 0 : index
    %278 = vector.load %arg18[%c1_210, %c0_211, %c0_212, %c0_213] : memref<2x4x32x64xf32, #tpu.memory_space<vmem>>, vector<1x1x32x64xf32>
    %279 = vector.shape_cast %278 : vector<1x1x32x64xf32> to vector<32x64xf32>
    %cst_214 = arith.constant dense<0.000000e+00> : vector<24x64xf32>
    %280 = tpu.matmul %276, %279, %cst_214 {dimension_numbers = #tpu.dot_dimension_numbers<[1], [0], [0], [1], [0, 0, 1, 1], [], []>} : vector<24x32xf32>, vector<32x64xf32>, vector<24x64xf32> -> vector<24x64xf32>
    %c1_215 = arith.constant 1 : index
    %c0_216 = arith.constant 0 : index
    %c0_217 = arith.constant 0 : index
    %c0_218 = arith.constant 0 : index
    %281 = vector.load %arg19[%c1_215, %c0_216, %c0_217, %c0_218] : memref<2x4x32x64xf32, #tpu.memory_space<vmem>>, vector<1x1x32x64xf32>
    %282 = vector.shape_cast %281 : vector<1x1x32x64xf32> to vector<32x64xf32>
    %cst_219 = arith.constant dense<0.000000e+00> : vector<24x64xf32>
    %283 = tpu.matmul %276, %282, %cst_219 {dimension_numbers = #tpu.dot_dimension_numbers<[1], [0], [0], [1], [0, 0, 1, 1], [], []>} : vector<24x32xf32>, vector<32x64xf32>, vector<24x64xf32> -> vector<24x64xf32>
    %c1_220 = arith.constant 1 : index
    %c0_221 = arith.constant 0 : index
    %c0_222 = arith.constant 0 : index
    %c0_223 = arith.constant 0 : index
    %284 = vector.load %arg20[%c1_220, %c0_221, %c0_222, %c0_223] : memref<2x4x32x64xf32, #tpu.memory_space<vmem>>, vector<1x1x32x64xf32>
    %285 = vector.shape_cast %284 : vector<1x1x32x64xf32> to vector<32x64xf32>
    %cst_224 = arith.constant dense<0.000000e+00> : vector<24x64xf32>
    %286 = tpu.matmul %276, %285, %cst_224 {dimension_numbers = #tpu.dot_dimension_numbers<[1], [0], [0], [1], [0, 0, 1, 1], [], []>} : vector<24x32xf32>, vector<32x64xf32>, vector<24x64xf32> -> vector<24x64xf32>
    %cst_225 = arith.constant dense<0.000000e+00> : vector<24x24xf32>
    %287 = tpu.matmul %280, %283, %cst_225 {dimension_numbers = #tpu.dot_dimension_numbers<[1], [1], [0], [0], [0, 0, 1, 0], [], []>} : vector<24x64xf32>, vector<24x64xf32>, vector<24x24xf32> -> vector<24x24xf32>
    %288 = arith.addf %287, %86 : vector<24x24xf32>
    %cst_226 = arith.constant dense<0xFF800000> : vector<24xf32>
    %289 = vector.multi_reduction <maximumf>, %288, %cst_226 [1] : vector<24x24xf32> to vector<24xf32>
    %290 = vector.shape_cast %289 : vector<24xf32> to vector<24x1xf32>
    %291 = vector.broadcast %290 : vector<24x1xf32> to vector<24x24xf32>
    %292 = arith.subf %288, %291 : vector<24x24xf32>
    %293 = math.exp %292 : vector<24x24xf32>
    %cst_227 = arith.constant dense<0.000000e+00> : vector<24xf32>
    %294 = vector.multi_reduction <add>, %293, %cst_227 [1] : vector<24x24xf32> to vector<24xf32>
    %295 = vector.shape_cast %294 : vector<24xf32> to vector<24x1xf32>
    %296 = tpu.reciprocal %295 {approx = true} : vector<24x1xf32> -> vector<24x1xf32>
    %297 = vector.broadcast %296 : vector<24x1xf32> to vector<24x24xf32>
    %298 = arith.mulf %293, %297 : vector<24x24xf32>
    %cst_228 = arith.constant dense<0.000000e+00> : vector<24x64xf32>
    %299 = tpu.matmul %298, %286, %cst_228 {dimension_numbers = #tpu.dot_dimension_numbers<[1], [0], [0], [1], [0, 0, 1, 1], [], []>} : vector<24x24xf32>, vector<24x64xf32>, vector<24x64xf32> -> vector<24x64xf32>
    %c1_229 = arith.constant 1 : index
    %c0_230 = arith.constant 0 : index
    %c0_231 = arith.constant 0 : index
    %c0_232 = arith.constant 0 : index
    %300 = vector.load %arg21[%c1_229, %c0_230, %c0_231, %c0_232] : memref<2x4x64x32xf32, #tpu.memory_space<vmem>>, vector<1x1x64x32xf32>
    %301 = vector.shape_cast %300 : vector<1x1x64x32xf32> to vector<64x32xf32>
    %cst_233 = arith.constant dense<0.000000e+00> : vector<24x32xf32>
    %302 = tpu.matmul %299, %301, %cst_233 {dimension_numbers = #tpu.dot_dimension_numbers<[1], [0], [0], [1], [0, 0, 1, 1], [], []>} : vector<24x64xf32>, vector<64x32xf32>, vector<24x32xf32> -> vector<24x32xf32>
    %303 = arith.addf %277, %302 : vector<24x32xf32>
    %c1_234 = arith.constant 1 : index
    %c1_235 = arith.constant 1 : index
    %c0_236 = arith.constant 0 : index
    %c0_237 = arith.constant 0 : index
    %304 = vector.load %arg18[%c1_234, %c1_235, %c0_236, %c0_237] : memref<2x4x32x64xf32, #tpu.memory_space<vmem>>, vector<1x1x32x64xf32>
    %305 = vector.shape_cast %304 : vector<1x1x32x64xf32> to vector<32x64xf32>
    %cst_238 = arith.constant dense<0.000000e+00> : vector<24x64xf32>
    %306 = tpu.matmul %276, %305, %cst_238 {dimension_numbers = #tpu.dot_dimension_numbers<[1], [0], [0], [1], [0, 0, 1, 1], [], []>} : vector<24x32xf32>, vector<32x64xf32>, vector<24x64xf32> -> vector<24x64xf32>
    %c1_239 = arith.constant 1 : index
    %c1_240 = arith.constant 1 : index
    %c0_241 = arith.constant 0 : index
    %c0_242 = arith.constant 0 : index
    %307 = vector.load %arg19[%c1_239, %c1_240, %c0_241, %c0_242] : memref<2x4x32x64xf32, #tpu.memory_space<vmem>>, vector<1x1x32x64xf32>
    %308 = vector.shape_cast %307 : vector<1x1x32x64xf32> to vector<32x64xf32>
    %cst_243 = arith.constant dense<0.000000e+00> : vector<24x64xf32>
    %309 = tpu.matmul %276, %308, %cst_243 {dimension_numbers = #tpu.dot_dimension_numbers<[1], [0], [0], [1], [0, 0, 1, 1], [], []>} : vector<24x32xf32>, vector<32x64xf32>, vector<24x64xf32> -> vector<24x64xf32>
    %c1_244 = arith.constant 1 : index
    %c1_245 = arith.constant 1 : index
    %c0_246 = arith.constant 0 : index
    %c0_247 = arith.constant 0 : index
    %310 = vector.load %arg20[%c1_244, %c1_245, %c0_246, %c0_247] : memref<2x4x32x64xf32, #tpu.memory_space<vmem>>, vector<1x1x32x64xf32>
    %311 = vector.shape_cast %310 : vector<1x1x32x64xf32> to vector<32x64xf32>
    %cst_248 = arith.constant dense<0.000000e+00> : vector<24x64xf32>
    %312 = tpu.matmul %276, %311, %cst_248 {dimension_numbers = #tpu.dot_dimension_numbers<[1], [0], [0], [1], [0, 0, 1, 1], [], []>} : vector<24x32xf32>, vector<32x64xf32>, vector<24x64xf32> -> vector<24x64xf32>
    %cst_249 = arith.constant dense<0.000000e+00> : vector<24x24xf32>
    %313 = tpu.matmul %306, %309, %cst_249 {dimension_numbers = #tpu.dot_dimension_numbers<[1], [1], [0], [0], [0, 0, 1, 0], [], []>} : vector<24x64xf32>, vector<24x64xf32>, vector<24x24xf32> -> vector<24x24xf32>
    %314 = arith.addf %313, %86 : vector<24x24xf32>
    %cst_250 = arith.constant dense<0xFF800000> : vector<24xf32>
    %315 = vector.multi_reduction <maximumf>, %314, %cst_250 [1] : vector<24x24xf32> to vector<24xf32>
    %316 = vector.shape_cast %315 : vector<24xf32> to vector<24x1xf32>
    %317 = vector.broadcast %316 : vector<24x1xf32> to vector<24x24xf32>
    %318 = arith.subf %314, %317 : vector<24x24xf32>
    %319 = math.exp %318 : vector<24x24xf32>
    %cst_251 = arith.constant dense<0.000000e+00> : vector<24xf32>
    %320 = vector.multi_reduction <add>, %319, %cst_251 [1] : vector<24x24xf32> to vector<24xf32>
    %321 = vector.shape_cast %320 : vector<24xf32> to vector<24x1xf32>
    %322 = tpu.reciprocal %321 {approx = true} : vector<24x1xf32> -> vector<24x1xf32>
    %323 = vector.broadcast %322 : vector<24x1xf32> to vector<24x24xf32>
    %324 = arith.mulf %319, %323 : vector<24x24xf32>
    %cst_252 = arith.constant dense<0.000000e+00> : vector<24x64xf32>
    %325 = tpu.matmul %324, %312, %cst_252 {dimension_numbers = #tpu.dot_dimension_numbers<[1], [0], [0], [1], [0, 0, 1, 1], [], []>} : vector<24x24xf32>, vector<24x64xf32>, vector<24x64xf32> -> vector<24x64xf32>
    %c1_253 = arith.constant 1 : index
    %c1_254 = arith.constant 1 : index
    %c0_255 = arith.constant 0 : index
    %c0_256 = arith.constant 0 : index
    %326 = vector.load %arg21[%c1_253, %c1_254, %c0_255, %c0_256] : memref<2x4x64x32xf32, #tpu.memory_space<vmem>>, vector<1x1x64x32xf32>
    %327 = vector.shape_cast %326 : vector<1x1x64x32xf32> to vector<64x32xf32>
    %cst_257 = arith.constant dense<0.000000e+00> : vector<24x32xf32>
    %328 = tpu.matmul %325, %327, %cst_257 {dimension_numbers = #tpu.dot_dimension_numbers<[1], [0], [0], [1], [0, 0, 1, 1], [], []>} : vector<24x64xf32>, vector<64x32xf32>, vector<24x32xf32> -> vector<24x32xf32>
    %329 = arith.addf %303, %328 : vector<24x32xf32>
    %c1_258 = arith.constant 1 : index
    %c2_259 = arith.constant 2 : index
    %c0_260 = arith.constant 0 : index
    %c0_261 = arith.constant 0 : index
    %330 = vector.load %arg18[%c1_258, %c2_259, %c0_260, %c0_261] : memref<2x4x32x64xf32, #tpu.memory_space<vmem>>, vector<1x1x32x64xf32>
    %331 = vector.shape_cast %330 : vector<1x1x32x64xf32> to vector<32x64xf32>
    %cst_262 = arith.constant dense<0.000000e+00> : vector<24x64xf32>
    %332 = tpu.matmul %276, %331, %cst_262 {dimension_numbers = #tpu.dot_dimension_numbers<[1], [0], [0], [1], [0, 0, 1, 1], [], []>} : vector<24x32xf32>, vector<32x64xf32>, vector<24x64xf32> -> vector<24x64xf32>
    %c1_263 = arith.constant 1 : index
    %c2_264 = arith.constant 2 : index
    %c0_265 = arith.constant 0 : index
    %c0_266 = arith.constant 0 : index
    %333 = vector.load %arg19[%c1_263, %c2_264, %c0_265, %c0_266] : memref<2x4x32x64xf32, #tpu.memory_space<vmem>>, vector<1x1x32x64xf32>
    %334 = vector.shape_cast %333 : vector<1x1x32x64xf32> to vector<32x64xf32>
    %cst_267 = arith.constant dense<0.000000e+00> : vector<24x64xf32>
    %335 = tpu.matmul %276, %334, %cst_267 {dimension_numbers = #tpu.dot_dimension_numbers<[1], [0], [0], [1], [0, 0, 1, 1], [], []>} : vector<24x32xf32>, vector<32x64xf32>, vector<24x64xf32> -> vector<24x64xf32>
    %c1_268 = arith.constant 1 : index
    %c2_269 = arith.constant 2 : index
    %c0_270 = arith.constant 0 : index
    %c0_271 = arith.constant 0 : index
    %336 = vector.load %arg20[%c1_268, %c2_269, %c0_270, %c0_271] : memref<2x4x32x64xf32, #tpu.memory_space<vmem>>, vector<1x1x32x64xf32>
    %337 = vector.shape_cast %336 : vector<1x1x32x64xf32> to vector<32x64xf32>
    %cst_272 = arith.constant dense<0.000000e+00> : vector<24x64xf32>
    %338 = tpu.matmul %276, %337, %cst_272 {dimension_numbers = #tpu.dot_dimension_numbers<[1], [0], [0], [1], [0, 0, 1, 1], [], []>} : vector<24x32xf32>, vector<32x64xf32>, vector<24x64xf32> -> vector<24x64xf32>
    %cst_273 = arith.constant dense<0.000000e+00> : vector<24x24xf32>
    %339 = tpu.matmul %332, %335, %cst_273 {dimension_numbers = #tpu.dot_dimension_numbers<[1], [1], [0], [0], [0, 0, 1, 0], [], []>} : vector<24x64xf32>, vector<24x64xf32>, vector<24x24xf32> -> vector<24x24xf32>
    %340 = arith.addf %339, %86 : vector<24x24xf32>
    %cst_274 = arith.constant dense<0xFF800000> : vector<24xf32>
    %341 = vector.multi_reduction <maximumf>, %340, %cst_274 [1] : vector<24x24xf32> to vector<24xf32>
    %342 = vector.shape_cast %341 : vector<24xf32> to vector<24x1xf32>
    %343 = vector.broadcast %342 : vector<24x1xf32> to vector<24x24xf32>
    %344 = arith.subf %340, %343 : vector<24x24xf32>
    %345 = math.exp %344 : vector<24x24xf32>
    %cst_275 = arith.constant dense<0.000000e+00> : vector<24xf32>
    %346 = vector.multi_reduction <add>, %345, %cst_275 [1] : vector<24x24xf32> to vector<24xf32>
    %347 = vector.shape_cast %346 : vector<24xf32> to vector<24x1xf32>
    %348 = tpu.reciprocal %347 {approx = true} : vector<24x1xf32> -> vector<24x1xf32>
    %349 = vector.broadcast %348 : vector<24x1xf32> to vector<24x24xf32>
    %350 = arith.mulf %345, %349 : vector<24x24xf32>
    %cst_276 = arith.constant dense<0.000000e+00> : vector<24x64xf32>
    %351 = tpu.matmul %350, %338, %cst_276 {dimension_numbers = #tpu.dot_dimension_numbers<[1], [0], [0], [1], [0, 0, 1, 1], [], []>} : vector<24x24xf32>, vector<24x64xf32>, vector<24x64xf32> -> vector<24x64xf32>
    %c1_277 = arith.constant 1 : index
    %c2_278 = arith.constant 2 : index
    %c0_279 = arith.constant 0 : index
    %c0_280 = arith.constant 0 : index
    %352 = vector.load %arg21[%c1_277, %c2_278, %c0_279, %c0_280] : memref<2x4x64x32xf32, #tpu.memory_space<vmem>>, vector<1x1x64x32xf32>
    %353 = vector.shape_cast %352 : vector<1x1x64x32xf32> to vector<64x32xf32>
    %cst_281 = arith.constant dense<0.000000e+00> : vector<24x32xf32>
    %354 = tpu.matmul %351, %353, %cst_281 {dimension_numbers = #tpu.dot_dimension_numbers<[1], [0], [0], [1], [0, 0, 1, 1], [], []>} : vector<24x64xf32>, vector<64x32xf32>, vector<24x32xf32> -> vector<24x32xf32>
    %355 = arith.addf %329, %354 : vector<24x32xf32>
    %c1_282 = arith.constant 1 : index
    %c3_283 = arith.constant 3 : index
    %c0_284 = arith.constant 0 : index
    %c0_285 = arith.constant 0 : index
    %356 = vector.load %arg18[%c1_282, %c3_283, %c0_284, %c0_285] : memref<2x4x32x64xf32, #tpu.memory_space<vmem>>, vector<1x1x32x64xf32>
    %357 = vector.shape_cast %356 : vector<1x1x32x64xf32> to vector<32x64xf32>
    %cst_286 = arith.constant dense<0.000000e+00> : vector<24x64xf32>
    %358 = tpu.matmul %276, %357, %cst_286 {dimension_numbers = #tpu.dot_dimension_numbers<[1], [0], [0], [1], [0, 0, 1, 1], [], []>} : vector<24x32xf32>, vector<32x64xf32>, vector<24x64xf32> -> vector<24x64xf32>
    %c1_287 = arith.constant 1 : index
    %c3_288 = arith.constant 3 : index
    %c0_289 = arith.constant 0 : index
    %c0_290 = arith.constant 0 : index
    %359 = vector.load %arg19[%c1_287, %c3_288, %c0_289, %c0_290] : memref<2x4x32x64xf32, #tpu.memory_space<vmem>>, vector<1x1x32x64xf32>
    %360 = vector.shape_cast %359 : vector<1x1x32x64xf32> to vector<32x64xf32>
    %cst_291 = arith.constant dense<0.000000e+00> : vector<24x64xf32>
    %361 = tpu.matmul %276, %360, %cst_291 {dimension_numbers = #tpu.dot_dimension_numbers<[1], [0], [0], [1], [0, 0, 1, 1], [], []>} : vector<24x32xf32>, vector<32x64xf32>, vector<24x64xf32> -> vector<24x64xf32>
    %c1_292 = arith.constant 1 : index
    %c3_293 = arith.constant 3 : index
    %c0_294 = arith.constant 0 : index
    %c0_295 = arith.constant 0 : index
    %362 = vector.load %arg20[%c1_292, %c3_293, %c0_294, %c0_295] : memref<2x4x32x64xf32, #tpu.memory_space<vmem>>, vector<1x1x32x64xf32>
    %363 = vector.shape_cast %362 : vector<1x1x32x64xf32> to vector<32x64xf32>
    %cst_296 = arith.constant dense<0.000000e+00> : vector<24x64xf32>
    %364 = tpu.matmul %276, %363, %cst_296 {dimension_numbers = #tpu.dot_dimension_numbers<[1], [0], [0], [1], [0, 0, 1, 1], [], []>} : vector<24x32xf32>, vector<32x64xf32>, vector<24x64xf32> -> vector<24x64xf32>
    %cst_297 = arith.constant dense<0.000000e+00> : vector<24x24xf32>
    %365 = tpu.matmul %358, %361, %cst_297 {dimension_numbers = #tpu.dot_dimension_numbers<[1], [1], [0], [0], [0, 0, 1, 0], [], []>} : vector<24x64xf32>, vector<24x64xf32>, vector<24x24xf32> -> vector<24x24xf32>
    %366 = arith.addf %365, %86 : vector<24x24xf32>
    %cst_298 = arith.constant dense<0xFF800000> : vector<24xf32>
    %367 = vector.multi_reduction <maximumf>, %366, %cst_298 [1] : vector<24x24xf32> to vector<24xf32>
    %368 = vector.shape_cast %367 : vector<24xf32> to vector<24x1xf32>
    %369 = vector.broadcast %368 : vector<24x1xf32> to vector<24x24xf32>
    %370 = arith.subf %366, %369 : vector<24x24xf32>
    %371 = math.exp %370 : vector<24x24xf32>
    %cst_299 = arith.constant dense<0.000000e+00> : vector<24xf32>
    %372 = vector.multi_reduction <add>, %371, %cst_299 [1] : vector<24x24xf32> to vector<24xf32>
    %373 = vector.shape_cast %372 : vector<24xf32> to vector<24x1xf32>
    %374 = tpu.reciprocal %373 {approx = true} : vector<24x1xf32> -> vector<24x1xf32>
    %375 = vector.broadcast %374 : vector<24x1xf32> to vector<24x24xf32>
    %376 = arith.mulf %371, %375 : vector<24x24xf32>
    %cst_300 = arith.constant dense<0.000000e+00> : vector<24x64xf32>
    %377 = tpu.matmul %376, %364, %cst_300 {dimension_numbers = #tpu.dot_dimension_numbers<[1], [0], [0], [1], [0, 0, 1, 1], [], []>} : vector<24x24xf32>, vector<24x64xf32>, vector<24x64xf32> -> vector<24x64xf32>
    %c1_301 = arith.constant 1 : index
    %c3_302 = arith.constant 3 : index
    %c0_303 = arith.constant 0 : index
    %c0_304 = arith.constant 0 : index
    %378 = vector.load %arg21[%c1_301, %c3_302, %c0_303, %c0_304] : memref<2x4x64x32xf32, #tpu.memory_space<vmem>>, vector<1x1x64x32xf32>
    %379 = vector.shape_cast %378 : vector<1x1x64x32xf32> to vector<64x32xf32>
    %cst_305 = arith.constant dense<0.000000e+00> : vector<24x32xf32>
    %380 = tpu.matmul %377, %379, %cst_305 {dimension_numbers = #tpu.dot_dimension_numbers<[1], [0], [0], [1], [0, 0, 1, 1], [], []>} : vector<24x64xf32>, vector<64x32xf32>, vector<24x32xf32> -> vector<24x32xf32>
    %381 = arith.addf %355, %380 : vector<24x32xf32>
    %c1_306 = arith.constant 1 : index
    %c0_307 = arith.constant 0 : index
    %c0_308 = arith.constant 0 : index
    %382 = vector.load %arg22[%c1_306, %c0_307, %c0_308] : memref<2x1x32xf32, #tpu.memory_space<vmem>>, vector<1x1x32xf32>
    %383 = vector.shape_cast %382 : vector<1x1x32xf32> to vector<1x32xf32>
    %384 = vector.broadcast %383 : vector<1x32xf32> to vector<24x32xf32>
    %385 = arith.addf %381, %384 : vector<24x32xf32>
    %386 = arith.addf %385, %276 : vector<24x32xf32>
    %c1_309 = arith.constant 1 : index
    %c0_310 = arith.constant 0 : index
    %c0_311 = arith.constant 0 : index
    %387 = vector.load %arg23[%c1_309, %c0_310, %c0_311] : memref<2x1x32xf32, #tpu.memory_space<vmem>>, vector<1x1x32xf32>
    %388 = vector.shape_cast %387 : vector<1x1x32xf32> to vector<1x32xf32>
    %c1_312 = arith.constant 1 : index
    %c0_313 = arith.constant 0 : index
    %c0_314 = arith.constant 0 : index
    %389 = vector.load %arg24[%c1_312, %c0_313, %c0_314] : memref<2x1x32xf32, #tpu.memory_space<vmem>>, vector<1x1x32xf32>
    %390 = vector.shape_cast %389 : vector<1x1x32xf32> to vector<1x32xf32>
    %cst_315 = arith.constant dense<0.000000e+00> : vector<24xf32>
    %391 = vector.multi_reduction <add>, %386, %cst_315 [1] : vector<24x32xf32> to vector<24xf32>
    %392 = vector.shape_cast %391 : vector<24xf32> to vector<24x1xf32>
    %cst_316 = arith.constant 3.200000e+01 : f32
    %393 = vector.broadcast %cst_316 : f32 to vector<24x1xf32>
    %394 = arith.divf %392, %393 : vector<24x1xf32>
    %395 = vector.broadcast %394 : vector<24x1xf32> to vector<24x32xf32>
    %396 = arith.subf %386, %395 : vector<24x32xf32>
    %397 = arith.mulf %396, %396 : vector<24x32xf32>
    %cst_317 = arith.constant dense<0.000000e+00> : vector<24xf32>
    %398 = vector.multi_reduction <add>, %397, %cst_317 [1] : vector<24x32xf32> to vector<24xf32>
    %399 = vector.shape_cast %398 : vector<24xf32> to vector<24x1xf32>
    %cst_318 = arith.constant 3.200000e+01 : f32
    %400 = vector.broadcast %cst_318 : f32 to vector<24x1xf32>
    %401 = arith.divf %399, %400 : vector<24x1xf32>
    %402 = vector.broadcast %394 : vector<24x1xf32> to vector<24x32xf32>
    %403 = arith.subf %386, %402 : vector<24x32xf32>
    %cst_319 = arith.constant 9.99999997E-7 : f32
    %404 = vector.broadcast %cst_319 : f32 to vector<24x1xf32>
    %405 = arith.addf %401, %404 : vector<24x1xf32>
    %406 = math.rsqrt %405 : vector<24x1xf32>
    %407 = vector.broadcast %406 : vector<24x1xf32> to vector<24x32xf32>
    %408 = arith.mulf %403, %407 : vector<24x32xf32>
    %409 = vector.broadcast %388 : vector<1x32xf32> to vector<24x32xf32>
    %410 = arith.mulf %408, %409 : vector<24x32xf32>
    %411 = vector.broadcast %390 : vector<1x32xf32> to vector<24x32xf32>
    %412 = arith.addf %410, %411 : vector<24x32xf32>
    %c1_320 = arith.constant 1 : index
    %c0_321 = arith.constant 0 : index
    %c0_322 = arith.constant 0 : index
    %413 = vector.load %arg25[%c1_320, %c0_321, %c0_322] : memref<2x32x32xf32, #tpu.memory_space<vmem>>, vector<1x32x32xf32>
    %414 = vector.shape_cast %413 : vector<1x32x32xf32> to vector<32x32xf32>
    %cst_323 = arith.constant dense<0.000000e+00> : vector<24x32xf32>
    %415 = tpu.matmul %412, %414, %cst_323 {dimension_numbers = #tpu.dot_dimension_numbers<[1], [0], [0], [1], [0, 0, 1, 1], [], []>} : vector<24x32xf32>, vector<32x32xf32>, vector<24x32xf32> -> vector<24x32xf32>
    %c1_324 = arith.constant 1 : index
    %c0_325 = arith.constant 0 : index
    %c0_326 = arith.constant 0 : index
    %416 = vector.load %arg26[%c1_324, %c0_325, %c0_326] : memref<2x1x32xf32, #tpu.memory_space<vmem>>, vector<1x1x32xf32>
    %417 = vector.shape_cast %416 : vector<1x1x32xf32> to vector<1x32xf32>
    %418 = vector.broadcast %417 : vector<1x32xf32> to vector<24x32xf32>
    %419 = arith.addf %415, %418 : vector<24x32xf32>
    %cst_327 = arith.constant 5.000000e-01 : f32
    %420 = vector.broadcast %cst_327 : f32 to vector<24x32xf32>
    %421 = arith.mulf %420, %419 : vector<24x32xf32>
    %cst_328 = arith.constant 4.471500e-02 : f32
    %422 = vector.broadcast %cst_328 : f32 to vector<24x32xf32>
    %423 = arith.mulf %422, %419 : vector<24x32xf32>
    %424 = arith.mulf %423, %419 : vector<24x32xf32>
    %425 = arith.mulf %424, %419 : vector<24x32xf32>
    %426 = arith.addf %419, %425 : vector<24x32xf32>
    %cst_329 = arith.constant 0.797884583 : f32
    %427 = vector.broadcast %cst_329 : f32 to vector<24x32xf32>
    %428 = arith.mulf %427, %426 : vector<24x32xf32>
    %429 = math.tanh %428 : vector<24x32xf32>
    %cst_330 = arith.constant 1.000000e+00 : f32
    %430 = vector.broadcast %cst_330 : f32 to vector<24x32xf32>
    %431 = arith.addf %430, %429 : vector<24x32xf32>
    %432 = arith.mulf %421, %431 : vector<24x32xf32>
    %c1_331 = arith.constant 1 : index
    %c0_332 = arith.constant 0 : index
    %c0_333 = arith.constant 0 : index
    %433 = vector.load %arg27[%c1_331, %c0_332, %c0_333] : memref<2x32x32xf32, #tpu.memory_space<vmem>>, vector<1x32x32xf32>
    %434 = vector.shape_cast %433 : vector<1x32x32xf32> to vector<32x32xf32>
    %cst_334 = arith.constant dense<0.000000e+00> : vector<24x32xf32>
    %435 = tpu.matmul %432, %434, %cst_334 {dimension_numbers = #tpu.dot_dimension_numbers<[1], [0], [0], [1], [0, 0, 1, 1], [], []>} : vector<24x32xf32>, vector<32x32xf32>, vector<24x32xf32> -> vector<24x32xf32>
    %c1_335 = arith.constant 1 : index
    %c0_336 = arith.constant 0 : index
    %c0_337 = arith.constant 0 : index
    %436 = vector.load %arg28[%c1_335, %c0_336, %c0_337] : memref<2x1x32xf32, #tpu.memory_space<vmem>>, vector<1x1x32xf32>
    %437 = vector.shape_cast %436 : vector<1x1x32xf32> to vector<1x32xf32>
    %438 = vector.broadcast %437 : vector<1x32xf32> to vector<24x32xf32>
    %439 = arith.addf %435, %438 : vector<24x32xf32>
    %440 = arith.addf %439, %412 : vector<24x32xf32>
    %c1_338 = arith.constant 1 : index
    %c0_339 = arith.constant 0 : index
    %c0_340 = arith.constant 0 : index
    %441 = vector.load %arg29[%c1_338, %c0_339, %c0_340] : memref<2x1x32xf32, #tpu.memory_space<vmem>>, vector<1x1x32xf32>
    %442 = vector.shape_cast %441 : vector<1x1x32xf32> to vector<1x32xf32>
    %c1_341 = arith.constant 1 : index
    %c0_342 = arith.constant 0 : index
    %c0_343 = arith.constant 0 : index
    %443 = vector.load %arg30[%c1_341, %c0_342, %c0_343] : memref<2x1x32xf32, #tpu.memory_space<vmem>>, vector<1x1x32xf32>
    %444 = vector.shape_cast %443 : vector<1x1x32xf32> to vector<1x32xf32>
    %cst_344 = arith.constant dense<0.000000e+00> : vector<24xf32>
    %445 = vector.multi_reduction <add>, %440, %cst_344 [1] : vector<24x32xf32> to vector<24xf32>
    %446 = vector.shape_cast %445 : vector<24xf32> to vector<24x1xf32>
    %cst_345 = arith.constant 3.200000e+01 : f32
    %447 = vector.broadcast %cst_345 : f32 to vector<24x1xf32>
    %448 = arith.divf %446, %447 : vector<24x1xf32>
    %449 = vector.broadcast %448 : vector<24x1xf32> to vector<24x32xf32>
    %450 = arith.subf %440, %449 : vector<24x32xf32>
    %451 = arith.mulf %450, %450 : vector<24x32xf32>
    %cst_346 = arith.constant dense<0.000000e+00> : vector<24xf32>
    %452 = vector.multi_reduction <add>, %451, %cst_346 [1] : vector<24x32xf32> to vector<24xf32>
    %453 = vector.shape_cast %452 : vector<24xf32> to vector<24x1xf32>
    %cst_347 = arith.constant 3.200000e+01 : f32
    %454 = vector.broadcast %cst_347 : f32 to vector<24x1xf32>
    %455 = arith.divf %453, %454 : vector<24x1xf32>
    %456 = vector.broadcast %448 : vector<24x1xf32> to vector<24x32xf32>
    %457 = arith.subf %440, %456 : vector<24x32xf32>
    %cst_348 = arith.constant 9.99999997E-7 : f32
    %458 = vector.broadcast %cst_348 : f32 to vector<24x1xf32>
    %459 = arith.addf %455, %458 : vector<24x1xf32>
    %460 = math.rsqrt %459 : vector<24x1xf32>
    %461 = vector.broadcast %460 : vector<24x1xf32> to vector<24x32xf32>
    %462 = arith.mulf %457, %461 : vector<24x32xf32>
    %463 = vector.broadcast %442 : vector<1x32xf32> to vector<24x32xf32>
    %464 = arith.mulf %462, %463 : vector<24x32xf32>
    %465 = vector.broadcast %444 : vector<1x32xf32> to vector<24x32xf32>
    %466 = arith.addf %464, %465 : vector<24x32xf32>
    %cst_349 = arith.constant 0.000000e+00 : f32
    %467 = vector.broadcast %cst_349 : f32 to vector<1x128xf32>
    %c0_350 = arith.constant 0 : index
    %c0_351 = arith.constant 0 : index
    %c0_352 = arith.constant 0 : index
    %468 = vector.load %arg31[%c0_350, %c0_351, %c0_352] : memref<2x1x24xf32, #tpu.memory_space<vmem>>, vector<1x1x24xf32>
    %469 = vector.shape_cast %468 : vector<1x1x24xf32> to vector<1x24xf32>
    %cst_353 = arith.constant dense<0.000000e+00> : vector<1x32xf32>
    %470 = tpu.matmul %469, %466, %cst_353 {dimension_numbers = #tpu.dot_dimension_numbers<[1], [0], [0], [1], [0, 0, 1, 1], [], []>} : vector<1x24xf32>, vector<24x32xf32>, vector<1x32xf32> -> vector<1x32xf32>
    %c0_354 = arith.constant 0 : index
    %c0_355 = arith.constant 0 : index
    %c0_356 = arith.constant 0 : index
    %471 = vector.load %arg32[%c0_354, %c0_355, %c0_356] : memref<2x32x128xf32, #tpu.memory_space<vmem>>, vector<1x32x128xf32>
    %472 = vector.shape_cast %471 : vector<1x32x128xf32> to vector<32x128xf32>
    %cst_357 = arith.constant dense<0.000000e+00> : vector<1x128xf32>
    %473 = tpu.matmul %470, %472, %cst_357 {dimension_numbers = #tpu.dot_dimension_numbers<[1], [0], [0], [1], [0, 0, 1, 1], [], []>} : vector<1x32xf32>, vector<32x128xf32>, vector<1x128xf32> -> vector<1x128xf32>
    %474 = arith.addf %467, %473 : vector<1x128xf32>
    %c1_358 = arith.constant 1 : index
    %c0_359 = arith.constant 0 : index
    %c0_360 = arith.constant 0 : index
    %475 = vector.load %arg31[%c1_358, %c0_359, %c0_360] : memref<2x1x24xf32, #tpu.memory_space<vmem>>, vector<1x1x24xf32>
    %476 = vector.shape_cast %475 : vector<1x1x24xf32> to vector<1x24xf32>
    %cst_361 = arith.constant dense<0.000000e+00> : vector<1x32xf32>
    %477 = tpu.matmul %476, %466, %cst_361 {dimension_numbers = #tpu.dot_dimension_numbers<[1], [0], [0], [1], [0, 0, 1, 1], [], []>} : vector<1x24xf32>, vector<24x32xf32>, vector<1x32xf32> -> vector<1x32xf32>
    %c1_362 = arith.constant 1 : index
    %c0_363 = arith.constant 0 : index
    %c0_364 = arith.constant 0 : index
    %478 = vector.load %arg32[%c1_362, %c0_363, %c0_364] : memref<2x32x128xf32, #tpu.memory_space<vmem>>, vector<1x32x128xf32>
    %479 = vector.shape_cast %478 : vector<1x32x128xf32> to vector<32x128xf32>
    %cst_365 = arith.constant dense<0.000000e+00> : vector<1x128xf32>
    %480 = tpu.matmul %477, %479, %cst_365 {dimension_numbers = #tpu.dot_dimension_numbers<[1], [0], [0], [1], [0, 0, 1, 1], [], []>} : vector<1x32xf32>, vector<32x128xf32>, vector<1x128xf32> -> vector<1x128xf32>
    %481 = arith.addf %474, %480 : vector<1x128xf32>
    %482 = vector.shape_cast %481 : vector<1x128xf32> to vector<1x128xf32>
    %483 = vector.broadcast %482 : vector<1x128xf32> to vector<8x128xf32>
    %c0_366 = arith.constant 0 : index
    %c0_367 = arith.constant 0 : index
    %c0_368 = arith.constant 0 : index
    %484 = vector.load %arg33[%c0_366, %c0_367, %c0_368] : memref<1x8x128xf32, #tpu.memory_space<vmem>>, vector<1x8x128xf32>
    %485 = vector.shape_cast %484 : vector<1x8x128xf32> to vector<8x128xf32>
    %486 = vector.shape_cast %483 : vector<8x128xf32> to vector<1x8x128xf32>
    tpu.vector_store %arg33[%c0_366, %c0_367, %c0_368], %486 {strides = array<i32>} : memref<1x8x128xf32, #tpu.memory_space<vmem>>, vector<1x8x128xf32>,
    return
  }
  func.func @transform_0(%arg0: i32) -> (i32, i32, i32) {
    %c0_i32 = arith.constant 0 : i32
    %c0_i32_0 = arith.constant 0 : i32
    %c0_i32_1 = arith.constant 0 : i32
    return %arg0, %c0_i32, %c0_i32_0 : i32, i32, i32
  }
  func.func @transform_1(%arg0: i32) -> (i32, i32, i32) {
    %c0_i32 = arith.constant 0 : i32
    %c0_i32_0 = arith.constant 0 : i32
    %c0_i32_1 = arith.constant 0 : i32
    return %arg0, %c0_i32, %c0_i32_0 : i32, i32, i32
  }
  func.func @transform_2(%arg0: i32) -> (i32, i32) {
    %c0_i32 = arith.constant 0 : i32
    %c0_i32_0 = arith.constant 0 : i32
    %c0_i32_1 = arith.constant 0 : i32
    return %c0_i32, %c0_i32_0 : i32, i32
  }
  func.func @transform_3(%arg0: i32) -> (i32, i32, i32) {
    %c0_i32 = arith.constant 0 : i32
    %c0_i32_0 = arith.constant 0 : i32
    %c0_i32_1 = arith.constant 0 : i32
    %c0_i32_2 = arith.constant 0 : i32
    return %c0_i32, %c0_i32_0, %c0_i32_1 : i32, i32, i32
  }
  func.func @transform_4(%arg0: i32) -> (i32, i32, i32) {
    %c0_i32 = arith.constant 0 : i32
    %c0_i32_0 = arith.constant 0 : i32
    %c0_i32_1 = arith.constant 0 : i32
    %c0_i32_2 = arith.constant 0 : i32
    return %c0_i32, %c0_i32_0, %c0_i32_1 : i32, i32, i32
  }
  func.func @transform_5(%arg0: i32) -> (i32, i32) {
    %c0_i32 = arith.constant 0 : i32
    %c0_i32_0 = arith.constant 0 : i32
    %c0_i32_1 = arith.constant 0 : i32
    return %c0_i32, %c0_i32_0 : i32, i32
  }
  func.func @transform_6(%arg0: i32) -> (i32, i32) {
    %c0_i32 = arith.constant 0 : i32
    %c0_i32_0 = arith.constant 0 : i32
    %c0_i32_1 = arith.constant 0 : i32
    return %c0_i32, %c0_i32_0 : i32, i32
  }
  func.func @transform_7(%arg0: i32) -> (i32, i32) {
    %c0_i32 = arith.constant 0 : i32
    %c0_i32_0 = arith.constant 0 : i32
    %c0_i32_1 = arith.constant 0 : i32
    return %c0_i32, %c0_i32_0 : i32, i32
  }
  func.func @transform_8(%arg0: i32) -> (i32, i32) {
    %c0_i32 = arith.constant 0 : i32
    %c0_i32_0 = arith.constant 0 : i32
    %c0_i32_1 = arith.constant 0 : i32
    return %c0_i32, %c0_i32_0 : i32, i32
  }
  func.func @transform_9(%arg0: i32) -> (i32, i32, i32) {
    %c0_i32 = arith.constant 0 : i32
    %c0_i32_0 = arith.constant 0 : i32
    %c0_i32_1 = arith.constant 0 : i32
    %c0_i32_2 = arith.constant 0 : i32
    return %c0_i32, %c0_i32_0, %c0_i32_1 : i32, i32, i32
  }
  func.func @transform_10(%arg0: i32) -> (i32, i32, i32) {
    %c0_i32 = arith.constant 0 : i32
    %c0_i32_0 = arith.constant 0 : i32
    %c0_i32_1 = arith.constant 0 : i32
    %c0_i32_2 = arith.constant 0 : i32
    return %c0_i32, %c0_i32_0, %c0_i32_1 : i32, i32, i32
  }
  func.func @transform_11(%arg0: i32) -> (i32, i32) {
    %c0_i32 = arith.constant 0 : i32
    %c0_i32_0 = arith.constant 0 : i32
    %c0_i32_1 = arith.constant 0 : i32
    return %c0_i32, %c0_i32_0 : i32, i32
  }
  func.func @transform_12(%arg0: i32) -> (i32, i32) {
    %c0_i32 = arith.constant 0 : i32
    %c0_i32_0 = arith.constant 0 : i32
    %c0_i32_1 = arith.constant 0 : i32
    return %c0_i32, %c0_i32_0 : i32, i32
  }
  func.func @transform_13(%arg0: i32) -> (i32, i32) {
    %c0_i32 = arith.constant 0 : i32
    %c0_i32_0 = arith.constant 0 : i32
    %c0_i32_1 = arith.constant 0 : i32
    return %c0_i32, %c0_i32_0 : i32, i32
  }
  func.func @transform_14(%arg0: i32) -> (i32, i32) {
    %c0_i32 = arith.constant 0 : i32
    %c0_i32_0 = arith.constant 0 : i32
    %c0_i32_1 = arith.constant 0 : i32
    return %c0_i32, %c0_i32_0 : i32, i32
  }
  func.func @transform_15(%arg0: i32) -> (i32, i32) {
    %c0_i32 = arith.constant 0 : i32
    %c0_i32_0 = arith.constant 0 : i32
    %c0_i32_1 = arith.constant 0 : i32
    return %c0_i32, %c0_i32_0 : i32, i32
  }
  func.func @transform_16(%arg0: i32) -> (i32, i32) {
    %c0_i32 = arith.constant 0 : i32
    %c0_i32_0 = arith.constant 0 : i32
    %c0_i32_1 = arith.constant 0 : i32
    return %c0_i32, %c0_i32_0 : i32, i32
  }
  func.func @transform_17(%arg0: i32) -> (i32, i32, i32, i32) {
    %c0_i32 = arith.constant 0 : i32
    %c0_i32_0 = arith.constant 0 : i32
    %c0_i32_1 = arith.constant 0 : i32
    %c0_i32_2 = arith.constant 0 : i32
    %c0_i32_3 = arith.constant 0 : i32
    return %c0_i32, %c0_i32_0, %c0_i32_1, %c0_i32_2 : i32, i32, i32, i32
  }
  func.func @transform_18(%arg0: i32) -> (i32, i32, i32, i32) {
    %c0_i32 = arith.constant 0 : i32
    %c0_i32_0 = arith.constant 0 : i32
    %c0_i32_1 = arith.constant 0 : i32
    %c0_i32_2 = arith.constant 0 : i32
    %c0_i32_3 = arith.constant 0 : i32
    return %c0_i32, %c0_i32_0, %c0_i32_1, %c0_i32_2 : i32, i32, i32, i32
  }
  func.func @transform_19(%arg0: i32) -> (i32, i32, i32, i32) {
    %c0_i32 = arith.constant 0 : i32
    %c0_i32_0 = arith.constant 0 : i32
    %c0_i32_1 = arith.constant 0 : i32
    %c0_i32_2 = arith.constant 0 : i32
    %c0_i32_3 = arith.constant 0 : i32
    return %c0_i32, %c0_i32_0, %c0_i32_1, %c0_i32_2 : i32, i32, i32, i32
  }
  func.func @transform_20(%arg0: i32) -> (i32, i32, i32, i32) {
    %c0_i32 = arith.constant 0 : i32
    %c0_i32_0 = arith.constant 0 : i32
    %c0_i32_1 = arith.constant 0 : i32
    %c0_i32_2 = arith.constant 0 : i32
    %c0_i32_3 = arith.constant 0 : i32
    return %c0_i32, %c0_i32_0, %c0_i32_1, %c0_i32_2 : i32, i32, i32, i32
  }
  func.func @transform_21(%arg0: i32) -> (i32, i32, i32) {
    %c0_i32 = arith.constant 0 : i32
    %c0_i32_0 = arith.constant 0 : i32
    %c0_i32_1 = arith.constant 0 : i32
    %c0_i32_2 = arith.constant 0 : i32
    return %c0_i32, %c0_i32_0, %c0_i32_1 : i32, i32, i32
  }
  func.func @transform_22(%arg0: i32) -> (i32, i32, i32) {
    %c0_i32 = arith.constant 0 : i32
    %c0_i32_0 = arith.constant 0 : i32
    %c0_i32_1 = arith.constant 0 : i32
    %c0_i32_2 = arith.constant 0 : i32
    return %c0_i32, %c0_i32_0, %c0_i32_1 : i32, i32, i32
  }
  func.func @transform_23(%arg0: i32) -> (i32, i32, i32) {
    %c0_i32 = arith.constant 0 : i32
    %c0_i32_0 = arith.constant 0 : i32
    %c0_i32_1 = arith.constant 0 : i32
    %c0_i32_2 = arith.constant 0 : i32
    return %c0_i32, %c0_i32_0, %c0_i32_1 : i32, i32, i32
  }
  func.func @transform_24(%arg0: i32) -> (i32, i32, i32) {
    %c0_i32 = arith.constant 0 : i32
    %c0_i32_0 = arith.constant 0 : i32
    %c0_i32_1 = arith.constant 0 : i32
    %c0_i32_2 = arith.constant 0 : i32
    return %c0_i32, %c0_i32_0, %c0_i32_1 : i32, i32, i32
  }
  func.func @transform_25(%arg0: i32) -> (i32, i32, i32) {
    %c0_i32 = arith.constant 0 : i32
    %c0_i32_0 = arith.constant 0 : i32
    %c0_i32_1 = arith.constant 0 : i32
    %c0_i32_2 = arith.constant 0 : i32
    return %c0_i32, %c0_i32_0, %c0_i32_1 : i32, i32, i32
  }
  func.func @transform_26(%arg0: i32) -> (i32, i32, i32) {
    %c0_i32 = arith.constant 0 : i32
    %c0_i32_0 = arith.constant 0 : i32
    %c0_i32_1 = arith.constant 0 : i32
    %c0_i32_2 = arith.constant 0 : i32
    return %c0_i32, %c0_i32_0, %c0_i32_1 : i32, i32, i32
  }
  func.func @transform_27(%arg0: i32) -> (i32, i32, i32) {
    %c0_i32 = arith.constant 0 : i32
    %c0_i32_0 = arith.constant 0 : i32
    %c0_i32_1 = arith.constant 0 : i32
    %c0_i32_2 = arith.constant 0 : i32
    return %c0_i32, %c0_i32_0, %c0_i32_1 : i32, i32, i32
  }
  func.func @transform_28(%arg0: i32) -> (i32, i32, i32) {
    %c0_i32 = arith.constant 0 : i32
    %c0_i32_0 = arith.constant 0 : i32
    %c0_i32_1 = arith.constant 0 : i32
    %c0_i32_2 = arith.constant 0 : i32
    return %c0_i32, %c0_i32_0, %c0_i32_1 : i32, i32, i32
  }
  func.func @transform_29(%arg0: i32) -> (i32, i32, i32) {
    %c0_i32 = arith.constant 0 : i32
    %c0_i32_0 = arith.constant 0 : i32
    %c0_i32_1 = arith.constant 0 : i32
    %c0_i32_2 = arith.constant 0 : i32
    return %c0_i32, %c0_i32_0, %c0_i32_1 : i32, i32, i32
  }
  func.func @transform_30(%arg0: i32) -> (i32, i32, i32) {
    %c0_i32 = arith.constant 0 : i32
    %c0_i32_0 = arith.constant 0 : i32
    %c0_i32_1 = arith.constant 0 : i32
    %c0_i32_2 = arith.constant 0 : i32
    return %c0_i32, %c0_i32_0, %c0_i32_1 : i32, i32, i32
  }
  func.func @transform_31(%arg0: i32) -> (i32, i32, i32) {
    %c0_i32 = arith.constant 0 : i32
    %c0_i32_0 = arith.constant 0 : i32
    %c0_i32_1 = arith.constant 0 : i32
    %c0_i32_2 = arith.constant 0 : i32
    return %c0_i32, %c0_i32_0, %c0_i32_1 : i32, i32, i32
  }
  func.func @transform_32(%arg0: i32) -> (i32, i32, i32) {
    %c0_i32 = arith.constant 0 : i32
    %c0_i32_0 = arith.constant 0 : i32
    %c0_i32_1 = arith.constant 0 : i32
    return %arg0, %c0_i32, %c0_i32_0 : i32, i32, i32
  }
}

</mosaic_0001>

<bundles_post_ra>
// kernel: squeeze.1
= control target key start
LH: loop header
LB: loop body
LE: loop exit
PB: predicated region body
PF: predicated region fallthrough
CT: control target
= control target key end

     0   :  { %s106_s0 = inlined_call_operand.vmem [shape: f32[2,16], index: 0, kind: input, shape index: {}]   ;;  %s107_s1 = inlined_call_operand.hbm [shape: f32[2,4,4], index: 1, kind: output, shape index: {}]  }
   0x1   :  { %v5_v0 = vld [vmem:[%s106_s0] sm:$0x3] }
   0x2   :  { %6 = vst [vmem:[#allocation3] sm:$0x3] %v5_v0 }
   0x3   :  { %2 = vsyncpa [#allocation1], 0  ;;  %s77_s0 = smov 124   ;;  %s78_s8 = smov 116   ;;  %vm8_vm0 = vcmask 31744  }
   0x4   :  { %s79_s9 = smov 120   ;;  %s80_s10 = smov [#allocation0]  }
   0x5   :  { %s43_s11 = sshll.u32 %s80_s10, 4  ;;  %s44_s11 = int_to_ptr.vmem [resolvable:$true] %s43_s11 }
   0x6   :  { %s53_s12 = scalar_lea.vmem %s44_s11, 128  ;;  %p58_p1 = scmp.lt.s32.totalorder %s44_s11, %s44_s11 }
   0x7   :  { %p54_p0 = scmp.ne.s32.totalorder %s44_s11, %s53_s12  ;;  %p59_p2 = scmp.lt.s32.totalorder %s53_s12, %s53_s12 }
   0x9   :  { %v10_v1 = vld [vmem:[#allocation3] sm:$0x3]   ;;  %p60_p3 = por %p59_p2, %p58_p1 }
   0xa   :  { %v22_v2 = vld [vmem:[#allocation3] sm:$0x3]   ;;  %11 = vrot.lane.b32.xlu0 %v10_v1, %s77_s0 }
   0xb   :  { %23 = vrot.lane.b32.xlu1 %v22_v2, %s78_s8  ;;  %v7_v3 = vld [vmem:[#allocation3] sm:$0x3]   ;;  %p61_p4 = pnand %p60_p3, %p54_p0 }
   0xc   :  { %v16_v4 = vld [vmem:[#allocation3] sm:$0x3]   ;;  %9 = vst.msk [vmem:[#allocation2] ss:$8 sm:$0x3] %vm8_vm0, %v7_v3  }
   0xe   :  { %17 = vrot.lane.b32.xlu0 %v16_v4, %s79_s9 }
  0x7c   :  { %v12_v5 = vpop.permute.xlu0 %11  }
  0x7d   :  { %v24_v6 = vpop.permute.xlu1 %23   ;;  %15 = vst.msk [vmem:[#allocation2 + $0x1] ss:$8 sm:$0x3] %vm8_vm0, %v12_v5  }
  0x7e   :  { %27 = vst.msk [vmem:[#allocation2 + $0x3] ss:$8 sm:$0x3] %vm8_vm0, %v24_v6  }
  0x80   :  { %v18_v7 = vpop.permute.xlu0 %17  }
  0x81   :  { %21 = vst.msk [vmem:[#allocation2 + $0x2] ss:$8 sm:$0x3] %vm8_vm0, %v18_v7  }
  0x88   :  { %v31_v8 = vld [vmem:[#allocation2] sm:$0xf]  ;;  %v35_v9 = vld [vmem:[#allocation2 + $0x8] sm:$0xf] }
  0x89   :  { %33 = vst [vmem:[#allocation0] sm:$0xf] %v31_v8  ;;  %38 = vst [vmem:[#allocation0 + $0x4] sm:$0xf] %v35_v9 }
  0x8a   :  { %64 = shalt.err (!%p61_p4)
}
  0x8b   :  { %s65_s15 = scalar_lea.hbm %s107_s1, 128 }
  0x8c   :  { %p66_p5 = scmp.ne.s32.totalorder %s107_s1, %s65_s15  ;;  %p69_p6 = scmp.lt.u32.totalorder %s65_s15, %s107_s1 }
  0x8e   :  { %p71_p7 = pnand %p69_p6, %p66_p5 }
  0x90   :  { %74 = shalt.err (!%p71_p7)
}
  0x91   :  { %46 = dma.vmem_to_hbm [thread:$0]  %s44_s11, 128, %s107_s1, [#allocation1]  }
  0x92   :  { %75 = dma.done.wait [#allocation1], 128  }
  0x93   :  { %76 = vsyncadd [#allocation1], 4294967168 }
  0x94   :  { %48 = vsyncpa [#allocation1], 1 }

// kernel: model_forward.1
= control target key start
LH: loop header
LB: loop body
LE: loop exit
PB: predicated region body
PF: predicated region fallthrough
CT: control target
= control target key end

     0   :  { %s11766_s6 = smov 1   ;;  %s11767_s10 = smov 2   ;;  %s13580_s0 = inlined_call_operand.smem [shape: u32[33], index: -1, kind: input, shape index: {}] }
   0x1   :  { %s11836_s5 = sld [smem:[%s13580_s0]]   ;;  %s11768_s14 = smov 3  }
   0x2   :  { %s11841_s9 = sld [smem:[%s13580_s0 + %s11766_s6]]   ;;  %s11769_s18 = smov 4  }
   0x3   :  { %s11846_s13 = sld [smem:[%s13580_s0 + %s11767_s10]]   ;;  %s11770_s22 = smov 5  }
   0x4   :  { %s11851_s17 = sld [smem:[%s13580_s0 + %s11768_s14]]   ;;  %s11771_s26 = smov 6  }
   0x5   :  { %s11856_s21 = sld [smem:[%s13580_s0 + %s11769_s18]]   ;;  %s11772_s30 = smov 7  }
   0x6   :  { %s11861_s25 = sld [smem:[%s13580_s0 + %s11770_s22]]   ;;  %s11773_s4 = smov 8  }
   0x7   :  { %13611 = sst [smem:[#allocation45_spill]] %s11836_s5  ;;  %s11774_s10 = smov 9  }
   0x8   :  { %13612 = sst [smem:[#allocation46_spill]] %s11841_s9  ;;  %s11775_s15 = smov 10  }
   0x9   :  { %s11866_s29 = sld [smem:[%s13580_s0 + %s11771_s26]]   ;;  %s11776_s20 = smov 11  }
   0xa   :  { %s11871_s3 = sld [smem:[%s13580_s0 + %s11772_s30]]   ;;  %s11777_s26 = smov 12  }
   0xb   :  { %s11876_s8 = sld [smem:[%s13580_s0 + %s11773_s4]]   ;;  %s11778_s1 = smov 13  }
   0xc   :  { %s11881_s14 = sld [smem:[%s13580_s0 + %s11774_s10]]   ;;  %s11779_s7 = smov 14  }
   0xd   :  { %s11886_s19 = sld [smem:[%s13580_s0 + %s11775_s15]]   ;;  %s11780_s15 = smov 15  }
   0xe   :  { %s11891_s24 = sld [smem:[%s13580_s0 + %s11776_s20]]   ;;  %s11781_s22 = smov 16  }
   0xf   :  { %s11896_s30 = sld [smem:[%s13580_s0 + %s11777_s26]]   ;;  %s11782_s28 = smov 17  }
  0x10   :  { %13613 = sst [smem:[#allocation47_spill]] %s11871_s3 }
  0x11   :  { %13614 = sst [smem:[#allocation48_spill]] %s11876_s8 }
  0x12   :  { %s11901_s6 = sld [smem:[%s13580_s0 + %s11778_s1]]  }
  0x13   :  { %13615 = sst [smem:[#allocation49_spill]] %s11886_s19 }
  0x14   :  { %s11906_s12 = sld [smem:[%s13580_s0 + %s11779_s7]]   ;;  %s11783_s7 = smov 18  }
  0x15   :  { %13616 = sst [smem:[#allocation50_spill]] %s11896_s30 }
  0x16   :  { %s11911_s20 = sld [smem:[%s13580_s0 + %s11780_s15]]   ;;  %s11784_s15 = smov 19  }
  0x17   :  { %s11916_s27 = sld [smem:[%s13580_s0 + %s11781_s22]]   ;;  %s11785_s22 = smov 20  }
  0x18   :  { %13617 = sst [smem:[#allocation51_spill]] %s11901_s6 }
  0x19   :  { %s11921_s4 = sld [smem:[%s13580_s0 + %s11782_s28]]   ;;  %s11786_s28 = smov 21  }
  0x1a   :  { %13618 = sst [smem:[#allocation52_spill]] %s11906_s12 }
  0x1b   :  { %s11926_s30 = sld [smem:[%s13580_s0 + %s11783_s7]]   ;;  %s11787_s7 = smov 22  }
  0x1c   :  { %s11931_s19 = sld [smem:[%s13580_s0 + %s11784_s15]]   ;;  %s11788_s15 = smov 23  }
  0x1d   :  { %13619 = sst [smem:[#allocation53_spill]] %s11916_s27 }
  0x1e   :  { %s11936_s9 = sld [smem:[%s13580_s0 + %s11785_s22]]   ;;  %s11789_s22 = smov 24  }
  0x1f   :  { %13620 = sst [smem:[#allocation54_spill]] %s11921_s4 }
  0x20   :  { %s11941_s4 = sld [smem:[%s13580_s0 + %s11786_s28]]   ;;  %s11790_s28 = smov 25  }
  0x21   :  { %13621 = sst [smem:[#allocation55_spill]] %s11926_s30 }
  0x22   :  { %13622 = sst [smem:[#allocation56_spill]] %s11931_s19 }
  0x23   :  { %s11946_s30 = sld [smem:[%s13580_s0 + %s11787_s7]]   ;;  %s11791_s7 = smov 26  }
  0x24   :  { %13623 = sst [smem:[#allocation57_spill]] %s11936_s9 }
  0x25   :  { %s11951_s19 = sld [smem:[%s13580_s0 + %s11788_s15]]   ;;  %s11792_s15 = smov 27  }
  0x26   :  { %13624 = sst [smem:[#allocation58_spill]] %s11941_s4 }
  0x27   :  { %s11956_s9 = sld [smem:[%s13580_s0 + %s11789_s22]]   ;;  %s11793_s22 = smov 28  }
  0x28   :  { %s11961_s4 = sld [smem:[%s13580_s0 + %s11790_s28]]   ;;  %s11794_s28 = smov 29  }
  0x29   :  { %s11966_s5 = sld [smem:[%s13580_s0 + %s11791_s7]]   ;;  %s11795_s7 = smov 30  }
  0x2a   :  { %s11981_s27 = sld [smem:[%s13580_s0 + %s11794_s28]]  }
  0x2b   :  { %13625 = sst [smem:[#allocation59_spill]] %s11951_s19 }
  0x2c   :  { %s11971_s19 = sld [smem:[%s13580_s0 + %s11792_s15]]   ;;  %s11796_s15 = smov 31  }
  0x2d   :  { %13626 = sst [smem:[#allocation60_spill]] %s11956_s9 }
  0x2e   :  { %13627 = sst [smem:[#allocation61_spill]] %s11961_s4 }
  0x2f   :  { %13628 = sst [smem:[#allocation62_spill]] %s11966_s5 }
  0x30   :  { %s11976_s9 = sld [smem:[%s13580_s0 + %s11793_s22]]   ;;  %s11797_s22 = smov 32  }
  0x31   :  { %s11986_s5 = sld [smem:[%s13580_s0 + %s11795_s7]]  }
  0x32   :  { %13629 = sst [smem:[#allocation63_spill]] %s11971_s19 }
  0x33   :  { %s11991_s19 = sld [smem:[%s13580_s0 + %s11796_s15]]  }
  0x34   :  { %s11996_s12 = sld [smem:[%s13580_s0 + %s11797_s22]]  }
  0x36   :  { %13630 = sst [smem:[#allocation64_spill]] %s11976_s9 }
  0x37   :  { %13631 = sst [smem:[#allocation65_spill]] %s11986_s5 }
  0x38   :  { %70 = vsyncpa [#allocation3], 0 }
  0x39   :  { %71 = vsyncpa [#allocation5], 0 }
  0x3a   :  { %72 = vsyncpa [#allocation8], 0 }
  0x3b   :  { %73 = vsyncpa [#allocation11], 0 }
  0x3c   :  { %74 = vsyncpa [#allocation14], 0 }
  0x3d   :  { %75 = vsyncpa [#allocation17], 0 }
  0x3e   :  { %76 = vsyncpa [#allocation20], 0 }
  0x3f   :  { %77 = vsyncpa [#allocation23], 0 }
  0x40   :  { %78 = vsyncpa [#allocation26], 0 }
  0x41   :  { %79 = vsyncpa [#allocation29], 0 }
  0x42   :  { %80 = vsyncpa [#allocation32], 0  ;;  %s11998_s28 = smov 0  }
  0x43 LB: > { %s13632_s9 = sld [smem:[#allocation64_spill]]  ;;  %s13634_s6 = sld [smem:[#allocation51_spill]]  ;;  %s11764_s28 = sphi %s11998_s28, %s86_s28  }
  0x44   : > { %s13633_s8 = sld [smem:[#allocation48_spill]]  ;;  %s13635_s5 = sld [smem:[#allocation65_spill]] }
  0x45   : > { %s13636_s4 = sld [smem:[#allocation61_spill]]  ;;  %s13637_s3 = sld [smem:[#allocation47_spill]] }
  0x46   : > { %s12004_s0 = sadd.s32 4294967295, %s11764_s28   ;;  %p8349_p0 = scmp.ge.s32.totalorder %s11764_s28, 1 }
  0x47   : > { %p799_p1 = scmp.lt.s32.totalorder %s11764_s28, 3  ;;  %p13594_p2 = scmp.eq.s32.totalorder %s12004_s0, 0 }
  0x48   : > { %s11798_s2 = smov [#allocation4]   ;;  %s11799_s10 = smov [#allocation7]  }
  0x49   : > { %p12009_p3 = pnand %p8349_p0, %p799_p1  ;;  %s824_s7 = sshll.u32 %s11798_s2, 4  ;;  %s12013_s7 = int_to_ptr.vmem [resolvable:$true] %s824_s7 }
  0x4a   : > { %s851_s11 = sshll.u32 %s11799_s10, 4  ;;  %s11800_s16 = smov [#allocation10]   ;;  %s12017_s11 = int_to_ptr.vmem [resolvable:$true] %s851_s11 }
  0x4b   : > { %s13638_s1 = scalar_select %p12009_p3, 1, 0 }
  0x4c   : > { %p10807_p4 = pneg %p12009_p3  ;;  %s872_s18 = sshll.u32 %s11800_s16, 4  ;;  %s12025_s18 = int_to_ptr.vmem [resolvable:$true] %s872_s18 }
  0x4d   : > { %s11801_s22 = smov [#allocation13]   ;;  %s11126_s26 = scalar_lea.hbm %s11851_s17, 768 }
  0x4e   : > { %p12021_p5 = pnand %p13594_p2, %p10807_p4  ;;  %s12027_s23 = sshll.u32 %s11801_s22, 4  ;;  %s897_s23 = int_to_ptr.vmem [resolvable:$true] %s12027_s23 }
  0x4f   : > { %p11127_p6 = scmp.ne.s32.totalorder %s11851_s17, %s11126_s26  ;;  %p11133_p10 = scmp.lt.u32.totalorder %s11126_s26, %s11851_s17 }
  0x50   : > { %p12033_p7 = pneg %p12021_p5 }
  0x52   : > { %p11129_p8 = pnand %p12033_p7, %p11127_p6 }
  0x54   : > { %p11130_p9 = pneg %p11129_p8 }
  0x56   : > { %p11135_p11 = pnand %p11133_p10, %p11130_p9 }
  0x58   : > { %11138 = shalt.err (!%p11135_p11)
}
  0x59   : > { %s11139_s10 = scalar_lea.vmem %s12013_s7, 768  ;;  %p11147_p1 = scmp.lt.s32.totalorder %s12013_s7, %s12013_s7 }
  0x5a   : > { %p11140_p12 = scmp.ne.s32.totalorder %s12013_s7, %s11139_s10  ;;  %p11148_p4 = scmp.lt.s32.totalorder %s11139_s10, %s11139_s10 }
  0x5c   : > { %p11142_p13 = pnand %p11140_p12, %p12033_p7  ;;  %p11149_p2 = por %p11148_p4, %p11147_p1 }
  0x5e   : > { %p11143_p0 = pneg %p11142_p13 }
  0x60   : > { %p11150_p3 = pnand %p11149_p2, %p11143_p0 }
  0x62   : > { %11153 = shalt.err (!%p11150_p3)
}
  0x63   : > { %s13597_s16 = smov 128   ;;  %s13599_s22 = smov 8  }
  0x64   : > { %10813 = dma.hbm_to_vmem [thread:$0]  (!%p12021_p5), %s11851_s17, 768, %s12013_s7, [#allocation5], %s13597_s16, %s13597_s16, %s13599_s22  }
  0x65   : > { %s11154_s26 = scalar_lea.hbm %s11861_s25, 64 }
  0x66   : > { %p11155_p6 = scmp.ne.s32.totalorder %s11861_s25, %s11154_s26  ;;  %p11161_p3 = scmp.lt.u32.totalorder %s11154_s26, %s11861_s25 }
  0x68   : > { %p11157_p8 = pnand %p11155_p6, %p12033_p7 }
  0x6a   : > { %p11158_p2 = pneg %p11157_p8 }
  0x6c   : > { %p11163_p9 = pnand %p11161_p3, %p11158_p2 }
  0x6e   : > { %11166 = shalt.err (!%p11163_p9)
}
  0x6f   : > { %s11167_s10 = scalar_lea.vmem %s12017_s11, 64  ;;  %p11175_p13 = scmp.lt.s32.totalorder %s12017_s11, %s12017_s11 }
  0x70   : > { %p11168_p10 = scmp.ne.s32.totalorder %s12017_s11, %s11167_s10  ;;  %p11176_p0 = scmp.lt.s32.totalorder %s11167_s10, %s11167_s10 }
  0x72   : > { %p11170_p11 = pnand %p11168_p10, %p12033_p7  ;;  %p11177_p1 = por %p11176_p0, %p11175_p13 }
  0x74   : > { %p11171_p12 = pneg %p11170_p11 }
  0x76   : > { %p11178_p4 = pnand %p11177_p1, %p11171_p12 }
  0x78   : > { %11181 = shalt.err (!%p11178_p4)
}
  0x79   : > { %10819 = dma.hbm_to_vmem [thread:$0]  (!%p12021_p5), %s11861_s25, 64, %s12017_s11, [#allocation8]  }
  0x7a   : > { %s11182_s7 = scalar_lea.hbm %s13637_s3, 512 }
  0x7b   : > { %p11183_p6 = scmp.ne.s32.totalorder %s13637_s3, %s11182_s7  ;;  %p11189_p3 = scmp.lt.u32.totalorder %s11182_s7, %s13637_s3 }
  0x7d   : > { %p11185_p8 = pnand %p11183_p6, %p12033_p7 }
  0x7f   : > { %p11186_p2 = pneg %p11185_p8 }
  0x81   : > { %p11191_p9 = pnand %p11189_p3, %p11186_p2 }
  0x83   : > { %11194 = shalt.err (!%p11191_p9)
}
  0x84   : > { %s11195_s26 = scalar_lea.vmem %s12025_s18, 512  ;;  %p11203_p13 = scmp.lt.s32.totalorder %s12025_s18, %s12025_s18 }
  0x85   : > { %p11196_p10 = scmp.ne.s32.totalorder %s12025_s18, %s11195_s26  ;;  %p11204_p0 = scmp.lt.s32.totalorder %s11195_s26, %s11195_s26 }
  0x87   : > { %p11198_p11 = pnand %p11196_p10, %p12033_p7  ;;  %p11205_p1 = por %p11204_p0, %p11203_p13 }
  0x89   : > { %p11199_p12 = pneg %p11198_p11 }
  0x8b   : > { %p11206_p4 = pnand %p11205_p1, %p11199_p12 }
  0x8d   : > { %11209 = shalt.err (!%p11206_p4)
}
  0x8e   : > { %10825 = dma.hbm_to_vmem [thread:$0]  (!%p12021_p5), %s13637_s3, 512, %s12025_s18, [#allocation11], %s13597_s16, %s13597_s16, %s13599_s22  }
  0x8f   : > { %s11210_s11 = scalar_lea.hbm %s11881_s14, 256 }
  0x90   : > { %p11211_p6 = scmp.ne.s32.totalorder %s11881_s14, %s11210_s11  ;;  %p11217_p3 = scmp.lt.u32.totalorder %s11210_s11, %s11881_s14 }
  0x92   : > { %p11213_p8 = pnand %p11211_p6, %p12033_p7 }
  0x94   : > { %p11214_p2 = pneg %p11213_p8 }
  0x96   : > { %p11219_p9 = pnand %p11217_p3, %p11214_p2 }
  0x98   : > { %11222 = shalt.err (!%p11219_p9)
}
  0x99   : > { %s11223_s10 = scalar_lea.vmem %s897_s23, 256  ;;  %p11231_p13 = scmp.lt.s32.totalorder %s897_s23, %s897_s23 }
  0x9a   : > { %p11224_p10 = scmp.ne.s32.totalorder %s897_s23, %s11223_s10  ;;  %p11232_p0 = scmp.lt.s32.totalorder %s11223_s10, %s11223_s10 }
  0x9c   : > { %p11226_p11 = pnand %p11224_p10, %p12033_p7  ;;  %p11233_p1 = por %p11232_p0, %p11231_p13 }
  0x9e   : > { %p11227_p12 = pneg %p11226_p11 }
  0xa0   : > { %p11234_p4 = pnand %p11233_p1, %p11227_p12 }
  0xa2   : > { %11237 = shalt.err (!%p11234_p4)
}
  0xa3   : > { %10831 = dma.hbm_to_vmem [thread:$0]  (!%p12021_p5), %s11881_s14, 256, %s897_s23, [#allocation14], %s13597_s16, %s13597_s16, %s13599_s22  }
  0xa4   : > { %s11804_s18 = smov [#allocation16]   ;;  %s11805_s26 = smov [#allocation19]  }
  0xa5   : > { %s927_s7 = sshll.u32 %s11804_s18, 4  ;;  %s949_s11 = sshll.u32 %s11805_s26, 4  ;;  %s928_s7 = int_to_ptr.vmem [resolvable:$true] %s927_s7  ;;  %s950_s11 = int_to_ptr.vmem [resolvable:$true] %s949_s11 }
  0xa6   : > { %s11238_s10 = scalar_lea.hbm %s13634_s6, 16 }
  0xa7   : > { %p11239_p6 = scmp.ne.s32.totalorder %s13634_s6, %s11238_s10  ;;  %p11245_p3 = scmp.lt.u32.totalorder %s11238_s10, %s13634_s6 }
  0xa9   : > { %p11241_p8 = pnand %p11239_p6, %p12033_p7 }
  0xab   : > { %p11242_p2 = pneg %p11241_p8 }
  0xad   : > { %p11247_p9 = pnand %p11245_p3, %p11242_p2 }
  0xaf   : > { %11250 = shalt.err (!%p11247_p9)
}
  0xb0   : > { %s11251_s3 = scalar_lea.vmem %s928_s7, 16  ;;  %s11258_s23 = scalar_lea.vmem %s928_s7, 32 }
  0xb1   : > { %p11252_p10 = scmp.ne.s32.totalorder %s928_s7, %s11251_s3  ;;  %p11259_p13 = scmp.lt.s32.totalorder %s928_s7, %s928_s7 }
  0xb2   : > { %p11260_p0 = scmp.lt.s32.totalorder %s11258_s23, %s11251_s3 }
  0xb3   : > { %p11254_p11 = pnand %p11252_p10, %p12033_p7 }
  0xb4   : > { %p11261_p1 = por %p11260_p0, %p11259_p13 }
  0xb5   : > { %p11255_p12 = pneg %p11254_p11 }
  0xb7   : > { %p11262_p4 = pnand %p11261_p1, %p11255_p12 }
  0xb9   : > { %11265 = shalt.err (!%p11262_p4)
}
  0xba   : > { %10837 = dma.hbm_to_vmem [thread:$0]  (!%p12021_p5), %s13634_s6, 16, %s928_s7, [#allocation17]  }
  0xbb   : > { %s11266_s18 = scalar_lea.hbm %s11911_s20, 16 }
  0xbc   : > { %p11267_p6 = scmp.ne.s32.totalorder %s11911_s20, %s11266_s18  ;;  %p11273_p3 = scmp.lt.u32.totalorder %s11266_s18, %s11911_s20 }
  0xbe   : > { %p11269_p8 = pnand %p11267_p6, %p12033_p7 }
  0xc0   : > { %p11270_p2 = pneg %p11269_p8 }
  0xc2   : > { %p11275_p9 = pnand %p11273_p3, %p11270_p2 }
  0xc4   : > { %11278 = shalt.err (!%p11275_p9)
}
  0xc5   : > { %s11279_s3 = scalar_lea.vmem %s950_s11, 16  ;;  %s11286_s26 = scalar_lea.vmem %s950_s11, 32 }
  0xc6   : > { %p11280_p10 = scmp.ne.s32.totalorder %s950_s11, %s11279_s3  ;;  %p11287_p13 = scmp.lt.s32.totalorder %s950_s11, %s950_s11 }
  0xc7   : > { %p11288_p0 = scmp.lt.s32.totalorder %s11286_s26, %s11279_s3 }
  0xc8   : > { %p11282_p11 = pnand %p11280_p10, %p12033_p7 }
  0xc9   : > { %p11289_p1 = por %p11288_p0, %p11287_p13 }
  0xca   : > { %p11283_p12 = pneg %p11282_p11 }
  0xcc   : > { %p11290_p4 = pnand %p11289_p1, %p11283_p12 }
  0xce   : > { %11293 = shalt.err (!%p11290_p4)
}
  0xcf   : > { %10843 = dma.hbm_to_vmem [thread:$0]  (!%p12021_p5), %s11911_s20, 16, %s950_s11, [#allocation20]  }
  0xd0   : > { %s11806_s7 = smov [#allocation22]   ;;  %s11294_s23 = scalar_lea.hbm %s11946_s30, 32 }
  0xd1   : > { %s987_s10 = sshll.u32 %s11806_s7, 4  ;;  %p11295_p6 = scmp.ne.s32.totalorder %s11946_s30, %s11294_s23  ;;  %s988_s10 = int_to_ptr.vmem [resolvable:$true] %s987_s10 }
  0xd2   : > { %p11301_p3 = scmp.lt.u32.totalorder %s11294_s23, %s11946_s30 }
  0xd3   : > { %p11297_p8 = pnand %p11295_p6, %p12033_p7 }
  0xd5   : > { %p11298_p2 = pneg %p11297_p8 }
  0xd7   : > { %p11303_p9 = pnand %p11301_p3, %p11298_p2 }
  0xd9   : > { %11306 = shalt.err (!%p11303_p9)
}
  0xda   : > { %s11307_s18 = scalar_lea.vmem %s988_s10, 32  ;;  %p11315_p13 = scmp.lt.s32.totalorder %s988_s10, %s988_s10 }
  0xdb   : > { %p11308_p10 = scmp.ne.s32.totalorder %s988_s10, %s11307_s18  ;;  %p11316_p0 = scmp.lt.s32.totalorder %s11307_s18, %s11307_s18 }
  0xdd   : > { %p11310_p11 = pnand %p11308_p10, %p12033_p7  ;;  %p11317_p1 = por %p11316_p0, %p11315_p13 }
  0xdf   : > { %p11311_p12 = pneg %p11310_p11 }
  0xe1   : > { %p11318_p4 = pnand %p11317_p1, %p11311_p12 }
  0xe3   : > { %11321 = shalt.err (!%p11318_p4)
}
  0xe4   : > { %s13601_s11 = smov 16   ;;  %s13603_s3 = smov 1  }
  0xe5   : > { %10849 = dma.hbm_to_vmem [thread:$0]  (!%p12021_p5), %s11946_s30, 32, %s988_s10, [#allocation23], %s13601_s11, %s13601_s11, %s13603_s3  }
  0xe6   : > { %s11809_s26 = smov [#allocation25]   ;;  %s11810_s23 = smov [#allocation28]  }
  0xe7   : > { %s1016_s7 = sshll.u32 %s11809_s26, 4  ;;  %s1045_s18 = sshll.u32 %s11810_s23, 4  ;;  %s1017_s7 = int_to_ptr.vmem [resolvable:$true] %s1016_s7  ;;  %s12133_s18 = int_to_ptr.vmem [resolvable:$true] %s1045_s18 }
  0xe8   : > { %s11322_s16 = scalar_lea.hbm %s13636_s4, 32 }
  0xe9   : > { %p11323_p6 = scmp.ne.s32.totalorder %s13636_s4, %s11322_s16  ;;  %p11329_p3 = scmp.lt.u32.totalorder %s11322_s16, %s13636_s4 }
  0xeb   : > { %p11325_p8 = pnand %p11323_p6, %p12033_p7 }
  0xed   : > { %p11326_p2 = pneg %p11325_p8 }
  0xef   : > { %p11331_p9 = pnand %p11329_p3, %p11326_p2 }
  0xf1   : > { %11334 = shalt.err (!%p11331_p9)
}
  0xf2   : > { %s11335_s22 = scalar_lea.vmem %s1017_s7, 32  ;;  %p11343_p13 = scmp.lt.s32.totalorder %s1017_s7, %s1017_s7 }
  0xf3   : > { %p11336_p10 = scmp.ne.s32.totalorder %s1017_s7, %s11335_s22  ;;  %p11344_p0 = scmp.lt.s32.totalorder %s11335_s22, %s11335_s22 }
  0xf5   : > { %p11338_p11 = pnand %p11336_p10, %p12033_p7  ;;  %p11345_p1 = por %p11344_p0, %p11343_p13 }
  0xf7   : > { %p11339_p12 = pneg %p11338_p11 }
  0xf9   : > { %p11346_p4 = pnand %p11345_p1, %p11339_p12 }
  0xfb   : > { %11349 = shalt.err (!%p11346_p4)
}
  0xfc   : > { %10855 = dma.hbm_to_vmem [thread:$0]  (!%p12021_p5), %s13636_s4, 32, %s1017_s7, [#allocation26], %s13601_s11, %s13601_s11, %s13603_s3  }
  0xfd   : > { %s11350_s16 = scalar_lea.hbm %s13632_s9, 32 }
  0xfe   : > { %p11351_p6 = scmp.ne.s32.totalorder %s13632_s9, %s11350_s16  ;;  %p11357_p3 = scmp.lt.u32.totalorder %s11350_s16, %s13632_s9 }
 0x100   : > { %p11353_p8 = pnand %p11351_p6, %p12033_p7 }
 0x102   : > { %p11354_p2 = pneg %p11353_p8 }
 0x104   : > { %p11359_p9 = pnand %p11357_p3, %p11354_p2 }
 0x106   : > { %11362 = shalt.err (!%p11359_p9)
}
 0x107   : > { %s11363_s22 = scalar_lea.vmem %s12133_s18, 32  ;;  %p11371_p13 = scmp.lt.s32.totalorder %s12133_s18, %s12133_s18 }
 0x108   : > { %p11364_p10 = scmp.ne.s32.totalorder %s12133_s18, %s11363_s22  ;;  %p11372_p0 = scmp.lt.s32.totalorder %s11363_s22, %s11363_s22 }
 0x10a   : > { %p11366_p11 = pnand %p11364_p10, %p12033_p7  ;;  %p11373_p1 = por %p11372_p0, %p11371_p13 }
 0x10c   : > { %p11367_p12 = pneg %p11366_p11 }
 0x10e   : > { %p11374_p4 = pnand %p11373_p1, %p11367_p12 }
 0x110   : > { %11377 = shalt.err (!%p11374_p4)
}
 0x111   : > { %10861 = dma.hbm_to_vmem [thread:$0]  (!%p12021_p5), %s13632_s9, 32, %s12133_s18, [#allocation29], %s13601_s11, %s13601_s11, %s13603_s3  }
 0x112   : > { %s11811_s10 = smov [#allocation31]   ;;  %s11812_s7 = smov [#allocation2]  }
 0x113   : > { %s1071_s26 = sshll.u32 %s11811_s10, 4  ;;  %s811_s23 = sshll.u32 %s11812_s7, 4  ;;  %s1072_s26 = int_to_ptr.vmem [resolvable:$true] %s1071_s26  ;;  %s12166_s23 = int_to_ptr.vmem [resolvable:$true] %s811_s23 }
 0x114   : > { %s11378_s16 = scalar_lea.hbm %s13635_s5, 32 }
 0x115   : > { %p11379_p6 = scmp.ne.s32.totalorder %s13635_s5, %s11378_s16  ;;  %p11385_p3 = scmp.lt.u32.totalorder %s11378_s16, %s13635_s5 }
 0x117   : > { %p11381_p8 = pnand %p11379_p6, %p12033_p7 }
 0x119   : > { %p11382_p2 = pneg %p11381_p8 }
 0x11b   : > { %p11387_p9 = pnand %p11385_p3, %p11382_p2 }
 0x11d   : > { %11390 = shalt.err (!%p11387_p9)
}
 0x11e   : > { %s11391_s22 = scalar_lea.vmem %s1072_s26, 32  ;;  %p11399_p13 = scmp.lt.s32.totalorder %s1072_s26, %s1072_s26 }
 0x11f   : > { %p11392_p10 = scmp.ne.s32.totalorder %s1072_s26, %s11391_s22  ;;  %p11400_p0 = scmp.lt.s32.totalorder %s11391_s22, %s11391_s22 }
 0x121   : > { %p11394_p11 = pnand %p11392_p10, %p12033_p7  ;;  %p11401_p1 = por %p11400_p0, %p11399_p13 }
 0x123   : > { %p11395_p12 = pneg %p11394_p11 }
 0x125   : > { %p11402_p4 = pnand %p11401_p1, %p11395_p12 }
 0x127   : > { %11405 = shalt.err (!%p11402_p4)
}
 0x128   : > { %10867 = dma.hbm_to_vmem [thread:$0]  (!%p12021_p5), %s13635_s5, 32, %s1072_s26, [#allocation32], %s13601_s11, %s13601_s11, %s13603_s3  }
 0x129   : > { %s11406_s18 = scalar_lea.hbm %s11846_s13, 256 }
 0x12a   : > { %p11407_p6 = scmp.ne.s32.totalorder %s11846_s13, %s11406_s18  ;;  %p11413_p3 = scmp.lt.u32.totalorder %s11406_s18, %s11846_s13 }
 0x12c   : > { %p11409_p8 = pnand %p11407_p6, %p12033_p7 }
 0x12e   : > { %p11410_p2 = pneg %p11409_p8 }
 0x130   : > { %p11415_p9 = pnand %p11413_p3, %p11410_p2 }
 0x132   : > { %11418 = shalt.err (!%p11415_p9)
}
 0x133   : > { %s11419_s10 = scalar_lea.vmem %s12166_s23, 256  ;;  %p11427_p13 = scmp.lt.s32.totalorder %s12166_s23, %s12166_s23 }
 0x134   : > { %p11420_p10 = scmp.ne.s32.totalorder %s12166_s23, %s11419_s10  ;;  %p11428_p0 = scmp.lt.s32.totalorder %s11419_s10, %s11419_s10 }
 0x136   : > { %p11422_p11 = pnand %p11420_p10, %p12033_p7  ;;  %p11429_p1 = por %p11428_p0, %p11427_p13 }
 0x138   : > { %p11423_p12 = pneg %p11422_p11 }
 0x13a   : > { %p11430_p4 = pnand %p11429_p1, %p11423_p12 }
 0x13c   : > { %11433 = shalt.err (!%p11430_p4)
}
 0x13d   : > { %s13641_s26 = smov 8   ;;  %s13642_s7 = smov 128  }
 0x13e   : > { %10810 = dma.hbm_to_vmem [thread:$0]  (!%p12021_p5), %s11846_s13, 256, %s12166_s23, [#allocation3], %s13642_s7, %s13642_s7, %s13641_s26  }
 0x13f   : > { %s11813_s16 = smov [#allocation6]   ;;  %s11434_s18 = scalar_lea.hbm %s11856_s21, 192 }
 0x140   : > { %s837_s22 = sshll.u32 %s11813_s16, 4  ;;  %p11435_p6 = scmp.ne.s32.totalorder %s11856_s21, %s11434_s18  ;;  %s838_s22 = int_to_ptr.vmem [resolvable:$true] %s837_s22 }
 0x141   : > { %p11441_p3 = scmp.lt.u32.totalorder %s11434_s18, %s11856_s21 }
 0x142   : > { %p11437_p8 = pnand %p11435_p6, %p12033_p7 }
 0x144   : > { %p11438_p2 = pneg %p11437_p8 }
 0x146   : > { %p11443_p9 = pnand %p11441_p3, %p11438_p2 }
 0x148   : > { %11446 = shalt.err (!%p11443_p9)
}
 0x149   : > { %s11447_s10 = scalar_lea.vmem %s838_s22, 192  ;;  %p11455_p13 = scmp.lt.s32.totalorder %s838_s22, %s838_s22 }
 0x14a   : > { %p11448_p10 = scmp.ne.s32.totalorder %s838_s22, %s11447_s10  ;;  %p11456_p0 = scmp.lt.s32.totalorder %s11447_s10, %s11447_s10 }
 0x14c   : > { %p11450_p11 = pnand %p11448_p10, %p12033_p7  ;;  %p11457_p1 = por %p11456_p0, %p11455_p13 }
 0x14e   : > { %p11451_p12 = pneg %p11450_p11 }
 0x150   : > { %p11458_p4 = pnand %p11457_p1, %p11451_p12 }
 0x152   : > { %11461 = shalt.err (!%p11458_p4)
}
 0x153   : > { %s11814_s23 = smov 64   ;;  %s11815_s16 = smov 4  }
 0x154   : > { %10816 = dma.hbm_to_vmem [thread:$0]  (!%p12021_p5), %s11856_s21, 192, %s838_s22, [#allocation5], %s11814_s23, %s11814_s23, %s11815_s16  }
 0x155   : > { %s11816_s18 = smov [#allocation9]   ;;  %s11817_s3 = smov [#allocation12]  }
 0x156   : > { %s862_s11 = sshll.u32 %s11816_s18, 4  ;;  %s886_s4 = sshll.u32 %s11817_s3, 4  ;;  %s863_s11 = int_to_ptr.vmem [resolvable:$true] %s862_s11  ;;  %s887_s4 = int_to_ptr.vmem [resolvable:$true] %s886_s4 }
 0x157   : > { %s11462_s5 = scalar_lea.hbm %s11866_s29, 16 }
 0x158   : > { %p11463_p6 = scmp.ne.s32.totalorder %s11866_s29, %s11462_s5  ;;  %p11469_p3 = scmp.lt.u32.totalorder %s11462_s5, %s11866_s29 }
 0x15a   : > { %p11465_p8 = pnand %p11463_p6, %p12033_p7 }
 0x15c   : > { %p11466_p2 = pneg %p11465_p8 }
 0x15e   : > { %p11471_p9 = pnand %p11469_p3, %p11466_p2 }
 0x160   : > { %11474 = shalt.err (!%p11471_p9)
}
 0x161   : > { %s11475_s10 = scalar_lea.vmem %s863_s11, 16  ;;  %s11482_s22 = scalar_lea.vmem %s863_s11, 32 }
 0x162   : > { %p11476_p10 = scmp.ne.s32.totalorder %s863_s11, %s11475_s10  ;;  %p11483_p13 = scmp.lt.s32.totalorder %s863_s11, %s863_s11 }
 0x163   : > { %p11484_p0 = scmp.lt.s32.totalorder %s11482_s22, %s11475_s10 }
 0x164   : > { %p11478_p11 = pnand %p11476_p10, %p12033_p7 }
 0x165   : > { %p11485_p1 = por %p11484_p0, %p11483_p13 }
 0x166   : > { %p11479_p12 = pneg %p11478_p11 }
 0x168   : > { %p11486_p4 = pnand %p11485_p1, %p11479_p12 }
 0x16a   : > { %11489 = shalt.err (!%p11486_p4)
}
 0x16b   : > { %10822 = dma.hbm_to_vmem [thread:$0]  (!%p12021_p5), %s11866_s29, 16, %s863_s11, [#allocation8]  }
 0x16c   : > { %s11490_s5 = scalar_lea.hbm %s13633_s8, 16 }
 0x16d   : > { %p11491_p6 = scmp.ne.s32.totalorder %s13633_s8, %s11490_s5  ;;  %p11497_p3 = scmp.lt.u32.totalorder %s11490_s5, %s13633_s8 }
 0x16f   : > { %p11493_p8 = pnand %p11491_p6, %p12033_p7 }
 0x171   : > { %p11494_p2 = pneg %p11493_p8 }
 0x173   : > { %p11499_p9 = pnand %p11497_p3, %p11494_p2 }
 0x175   : > { %11502 = shalt.err (!%p11499_p9)
}
 0x176   : > { %s11503_s3 = scalar_lea.vmem %s887_s4, 16  ;;  %s11510_s23 = scalar_lea.vmem %s887_s4, 32 }
 0x177   : > { %p11504_p10 = scmp.ne.s32.totalorder %s887_s4, %s11503_s3  ;;  %p11511_p13 = scmp.lt.s32.totalorder %s887_s4, %s887_s4 }
 0x178   : > { %p11512_p0 = scmp.lt.s32.totalorder %s11510_s23, %s11503_s3 }
 0x179   : > { %p11506_p11 = pnand %p11504_p10, %p12033_p7 }
 0x17a   : > { %p11513_p1 = por %p11512_p0, %p11511_p13 }
 0x17b   : > { %p11507_p12 = pneg %p11506_p11 }
 0x17d   : > { %p11514_p4 = pnand %p11513_p1, %p11507_p12 }
 0x17f   : > { %11517 = shalt.err (!%p11514_p4)
}
 0x180   : > { %10828 = dma.hbm_to_vmem [thread:$0]  (!%p12021_p5), %s13633_s8, 16, %s887_s4, [#allocation11]  }
 0x181   : > { %s11818_s11 = smov [#allocation15]   ;;  %s11819_s18 = smov [#allocation18]  }
 0x182   : > { %s913_s16 = sshll.u32 %s11818_s11, 4  ;;  %s938_s10 = sshll.u32 %s11819_s18, 4  ;;  %s914_s16 = int_to_ptr.vmem [resolvable:$true] %s913_s16  ;;  %s939_s10 = int_to_ptr.vmem [resolvable:$true] %s938_s10 }
 0x183   : > { %s11518_s22 = scalar_lea.hbm %s11891_s24, 16 }
 0x184   : > { %p11519_p6 = scmp.ne.s32.totalorder %s11891_s24, %s11518_s22  ;;  %p11525_p3 = scmp.lt.u32.totalorder %s11518_s22, %s11891_s24 }
 0x186   : > { %p11521_p8 = pnand %p11519_p6, %p12033_p7 }
 0x188   : > { %p11522_p2 = pneg %p11521_p8 }
 0x18a   : > { %p11527_p9 = pnand %p11525_p3, %p11522_p2 }
 0x18c   : > { %11530 = shalt.err (!%p11527_p9)
}
 0x18d   : > { %s11531_s5 = scalar_lea.vmem %s914_s16, 16  ;;  %s11538_s4 = scalar_lea.vmem %s914_s16, 32 }
 0x18e   : > { %p11532_p10 = scmp.ne.s32.totalorder %s914_s16, %s11531_s5  ;;  %p11539_p13 = scmp.lt.s32.totalorder %s914_s16, %s914_s16 }
 0x18f   : > { %p11540_p0 = scmp.lt.s32.totalorder %s11538_s4, %s11531_s5 }
 0x190   : > { %p11534_p11 = pnand %p11532_p10, %p12033_p7 }
 0x191   : > { %p11541_p1 = por %p11540_p0, %p11539_p13 }
 0x192   : > { %p11535_p12 = pneg %p11534_p11 }
 0x194   : > { %p11542_p4 = pnand %p11541_p1, %p11535_p12 }
 0x196   : > { %11545 = shalt.err (!%p11542_p4)
}
 0x197   : > { %s13643_s3 = sld [smem:[#allocation52_spill]] }
 0x198   : > { %10834 = dma.hbm_to_vmem [thread:$0]  (!%p12021_p5), %s11891_s24, 16, %s914_s16, [#allocation14]  }
 0x19d   : > { %s11546_s23 = scalar_lea.hbm %s13643_s3, 16 }
 0x19e   : > { %p11547_p6 = scmp.ne.s32.totalorder %s13643_s3, %s11546_s23  ;;  %p11553_p3 = scmp.lt.u32.totalorder %s11546_s23, %s13643_s3 }
 0x1a0   : > { %p11549_p8 = pnand %p11547_p6, %p12033_p7 }
 0x1a2   : > { %p11550_p2 = pneg %p11549_p8 }
 0x1a4   : > { %p11555_p9 = pnand %p11553_p3, %p11550_p2 }
 0x1a6   : > { %11558 = shalt.err (!%p11555_p9)
}
 0x1a7   : > { %s11559_s11 = scalar_lea.vmem %s939_s10, 16  ;;  %s11566_s18 = scalar_lea.vmem %s939_s10, 32 }
 0x1a8   : > { %p11560_p10 = scmp.ne.s32.totalorder %s939_s10, %s11559_s11  ;;  %p11567_p13 = scmp.lt.s32.totalorder %s939_s10, %s939_s10 }
 0x1a9   : > { %p11568_p0 = scmp.lt.s32.totalorder %s11566_s18, %s11559_s11 }
 0x1aa   : > { %p11562_p11 = pnand %p11560_p10, %p12033_p7 }
 0x1ab   : > { %p11569_p1 = por %p11568_p0, %p11567_p13 }
 0x1ac   : > { %p11563_p12 = pneg %p11562_p11 }
 0x1ae   : > { %p11570_p4 = pnand %p11569_p1, %p11563_p12 }
 0x1b0   : > { %11573 = shalt.err (!%p11570_p4)
}
 0x1b1   : > { %s13644_s16 = sld [smem:[#allocation53_spill]]  ;;  %s11820_s22 = smov [#allocation21]  }
 0x1b2   : > { %10840 = dma.hbm_to_vmem [thread:$0]  (!%p12021_p5), %s13643_s3, 16, %s939_s10, [#allocation17]  }
 0x1b3   : > { %s959_s5 = sshll.u32 %s11820_s22, 4  ;;  %s11821_s4 = smov [#allocation24]   ;;  %s960_s5 = int_to_ptr.vmem [resolvable:$true] %s959_s5 }
 0x1b4   : > { %s1000_s23 = sshll.u32 %s11821_s4, 4  ;;  %s1001_s23 = int_to_ptr.vmem [resolvable:$true] %s1000_s23 }
 0x1b7   : > { %s11574_s6 = scalar_lea.hbm %s13644_s16, 384 }
 0x1b8   : > { %p11575_p6 = scmp.ne.s32.totalorder %s13644_s16, %s11574_s6  ;;  %p11581_p3 = scmp.lt.u32.totalorder %s11574_s6, %s13644_s16 }
 0x1ba   : > { %p11577_p8 = pnand %p11575_p6, %p12033_p7 }
 0x1bc   : > { %p11578_p2 = pneg %p11577_p8 }
 0x1be   : > { %p11583_p9 = pnand %p11581_p3, %p11578_p2 }
 0x1c0   : > { %11586 = shalt.err (!%p11583_p9)
}
 0x1c1   : > { %s11587_s11 = scalar_lea.vmem %s960_s5, 384  ;;  %p11595_p13 = scmp.lt.s32.totalorder %s960_s5, %s960_s5 }
 0x1c2   : > { %p11588_p10 = scmp.ne.s32.totalorder %s960_s5, %s11587_s11  ;;  %p11596_p0 = scmp.lt.s32.totalorder %s11587_s11, %s11587_s11 }
 0x1c4   : > { %p11590_p11 = pnand %p11588_p10, %p12033_p7  ;;  %p11597_p1 = por %p11596_p0, %p11595_p13 }
 0x1c6   : > { %p11591_p12 = pneg %p11590_p11 }
 0x1c8   : > { %p11598_p4 = pnand %p11597_p1, %p11591_p12 }
 0x1ca   : > { %11601 = shalt.err (!%p11598_p4)
}
 0x1cb   : > { %s13645_s6 = sld [smem:[#allocation59_spill]] }
 0x1cc   : > { %10846 = dma.hbm_to_vmem [thread:$0]  (!%p12021_p5), %s13644_s16, 384, %s960_s5, [#allocation20], %s13642_s7, %s13642_s7, %s13641_s26  }
 0x1d1   : > { %s11602_s10 = scalar_lea.hbm %s13645_s6, 32 }
 0x1d2   : > { %p11603_p6 = scmp.ne.s32.totalorder %s13645_s6, %s11602_s10  ;;  %p11609_p3 = scmp.lt.u32.totalorder %s11602_s10, %s13645_s6 }
 0x1d4   : > { %p11605_p8 = pnand %p11603_p6, %p12033_p7 }
 0x1d6   : > { %p11606_p2 = pneg %p11605_p8 }
 0x1d8   : > { %p11611_p9 = pnand %p11609_p3, %p11606_p2 }
 0x1da   : > { %11614 = shalt.err (!%p11611_p9)
}
 0x1db   : > { %s11615_s18 = scalar_lea.vmem %s1001_s23, 32  ;;  %p11623_p13 = scmp.lt.s32.totalorder %s1001_s23, %s1001_s23 }
 0x1dc   : > { %p11616_p10 = scmp.ne.s32.totalorder %s1001_s23, %s11615_s18  ;;  %p11624_p0 = scmp.lt.s32.totalorder %s11615_s18, %s11615_s18 }
 0x1de   : > { %p11618_p11 = pnand %p11616_p10, %p12033_p7  ;;  %p11625_p1 = por %p11624_p0, %p11623_p13 }
 0x1e0   : > { %p11619_p12 = pneg %p11618_p11 }
 0x1e2   : > { %p11626_p4 = pnand %p11625_p1, %p11619_p12 }
 0x1e4   : > { %11629 = shalt.err (!%p11626_p4)
}
 0x1e5   : > { %s13646_s22 = smov 1   ;;  %s13647_s5 = smov 16  }
 0x1e6   : > { %s13648_s4 = sld [smem:[#allocation63_spill]]  ;;  %s11822_s11 = smov [#allocation27]  }
 0x1e7   : > { %10852 = dma.hbm_to_vmem [thread:$0]  (!%p12021_p5), %s13645_s6, 32, %s1001_s23, [#allocation23], %s13647_s5, %s13647_s5, %s13646_s22  }
 0x1e8   : > { %s1032_s10 = sshll.u32 %s11822_s11, 4  ;;  %s11823_s3 = smov [#allocation30]   ;;  %s1033_s10 = int_to_ptr.vmem [resolvable:$true] %s1032_s10 }
 0x1e9   : > { %s1058_s8 = sshll.u32 %s11823_s3, 4  ;;  %s1059_s8 = int_to_ptr.vmem [resolvable:$true] %s1058_s8 }
 0x1ec   : > { %s11630_s18 = scalar_lea.hbm %s13648_s4, 32 }
 0x1ed   : > { %p11631_p6 = scmp.ne.s32.totalorder %s13648_s4, %s11630_s18  ;;  %p11637_p3 = scmp.lt.u32.totalorder %s11630_s18, %s13648_s4 }
 0x1ef   : > { %p11633_p8 = pnand %p11631_p6, %p12033_p7 }
 0x1f1   : > { %p11634_p2 = pneg %p11633_p8 }
 0x1f3   : > { %p11639_p9 = pnand %p11637_p3, %p11634_p2 }
 0x1f5   : > { %11642 = shalt.err (!%p11639_p9)
}
 0x1f6   : > { %s11643_s9 = scalar_lea.vmem %s1033_s10, 32  ;;  %p11651_p13 = scmp.lt.s32.totalorder %s1033_s10, %s1033_s10 }
 0x1f7   : > { %p11644_p10 = scmp.ne.s32.totalorder %s1033_s10, %s11643_s9  ;;  %p11652_p0 = scmp.lt.s32.totalorder %s11643_s9, %s11643_s9 }
 0x1f9   : > { %p11646_p11 = pnand %p11644_p10, %p12033_p7  ;;  %p11653_p1 = por %p11652_p0, %p11651_p13 }
 0x1fb   : > { %p11647_p12 = pneg %p11646_p11 }
 0x1fd   : > { %p11654_p4 = pnand %p11653_p1, %p11647_p12 }
 0x1ff   : > { %11657 = shalt.err (!%p11654_p4)
}
 0x200   : > { %10858 = dma.hbm_to_vmem [thread:$0]  (!%p12021_p5), %s13648_s4, 32, %s1033_s10, [#allocation26], %s13647_s5, %s13647_s5, %s13646_s22  }
 0x201   : > { %s11658_s3 = scalar_lea.hbm %s11981_s27, 32 }
 0x202   : > { %p11659_p6 = scmp.ne.s32.totalorder %s11981_s27, %s11658_s3  ;;  %p11665_p3 = scmp.lt.u32.totalorder %s11658_s3, %s11981_s27 }
 0x204   : > { %p11661_p8 = pnand %p11659_p6, %p12033_p7 }
 0x206   : > { %p11662_p2 = pneg %p11661_p8 }
 0x208   : > { %p11667_p9 = pnand %p11665_p3, %p11662_p2 }
 0x20a   : > { %11670 = shalt.err (!%p11667_p9)
}
 0x20b   : > { %s11671_s9 = scalar_lea.vmem %s1059_s8, 32  ;;  %p11679_p13 = scmp.lt.s32.totalorder %s1059_s8, %s1059_s8 }
 0x20c   : > { %p11672_p10 = scmp.ne.s32.totalorder %s1059_s8, %s11671_s9  ;;  %p11680_p0 = scmp.lt.s32.totalorder %s11671_s9, %s11671_s9 }
 0x20e   : > { %p11674_p11 = pnand %p11672_p10, %p12033_p7  ;;  %p11681_p1 = por %p11680_p0, %p11679_p13 }
 0x210   : > { %p11675_p12 = pneg %p11674_p11 }
 0x212   : > { %p11682_p4 = pnand %p11681_p1, %p11675_p12 }
 0x214   : > { %11685 = shalt.err (!%p11682_p4)
}
 0x215   : > { %10864 = dma.hbm_to_vmem [thread:$0]  (!%p12021_p5), %s11981_s27, 32, %s1059_s8, [#allocation29], %s13647_s5, %s13647_s5, %s13646_s22  }
 0x216   : > { %s11824_s23 = smov [#allocation33]   ;;  %s11686_s10 = scalar_lea.hbm %s11991_s19, 1024 }
 0x217   : > { %s1084_s11 = sshll.u32 %s11824_s23, 4  ;;  %p11687_p6 = scmp.ne.s32.totalorder %s11991_s19, %s11686_s10  ;;  %s1085_s11 = int_to_ptr.vmem [resolvable:$true] %s1084_s11 }
 0x218   : > { %p11693_p3 = scmp.lt.u32.totalorder %s11686_s10, %s11991_s19 }
 0x219   : > { %p11689_p8 = pnand %p11687_p6, %p12033_p7 }
 0x21b   : > { %p11690_p2 = pneg %p11689_p8 }
 0x21d   : > { %p11695_p9 = pnand %p11693_p3, %p11690_p2 }
 0x21f   : > { %11698 = shalt.err (!%p11695_p9)
}
 0x220   : > { %s11699_s18 = scalar_lea.vmem %s1085_s11, 1024  ;;  %p11707_p13 = scmp.lt.s32.totalorder %s1085_s11, %s1085_s11 }
 0x221   : > { %p11700_p10 = scmp.ne.s32.totalorder %s1085_s11, %s11699_s18  ;;  %p11708_p0 = scmp.lt.s32.totalorder %s11699_s18, %s11699_s18 }
 0x223   : > { %p11702_p11 = pnand %p11700_p10, %p12033_p7  ;;  %p11709_p1 = por %p11708_p0, %p11707_p13 }
 0x225   : > { %p11703_p12 = pneg %p11702_p11 }
 0x227   : > { %p11710_p4 = pnand %p11709_p1, %p11703_p12 }
 0x229   : > { %11713 = shalt.err (!%p11710_p4)
}
 0x22a   : > { %10870 = dma.hbm_to_vmem [thread:$0]  (!%p12021_p5), %s11991_s19, 1024, %s1085_s11, [#allocation32], %s13642_s7, %s13642_s7, %s13641_s26  }
 0x22b   : > { %p13649_p6 = scmp.ne.s32.totalorder %s13638_s1, 0 }
 0x22c   : > { %p13650_p8 = scmp.eq.s32.totalorder (!%p13649_p6), %s12004_s0, 0 }
 0x22d   : > { %1116 = sbr.rel (%p13649_p6) target bundleno = 12277 (0x2ff5), region = 148 }
 0x234   : > { %11719 = dma.done.wait (%p13650_p8), [#allocation3], 256   ;;  %p13651_p7 = pmov %p13650_p8 }
 0x236   : > { %11721 = vsyncadd (%p13651_p7), [#allocation3], 4294967040  ;;  %p13652_p2 = pmov %p13651_p7 }
 0x238   : > { %11723 = dma.done.wait (%p13652_p2), [#allocation5], 960   ;;  %p13653_p3 = pmov %p13652_p2 }
 0x239   : > { %p13654_p9 = pmov %p13652_p2 }
 0x23a   : > { %11725 = vsyncadd (%p13653_p3), [#allocation5], 4294966336 }
 0x23b   : > { %11727 = dma.done.wait (%p13654_p9), [#allocation8], 80   ;;  %p13655_p5 = pmov %p13652_p2 }
 0x23c   : > { %p13656_p10 = pmov %p13652_p2 }
 0x23d   : > { %11729 = vsyncadd (%p13655_p5), [#allocation8], 4294967216 }
 0x23e   : > { %11731 = dma.done.wait (%p13656_p10), [#allocation11], 528   ;;  %p13657_p11 = pmov %p13652_p2 }
 0x23f   : > { %p13658_p12 = pmov %p13652_p2 }
 0x240   : > { %11733 = vsyncadd (%p13657_p11), [#allocation11], 4294966768 }
 0x241   : > { %11735 = dma.done.wait (%p13658_p12), [#allocation14], 272   ;;  %p13659_p13 = pmov %p13652_p2 }
 0x242   : > { %p13660_p0 = pmov %p13652_p2 }
 0x243   : > { %11737 = vsyncadd (%p13659_p13), [#allocation14], 4294967024 }
 0x244   : > { %11739 = dma.done.wait (%p13660_p0), [#allocation17], 32   ;;  %p13661_p1 = pmov %p13660_p0 }
 0x245   : > { %p13662_p4 = pmov %p13660_p0 }
 0x246   : > { %11741 = vsyncadd (%p13661_p1), [#allocation17], 4294967264 }
 0x247   : > { %11743 = dma.done.wait (%p13662_p4), [#allocation20], 400   ;;  %p13663_p6 = pmov %p13660_p0 }
 0x248   : > { %p13664_p8 = pmov %p13660_p0 }
 0x249   : > { %11745 = vsyncadd (%p13663_p6), [#allocation20], 4294966896 }
 0x24a   : > { %11747 = dma.done.wait (%p13664_p8), [#allocation23], 64   ;;  %p13665_p7 = pmov %p13660_p0 }
 0x24b   : > { %p13666_p2 = pmov %p13660_p0 }
 0x24c   : > { %11749 = vsyncadd (%p13665_p7), [#allocation23], 4294967232 }
 0x24d   : > { %11751 = dma.done.wait (%p13666_p2), [#allocation26], 64   ;;  %p13667_p3 = pmov %p13660_p0 }
 0x24e   : > { %p13668_p9 = pmov %p13660_p0 }
 0x24f   : > { %11753 = vsyncadd (%p13667_p3), [#allocation26], 4294967232 }
 0x250   : > { %11755 = dma.done.wait (%p13668_p9), [#allocation29], 64   ;;  %p13669_p5 = pmov %p13660_p0 }
 0x251   : > { %p13670_p10 = pmov %p13660_p0 }
 0x252   : > { %11757 = vsyncadd (%p13669_p5), [#allocation29], 4294967232 }
 0x253   : > { %11759 = dma.done.wait (%p13670_p10), [#allocation32], 1056   ;;  %p13671_p11 = pmov %p13660_p0 }
 0x254   : > { %s13672_s8 = sld [smem:[#allocation45_spill]]  ;;  %p1282_p12 = scmp.lt.s32.totalorder %s12004_s0, 1  ;;  %vm1302_vm0 = vcmask 130048   ;;  %v1300_v2 = vld [vmem:[#allocation4] sm:$0xff]  ;;  %v1301_v5 = vld [vmem:[#allocation4 + $0x8] sm:$0xff]  ;;  %vm1392_vm1 = vcmask 1043456  }
 0x255   : > { %11761 = vsyncadd (%p13671_p11), [#allocation32], 4294966240  ;;  %9249 = vmatprep.mubr.msk.f32.mxu1 %vm1302_vm0, %v1300_v2  ;;  %v1556_v4 = vld [vmem:[#allocation4 + $0x20] sm:$0xff]  ;;  %v1557_v6 = vld [vmem:[#allocation4 + $0x28] sm:$0xff]  ;;  %vm1385_vm2 = vcmask 31744   ;;  %s13673_s2 = sld [smem:[#allocation46_spill]] }
 0x256   : > { %s13686_s0 = smov (!%p1282_p12, %s12004_s0), 1  ;;  %9266 = vmatprep.mubr.msk.f32.mxu0 %vm1302_vm0, %v1556_v4  ;;  %v1384_v7 = vld [vmem:[#allocation6] sm:$0xf]  ;;  %v1299_v8 = vld [vmem:[#allocation6 + $0x4] sm:$0xf]  ;;  %v1827_v9 = vld [vmem:[#allocation10] sm:$0xff] }
 0x257   : > { %s8786_s1 = sshll.u32 %s13686_s0, 4  ;;  %v1828_v10 = vld [vmem:[#allocation10 + $0x8] sm:$0xff]  ;;  %v1640_v16 = vld [vmem:[#allocation6 + $0x8] sm:$0xf]  ;;  %v1729_v17 = vld [vmem:[#allocation7] sm:$0xf] }
 0x258   : > { %v10325_v11 = vpack.c.bf16 %v1828_v10, %v1827_v9  ;;  %v1829_v20 = vld [vmem:[#allocation10 + $0x10] sm:$0xff]  ;;  %v1830_v21 = vld [vmem:[#allocation10 + $0x18] sm:$0xff]  ;;  %vm1838_vm3 = vcmask 261120   ;;  %v11825_v34 = vmov 0.0|0.0   ;;  %vm11826_vm4 = vmmov 0   ;;  %s13674_s7 = sld [smem:[#allocation49_spill]] }
 0x259   : > { %v10329_v22 = vpack.c.bf16 %v1830_v21, %v1829_v20  ;;  %v8412_v23 = vld [vmem:[#allocation9] ss:$0 sm:$0xff]  ;;  %v1823_v27 = vld [vmem:[#allocation2] sm:$0xff]  ;;  %v1824_v28 = vld [vmem:[#allocation2 + $0x8] sm:$0xff]  ;;  %v11827_v35 = vmov 0.0   ;;  %s13675_s22 = sld [smem:[#allocation50_spill]] }
 0x25a   : > { %s1286_s15 = scalar_lea.vmem %s13672_s8, %s8786_s1  ;;  %v8416_v42 = vld [vmem:[#allocation12] ss:$0 sm:$0xff]  ;;  %v1920_v52 = vld [vmem:[#allocation13] sm:$0xff]  ;;  %v2003_v53 = vld [vmem:[#allocation13 + $0x8] sm:$0xff]  ;;  %vm2086_vm5 = vcmask 523264   ;;  %s13676_s5 = sld [smem:[#allocation54_spill]] }
 0x25b   : > { %v1296_v0 = vld [vmem:[%s1286_s15] sm:$0xff]  ;;  %v1297_v1 = vld [vmem:[%s1286_s15 + $0x8] sm:$0xff]  ;;  %s1291_s26 = scalar_lea.vmem %s13673_s2, %s8786_s1  ;;  %s13677_s3 = sld [smem:[#allocation56_spill]]  ;;  %vm12535_vm7 = vmpackc.low %vm2086_vm5, %vm2086_vm5  ;;  %vm2756_vm8 = vcmask 195584  }
 0x25c   : > { %v10317_v3 = vpack.c.bf16 %v1297_v1, %v1296_v0  ;;  %v1727_v18 = vld [vmem:[%s1291_s26] sm:$0xff]  ;;  %v1728_v19 = vld [vmem:[%s1291_s26 + $0x8] sm:$0xff]  ;;  %s13678_s9 = sld [smem:[#allocation55_spill]]  ;;  %s13681_s23 = sld [smem:[#allocation57_spill]] }
 0x25d   : > { %s13682_s11 = sld [smem:[#allocation58_spill]]  ;;  %s13683_s10 = sld [smem:[#allocation60_spill]] }
 0x25e   : > { %10318 = vmatprep.subr.bf16.mxu1 %v10317_v3  ;;  %10322 = vmatprep.subr.bf16.mxu0 %v10317_v3  ;;  %v8421_v47 = vld [vmem:[%s13674_s7 + $0x40] sm:$0xff]  ;;  %v8422_v48 = vld [vmem:[%s13674_s7 + $0x48] sm:$0xff]  ;;  %v8423_v56 = vld [vmem:[%s13674_s7 + $0x50] sm:$0xff]  ;;  %s13684_s18 = sld [smem:[#allocation62_spill]]  ;;  %s8398_s8 = sshll.u32 %s13686_s0, 3 }
 0x25f   : > { %10320 = vmatpush3.bf16.msra.mxu1 %v10317_v3  ;;  %10324 = vmatpush3.bf16.msra.mxu0 %v10317_v3  ;;  %v1994_v49 = vld [vmem:[%s13674_s7] sm:$0xff]  ;;  %v1995_v50 = vld [vmem:[%s13674_s7 + $0x8] sm:$0xff]  ;;  %v10340_v54 = vpack.c.bf16 %v8422_v48, %v8421_v47  ;;  %v8424_v57 = vld [vmem:[%s13674_s7 + $0x58] sm:$0xff]  ;;  %s1295_s1 = scalar_lea.vmem %s11996_s12, %s8398_s8 }
 0x260   : > { %9252 = vmatprep.subr.msk.mxu1 %vm1392_vm1, %v1384_v7  ;;  %10326 = vmatprep.subr.bf16.mxu0 %v10325_v11  ;;  %v10352_v55 = vpack.c.bf16 %v1995_v50, %v1994_v49  ;;  %v1996_v58 = vld [vmem:[%s13674_s7 + $0x10] sm:$0xff]  ;;  %v1997_v59 = vld [vmem:[%s13674_s7 + $0x18] sm:$0xff]  ;;  %v10343_v60 = vpack.c.bf16 %v8424_v57, %v8423_v56  ;;  %v8425_v62 = vld [vmem:[%s13674_s7 + $0x60] sm:$0xff] }
 0x261   : > { %v10355_v61 = vpack.c.bf16 %v1997_v59, %v1996_v58  ;;  %v8426_v63 = vld [vmem:[%s13674_s7 + $0x68] sm:$0xff]  ;;  %v8427_v4 = vld [vmem:[%s13674_s7 + $0x70] sm:$0xff]  ;;  %v2400_v56 = vld [vmem:[%s13676_s5 + $0x18] sm:$0xff] }
 0x262   : > { %9250 = vmatmul.mubr.msk.f32.vlgmr.msra.gmra.mrb[0].mxu1 %vm1302_vm0, %v1301_v5  ;;  %9267 = vmatmul.mubr.msk.f32.vlgmr.msra.gmra.mrb[0].mxu0 %vm1302_vm0, %v1557_v6  ;;  %v10346_v2 = vpack.c.bf16 %v8426_v63, %v8425_v62  ;;  %v8428_v5 = vld [vmem:[%s13674_s7 + $0x78] sm:$0xff]  ;;  %v2000_v6 = vld [vmem:[%s13674_s7 + $0x30] sm:$0xff]  ;;  %v2251_v21 = vld [vmem:[%s13675_s22 + $0x28] sm:$0xff] }
 0x263   : > { %9253 = vmatpush3.msk.msra.mxu1 %vm1392_vm1, %v1384_v7  ;;  %10328 = vmatpush3.bf16.msra.mxu0 %v10325_v11  ;;  %v2001_v7 = vld [vmem:[%s13674_s7 + $0x38] sm:$0xff]  ;;  %v2576_v57 = vld [vmem:[%s13677_s3 + $0x10] sm:$0xff] }
 0x264   : > { %9257 = vmatprep.subr.msk.mxu1 %vm1392_vm1, %v1299_v8  ;;  %10330 = vmatprep.subr.bf16.mxu0 %v10329_v22  ;;  %v10361_v9 = vpack.c.bf16 %v2001_v7, %v2000_v6  ;;  %v2577_v59 = vld [vmem:[%s13677_s3 + $0x18] sm:$0xff] }
 0x267   : > { %10332 = vmatpush3.bf16.msra.mxu0 %v10329_v22 }
 0x268   : > { %10336 = vmatprep.subr.bf16.mxu0 %v11825_v34 }
 0x335   : > { %v9251_v12 = vpop.f32.mrb[0].mxu1  ;;  %v9268_v13 = vpop.f32.mrb[0].mxu0 }
 0x336   : > { %v1375_v14 = vpop.f32.mrb[1].mxu1  ;;  %v1630_v15 = vpop.f32.mrb[1].mxu0 }
 0x337   : > { %9254 = vmatprep.mubr.msk.f32.mxu1 %vm1385_vm2, %v1375_v14  ;;  %v2246_v14 = vld [vmem:[%s13675_s22] sm:$0xff] }
 0x338   : > { %9255 = vmatmul.mubr.msk.f32.vlgmr.msra.gmra.mrb[2].mxu1 %vm1385_vm2, %v9251_v12 }
 0x339   : > { %9258 = vmatpush3.msk.msra.mxu1 %vm1392_vm1, %v1299_v8  ;;  %9259 = vmatprep.mubr.msk.f32.mxu1 %vm1385_vm2, %v1296_v0  ;;  %v1998_v0 = vld [vmem:[%s13674_s7 + $0x20] sm:$0xff]  ;;  %v10349_v8 = vpack.c.bf16 %v8428_v5, %v8427_v4 }
 0x33a   : > { %9269 = vmatprep.subr.msk.mxu1 %vm1392_vm1, %v1640_v16 }
 0x340   : > { %9260 = vmatmul.mubr.msk.f32.vlgmr.msra.gmra.mrb[2].mxu1 %vm1385_vm2, %v1297_v1  ;;  %v1999_v1 = vld [vmem:[%s13674_s7 + $0x28] sm:$0xff] }
 0x341   : > { %9270 = vmatpush3.msk.msra.mxu1 %vm1392_vm1, %v1640_v16  ;;  %9271 = vmatprep.mubr.msk.f32.mxu1 %vm1385_vm2, %v1630_v15  ;;  %v10358_v3 = vpack.c.bf16 %v1999_v1, %v1998_v0  ;;  %v2247_v15 = vld [vmem:[%s13675_s22 + $0x8] sm:$0xff] }
 0x342   : > { %9274 = vmatprep.subr.msk.mxu1 %vm1392_vm1, %v1729_v17  ;;  %v10364_v16 = vpack.c.bf16 %v2247_v15, %v2246_v14  ;;  %v8436_v14 = vld [vmem:[#allocation19] ss:$0 sm:$0xff] }
 0x348   : > { %9272 = vmatmul.mubr.msk.f32.vlgmr.msra.gmra.mrb[2].mxu1 %vm1385_vm2, %v9268_v13 }
 0x349   : > { %9275 = vmatpush3.msk.msra.mxu1 %vm1392_vm1, %v1729_v17  ;;  %9276 = vmatprep.mubr.msk.f32.mxu1 %vm1385_vm2, %v1727_v18  ;;  %v2248_v17 = vld [vmem:[%s13675_s22 + $0x10] sm:$0xff]  ;;  %v2249_v18 = vld [vmem:[%s13675_s22 + $0x18] sm:$0xff] }
 0x34a   : > { %10333 = vmatprep.subr.bf16.mxu1 %v11825_v34  ;;  %v10367_v20 = vpack.c.bf16 %v2249_v18, %v2248_v17  ;;  %v2490_v17 = vld [vmem:[%s13678_s9] sm:$0xff]  ;;  %v2491_v18 = vld [vmem:[%s13678_s9 + $0x8] sm:$0xff] }
 0x350   : > { %9277 = vmatmul.mubr.msk.f32.vlgmr.msra.gmra.mrb[2].mxu1 %vm1385_vm2, %v1728_v19  ;;  %v2250_v19 = vld [vmem:[%s13675_s22 + $0x20] sm:$0xff] }
 0x351   : > { %9294 = vmatprep.mubr.msk.f32.mxu1 %vm11826_vm4, %v11827_v35  ;;  %v10370_v22 = vpack.c.bf16 %v2251_v21, %v2250_v19  ;;  %v10382_v19 = vpack.c.bf16 %v2491_v18, %v2490_v17  ;;  %v2493_v21 = vld [vmem:[%s13678_s9 + $0x18] sm:$0xff] }
 0x423   : > { %v9278_v24 = vpop.f32.mrb[2].mxu1 }
 0x424   : > { %v1818_v25 = vadd.f32 %v9278_v24, %v8412_v23  ;;  %v1812_v26 = vpop.f32.mrb[3].mxu1  ;;  %v2253_v24 = vld [vmem:[%s13675_s22 + $0x38] sm:$0xff] }
 0x425   : > { %v1813_v29 = vadd.f32 %v8412_v23, %v1812_v26  ;;  %v2252_v23 = vld [vmem:[%s13675_s22 + $0x30] sm:$0xff] }
 0x426   : > { %v1826_v31 = vadd.f32 %v1824_v28, %v1818_v25  ;;  %v10373_v25 = vpack.c.bf16 %v2253_v24, %v2252_v23  ;;  %v8431_v28 = vld [vmem:[#allocation15] ss:$0 sm:$0xff] }
 0x427   : > { %v12391_v30 = vadd.f32 %v1823_v27, %v1813_v29 }
 0x428   : > { %v2339_v33 = vsel %vm1838_vm3, %v1826_v31, 0.0 }
 0x429   : > { %9287 = vmatprep.mubr.msk.f32.mxu0 %vm1838_vm3, %v12391_v30  ;;  %v2336_v32 = vsel %vm1838_vm3, %v12391_v30, 0.0 }
 0x42a   : > { %2337 = vadd.xlane.f32.xlu0 %v2336_v32  ;;  %9288 = vmatmul.mubr.msk.f32.vlgmr.msra.gmra.mrb[2].mxu0 %vm1838_vm3, %v1826_v31 }
 0x42b   : > { %9301 = vmatprep.mubr.msk.f32.mxu0 %vm11826_vm4, %v11827_v35 }
 0x42e   : > { %2340 = vadd.xlane.f32.xlu0 %v2339_v33 }
 0x4b7   : > { %v12405_v36 = vpop.xlane.xlu0 %2337 }
 0x4bb   : > { %v2341_v37 = vpop.xlane.xlu0 %2340 }
 0x4bc   : > { %v2347_v38 = vmul.f32 0.03125, %v2341_v37 }
 0x4be   : > { %v12407_v39 = vsub.f32 %v1826_v31, %v2347_v38 }
 0x4c0   : > { %v2353_v40 = vmul.f32 %v12407_v39, %v12407_v39 }
 0x4c2   : > { %v2358_v41 = vsel %vm1838_vm3, %v2353_v40, 0.0 }
 0x4c3   : > { %2359 = vadd.xlane.f32.xlu0 %v2358_v41 }
 0x4fd   : > { %v9289_v43 = vpop.f32.mrb[2].mxu0 }
 0x4fe   : > { %v1917_v44 = vadd.f32 %v9289_v43, %v8416_v42  ;;  %v1911_v45 = vpop.f32.mrb[3].mxu0  ;;  %v8433_v43 = vld [vmem:[#allocation16] ss:$0 sm:$0xff] }
 0x4ff   : > { %v1912_v46 = vadd.f32 %v8416_v42, %v1911_v45  ;;  %v2346_v42 = vmul.f32 0.03125, %v12405_v36  ;;  %v2574_v36 = vld [vmem:[%s13677_s3] sm:$0xff] }
 0x501   : > { %v10334_v51 = vpack.c.bf16 %v1917_v44, %v1912_v46  ;;  %v2349_v44 = vsub.f32 %v12391_v30, %v2346_v42 }
 0x503   : > { %10335 = vmatpush3.bf16.msra.mxu1 %v10334_v51  ;;  %10338 = vmatpush3.bf16.msra.mxu0 %v10334_v51  ;;  %v2352_v49 = vmul.f32 %v2349_v44, %v2349_v44  ;;  %v2397_v51 = vld [vmem:[%s13676_s5] sm:$0xff] }
 0x504   : > { %10339 = vmatprep.subr.bf16.mxu1 %v11825_v34  ;;  %10351 = vmatprep.subr.bf16.mxu0 %v11825_v34 }
 0x505   : > { %v2355_v50 = vsel %vm1838_vm3, %v2352_v49, 0.0 }
 0x506   : > { %9295 = vmatmul.mubr.msk.f32.vlgmr.msra.gmra.mrb[4].mxu1 %vm1302_vm0, %v1920_v52  ;;  %9302 = vmatmul.mubr.msk.f32.vlgmr.msra.gmra.mrb[4].mxu0 %vm1302_vm0, %v2003_v53  ;;  %v2398_v52 = vld [vmem:[%s13676_s5 + $0x8] sm:$0xff] }
 0x507   : > { %10341 = vmatpush3.bf16.msra.mxu1 %v10340_v54  ;;  %10353 = vmatpush3.bf16.msra.mxu0 %v10352_v55  ;;  %v10376_v53 = vpack.c.bf16 %v2398_v52, %v2397_v51  ;;  %v2575_v54 = vld [vmem:[%s13677_s3 + $0x8] sm:$0xff]  ;;  %v2399_v55 = vld [vmem:[%s13676_s5 + $0x10] sm:$0xff] }
 0x508   : > { %10342 = vmatprep.subr.bf16.mxu1 %v11825_v34  ;;  %10354 = vmatprep.subr.bf16.mxu0 %v11825_v34  ;;  %v10388_v30 = vpack.c.bf16 %v2575_v54, %v2574_v36  ;;  %v10379_v58 = vpack.c.bf16 %v2400_v56, %v2399_v55  ;;  %v8456_v55 = vld [vmem:[%s13676_s5 + $0x28] sm:$0xff] }
 0x509   : > { %9320 = vmatprep.mubr.msk.f32.mxu1 %vm11826_vm4, %v11827_v35  ;;  %9339 = vmatprep.mubr.msk.f32.mxu0 %vm11826_vm4, %v11827_v35 }
 0x50b   : > { %10344 = vmatpush3.bf16.msra.mxu1 %v10343_v60  ;;  %10356 = vmatpush3.bf16.msra.mxu0 %v10355_v61  ;;  %v10391_v60 = vpack.c.bf16 %v2577_v59, %v2576_v57  ;;  %v8457_v57 = vld [vmem:[%s13676_s5 + $0x30] sm:$0xff] }
 0x50c   : > { %10345 = vmatprep.subr.bf16.mxu1 %v11825_v34  ;;  %10357 = vmatprep.subr.bf16.mxu0 %v11825_v34 }
 0x50f   : > { %10347 = vmatpush3.bf16.msra.mxu1 %v10346_v2  ;;  %10359 = vmatpush3.bf16.msra.mxu0 %v10358_v3 }
 0x510   : > { %10348 = vmatprep.subr.bf16.mxu1 %v11825_v34  ;;  %10360 = vmatprep.subr.bf16.mxu0 %v11825_v34 }
 0x513   : > { %10350 = vmatpush3.bf16.msra.mxu1 %v10349_v8  ;;  %10362 = vmatpush3.bf16.msra.mxu0 %v10361_v9 }
 0x514   : > { %10363 = vmatprep.subr.bf16.mxu1 %v11825_v34  ;;  %10375 = vmatprep.subr.bf16.mxu0 %v11825_v34 }
 0x550   : > { %v2360_v61 = vpop.xlane.xlu0 %2359 }
 0x551   : > { %v2365_v62 = vmul.f32 0.03125, %v2360_v61  ;;  %v8470_v61 = vld [vmem:[%s13677_s3 + $0x28] sm:$0xff] }
 0x553   : > { %v2368_v1 = vadd.f32 1e-05, %v2365_v62 }
 0x5d9   : > { %v1990_v10 = vpop.f32.mrb[4].mxu1  ;;  %v2073_v11 = vpop.f32.mrb[4].mxu0 }
 0x5da   : > { %v9296_v12 = vpop.f32.mrb[5].mxu1  ;;  %v9303_v13 = vpop.f32.mrb[5].mxu0  ;;  %9321 = vmatmul.mubr.msk.f32.vlgmr.msra.gmra.mrb[6].mxu1 %vm2086_vm5, %v2073_v11  ;;  %9340 = vmatmul.mubr.msk.f32.vlgmr.msra.gmra.mrb[6].mxu0 %vm2086_vm5, %v1990_v10 }
 0x5db   : > { %9358 = vmatprep.mubr.msk.f32.mxu1 %vm11826_vm4, %v11827_v35  ;;  %9369 = vmatprep.mubr.msk.f32.mxu0 %vm11826_vm4, %v11827_v35  ;;  %v8435_v12 = vld [vmem:[#allocation18] ss:$0 sm:$0xff] }
 0x5dc   : > { %10365 = vmatpush3.bf16.msra.mxu1 %v10364_v16  ;;  %10377 = vmatpush3.bf16.msra.mxu0 %v10376_v53 }
 0x5dd   : > { %10366 = vmatprep.subr.bf16.mxu1 %v11825_v34  ;;  %10378 = vmatprep.subr.bf16.mxu0 %v11825_v34 }
 0x5e0   : > { %10368 = vmatpush3.bf16.msra.mxu1 %v10367_v20  ;;  %10380 = vmatpush3.bf16.msra.mxu0 %v10379_v58  ;;  %v2492_v20 = vld [vmem:[%s13678_s9 + $0x10] sm:$0xff]  ;;  %v8458_v58 = vld [vmem:[%s13676_s5 + $0x38] sm:$0xff] }
 0x5e1   : > { %10369 = vmatprep.subr.bf16.mxu1 %v11825_v34  ;;  %10381 = vmatprep.subr.bf16.mxu0 %v11825_v34  ;;  %v10404_v59 = vpack.c.bf16 %v8458_v58, %v8457_v57 }
 0x5e4   : > { %10371 = vmatpush3.bf16.msra.mxu1 %v10370_v22  ;;  %v10385_v22 = vpack.c.bf16 %v2493_v21, %v2492_v20 }
 0x5e5   : > { %10372 = vmatprep.subr.bf16.mxu1 %v11825_v34 }
 0x5e8   : > { %10374 = vmatpush3.bf16.msra.mxu1 %v10373_v25 }
 0x5e9   : > { %10387 = vmatprep.subr.bf16.mxu1 %v11825_v34 }
 0x6ad   : > { %v2156_v26 = vpop.f32.mrb[6].mxu1  ;;  %v2229_v27 = vpop.f32.mrb[6].mxu0 }
 0x6ae   : > { %v2230_v29 = vadd.f32 %v2229_v27, %v2156_v26  ;;  %v9322_v31 = vpop.f32.mrb[7].mxu1  ;;  %v9341_v32 = vpop.f32.mrb[7].mxu0 }
 0x6b0   : > { %v2240_v33 = vadd.f32 %v8431_v28, %v2230_v29 }
 0x6b2   : > { %v2242_v37 = vmul.f32 1.442695, %v2240_v33  ;;  %vm2241_vm6 = vcmp.gt.f32.partialorder %v2240_v33, 0.0 }
 0x6b4   : > { %10983 = vpow2.f32 %v2242_v37 }
 0x6b5   : > { %10985 = vrsqrt.f32 %v2368_v1 }
 0x6be   : > { %v10984_v38 = vpop.eup %10983 }
 0x6bf   : > { %v8432_v40 = vadd.f32 -1.0, %v10984_v38  ;;  %v10986_v8 = vpop.eup %10985 }
 0x6c0   : > { %v2374_v10 = vmul.f32 %v10986_v8, %v12407_v39 }
 0x6c1   : > { %v2245_v41 = vsel %vm2241_vm6, %v2240_v33, %v8432_v40 }
 0x6c2   : > { %9359 = vmatmul.mubr.msk.f32.vlgmr.msra.gmra.mrb[8].mxu1 %vm2086_vm5, %v2245_v41  ;;  %v2383_v15 = vmul.f32 %v8435_v12, %v2374_v10 }
 0x6c3   : > { %9403 = vmatprep.mubr.msk.f32.mxu1 %vm11826_vm4, %v11827_v35  ;;  %10389 = vmatpush3.bf16.msra.mxu1 %v10388_v30  ;;  %v8455_v30 = vld [vmem:[%s13676_s5 + $0x20] sm:$0xff] }
 0x6c4   : > { %10390 = vmatprep.subr.bf16.mxu1 %v11825_v34  ;;  %v12493_v39 = vadd.f32 %v8436_v14, %v2383_v15  ;;  %v10401_v56 = vpack.c.bf16 %v8456_v55, %v8455_v30  ;;  %v8462_v30 = vld [vmem:[%s13678_s9 + $0x20] sm:$0xff]  ;;  %v8463_v55 = vld [vmem:[%s13678_s9 + $0x28] sm:$0xff] }
 0x6c5   : > { %v10407_v57 = vpack.c.bf16 %v8463_v55, %v8462_v30  ;;  %v8488_v55 = vld [vmem:[%s13681_s23 + $0x58] sm:$0xff] }
 0x6c7   : > { %10392 = vmatpush3.bf16.msra.mxu1 %v10391_v60  ;;  %v8469_v60 = vld [vmem:[%s13677_s3 + $0x20] sm:$0xff] }
 0x6c8   : > { %10397 = vmatprep.subr.bf16.mxu1 %v11825_v34  ;;  %v10413_v62 = vpack.c.bf16 %v8470_v61, %v8469_v60  ;;  %v8465_v60 = vld [vmem:[%s13678_s9 + $0x38] sm:$0xff] }
 0x795   : > { %v2330_v45 = vpop.f32.mrb[8].mxu1 }
 0x796   : > { %v2331_v46 = vadd.f32 %v8433_v43, %v2330_v45  ;;  %v9360_v47 = vpop.f32.mrb[9].mxu1 }
 0x798   : > { %v2342_v48 = vsel %vm1838_vm3, %v2331_v46, 0.0 }
 0x799   : > { %2343 = vadd.xlane.f32.xlu1 %v2342_v48 }
 0x79d   : > { %2356 = vadd.xlane.f32.xlu1 %v2355_v50 }
 0x826   : > { %v2344_v63 = vpop.xlane.xlu1 %2343 }
 0x827   : > { %v2348_v0 = vmul.f32 0.03125, %v2344_v63  ;;  %v8471_v63 = vld [vmem:[%s13677_s3 + $0x30] sm:$0xff] }
 0x829   : > { %v2351_v2 = vsub.f32 %v2331_v46, %v2348_v0  ;;  %v8472_v0 = vld [vmem:[%s13677_s3 + $0x38] sm:$0xff] }
 0x82a   : > { %v2357_v3 = vpop.xlane.xlu1 %2356  ;;  %v10416_v1 = vpack.c.bf16 %v8472_v0, %v8471_v63 }
 0x82b   : > { %v2364_v4 = vmul.f32 0.03125, %v2357_v3  ;;  %v2354_v5 = vmul.f32 %v2351_v2, %v2351_v2 }
 0x82d   : > { %v2367_v6 = vadd.f32 1e-05, %v2364_v4  ;;  %v2361_v7 = vsel %vm1838_vm3, %v2354_v5, 0.0 }
 0x82e   : > { %2362 = vadd.xlane.f32.xlu1 %v2361_v7 }
 0x82f   : > { %10987 = vrsqrt.f32 %v2367_v6  ;;  %v12592_v6 = vld [vmem:[#allocation21 + $0x8] sm:$0xff] }
 0x839   : > { %v10988_v9 = vpop.eup %10987 }
 0x83a   : > { %v2373_v11 = vmul.f32 %v10988_v9, %v2349_v44 }
 0x83c   : > { %v2382_v13 = vmul.f32 %v8435_v12, %v2373_v11  ;;  %v12596_v11 = vld [vmem:[#allocation21 + $0x10] sm:$0xff] }
 0x83e   : > { %v12483_v16 = vadd.f32 %v8436_v14, %v2382_v13 }
 0x840   : > { %9370 = vmatmul.mubr.msk.f32.vlgmr.msra.gmra.mrb[8].mxu0 %vm1838_vm3, %v12483_v16  ;;  %9404 = vmatmul.mubr.msk.f32.vlgmr.msra.gmra.mrb[10].mxu1 %vm1838_vm3, %v12483_v16 }
 0x841   : > { %9372 = vmatprep.mubr.msk.f32.mxu0 %vm11826_vm4, %v11827_v35  ;;  %9406 = vmatprep.mubr.msk.f32.mxu1 %vm11826_vm4, %v11827_v35 }
 0x842   : > { %10383 = vmatpush3.bf16.msra.mxu0 %v10382_v19 }
 0x843   : > { %10384 = vmatprep.subr.bf16.mxu0 %v11825_v34 }
 0x844   : > { %9373 = vmatmul.mubr.msk.f32.gmra.mrb[10].mxu0 %vm1838_vm3, %v12493_v39  ;;  %9407 = vmatmul.mubr.msk.f32.gmra.mrb[12].mxu1 %vm1838_vm3, %v12493_v39 }
 0x845   : > { %9375 = vmatprep.mubr.msk.f32.mxu0 %vm11826_vm4, %v11827_v35  ;;  %9409 = vmatprep.mubr.msk.f32.mxu1 %vm11826_vm4, %v11827_v35 }
 0x846   : > { %10386 = vmatpush3.bf16.msra.mxu0 %v10385_v22 }
 0x847   : > { %10393 = vmatprep.subr.bf16.mxu0 %v11825_v34 }
 0x8bb   : > { %v2363_v23 = vpop.xlane.xlu1 %2362 }
 0x8bc   : > { %v2366_v24 = vmul.f32 0.03125, %v2363_v23 }
 0x8be   : > { %v2369_v25 = vadd.f32 1e-05, %v2366_v24 }
 0x8c0   : > { %10989 = vrsqrt.f32 %v2369_v25 }
 0x8ca   : > { %v10990_v26 = vpop.eup %10989 }
 0x8cb   : > { %v2375_v27 = vmul.f32 %v10990_v26, %v2351_v2  ;;  %v12589_v2 = vld [vmem:[#allocation21] sm:$0xff] }
 0x8cd   : > { %v2384_v28 = vmul.f32 %v8435_v12, %v2375_v27 }
 0x8cf   : > { %v12509_v29 = vadd.f32 %v8436_v14, %v2384_v28 }
 0x8d1   : > { %9376 = vmatmul.mubr.msk.f32.gmra.mrb[12].mxu0 %vm1838_vm3, %v12509_v29  ;;  %9410 = vmatmul.mubr.msk.f32.gmra.mrb[14].mxu1 %vm1838_vm3, %v12509_v29 }
 0x8d2   : > { %9386 = vmatprep.mubr.msk.f32.mxu0 %vm11826_vm4, %v11827_v35  ;;  %9433 = vmatprep.mubr.msk.f32.mxu1 %vm11826_vm4, %v11827_v35 }
 0x8d5   : > { %9387 = vmatmul.mubr.msk.f32.vlgmr.msra.gmra.mrb[14].mxu0 %vm1838_vm3, %v12483_v16 }
 0x8d6   : > { %9389 = vmatprep.mubr.msk.f32.mxu0 %vm11826_vm4, %v11827_v35 }
 0x8d9   : > { %9390 = vmatmul.mubr.msk.f32.gmra.mrb[16].mxu0 %vm1838_vm3, %v12493_v39 }
 0x8da   : > { %9392 = vmatprep.mubr.msk.f32.mxu0 %vm11826_vm4, %v11827_v35 }
 0x8dd   : > { %9393 = vmatmul.mubr.msk.f32.gmra.mrb[18].mxu0 %vm1838_vm3, %v12509_v29 }
 0x8de   : > { %9418 = vmatprep.mubr.msk.f32.mxu0 %vm11826_vm4, %v11827_v35 }
 0x913   : > { %v2476_v31 = vpop.f32.mrb[8].mxu0  ;;  %v2644_v32 = vpop.f32.mrb[10].mxu1 }
 0x914   : > { %v9371_v33 = vpop.f32.mrb[9].mxu0  ;;  %v9405_v37 = vpop.f32.mrb[11].mxu1 }
 0x917   : > { %v2481_v38 = vpop.f32.mrb[10].mxu0  ;;  %v2649_v40 = vpop.f32.mrb[12].mxu1 }
 0x918   : > { %v10398_v41 = vpack.c.bf16 %v2649_v40, %v2644_v32  ;;  %v9374_v42 = vpop.f32.mrb[11].mxu0  ;;  %v9408_v43 = vpop.f32.mrb[13].mxu1 }
 0x91a   : > { %10399 = vmatpush3.bf16.msra.mxu1 %v10398_v41 }
 0x91b   : > { %9431 = vmatprep.subr.mxu1 %v11827_v35 }
 0x9a4   : > { %v2486_v44 = vpop.f32.mrb[12].mxu0  ;;  %v2654_v45 = vpop.f32.mrb[14].mxu1 }
 0x9a5   : > { %v9377_v46 = vpop.f32.mrb[13].mxu0  ;;  %v9411_v47 = vpop.f32.mrb[15].mxu1  ;;  %9432 = vmatpush3.msra.mxu1 %v2654_v45 }
 0x9a6   : > { %10406 = vmatprep.subr.bf16.mxu1 %v11825_v34 }
 0x9a8   : > { %v2560_v48 = vpop.f32.mrb[14].mxu0 }
 0x9a9   : > { %v9388_v49 = vpop.f32.mrb[15].mxu0 }
 0x9ac   : > { %v2565_v50 = vpop.f32.mrb[16].mxu0 }
 0x9ad   : > { %v10394_v52 = vpack.c.bf16 %v2565_v50, %v2560_v48  ;;  %v9391_v36 = vpop.f32.mrb[17].mxu0 }
 0x9af   : > { %10396 = vmatpush3.bf16.xpose.msk.msra.mxu0 %vm12535_vm7, %v10394_v52 }
 0x9b0   : > { %v2570_v53 = vpop.f32.mrb[18].mxu0  ;;  %9416 = vmatprep.subr.mxu0 %v11827_v35 }
 0x9b1   : > { %v9394_v54 = vpop.f32.mrb[19].mxu0 }
 0x9b7   : > { %9417 = vmatpush3.xpose.msk.msra.mxu0 %vm2086_vm5, %v2570_v53 }
 0x9b8   : > { %10400 = vmatprep.subr.bf16.mxu0 %v11825_v34 }
 0x9ba   : > { %9419 = vmatmul.mubr.msk.f32.vlgmr.msra.gmra.mrb[20].mxu0 %vm2086_vm5, %v2476_v31 }
 0x9bb   : > { %9421 = vmatprep.mubr.msk.f32.mxu0 %vm11826_vm4, %v11827_v35  ;;  %10402 = vmatpush3.bf16.msra.mxu0 %v10401_v56 }
 0x9bc   : > { %10403 = vmatprep.subr.bf16.mxu0 %v11825_v34 }
 0x9be   : > { %9422 = vmatmul.mubr.msk.f32.gmra.mrb[22].mxu0 %vm2086_vm5, %v2481_v38 }
 0x9bf   : > { %9424 = vmatprep.mubr.msk.f32.mxu0 %vm11826_vm4, %v11827_v35  ;;  %10405 = vmatpush3.bf16.msra.mxu0 %v10404_v59  ;;  %v8464_v59 = vld [vmem:[%s13678_s9 + $0x30] sm:$0xff] }
 0x9c0   : > { %10412 = vmatprep.subr.bf16.mxu0 %v11825_v34 }
 0x9c2   : > { %9425 = vmatmul.mubr.msk.f32.gmra.mrb[24].mxu0 %vm2086_vm5, %v2486_v44 }
 0x9c3   : > { %9450 = vmatprep.mubr.msk.f32.mxu0 %vm11826_vm4, %v11827_v35 }
 0x9c6   : > { %9451 = vmatmul.mubr.msk.f32.vlgmr.msra.gmra.mrb[26].mxu0 %vm1838_vm3, %v12483_v16 }
 0x9c7   : > { %9453 = vmatprep.mubr.msk.f32.mxu0 %vm11826_vm4, %v11827_v35  ;;  %10414 = vmatpush3.bf16.msra.mxu0 %v10413_v62  ;;  %v10410_v62 = vpack.c.bf16 %v8465_v60, %v8464_v59  ;;  %v8491_v60 = vld [vmem:[%s13681_s23 + $0x70] sm:$0xff] }
 0x9c8   : > { %10415 = vmatprep.subr.bf16.mxu0 %v11825_v34 }
 0x9ca   : > { %9454 = vmatmul.mubr.msk.f32.gmra.mrb[28].mxu0 %vm1838_vm3, %v12493_v39 }
 0x9cb   : > { %9456 = vmatprep.mubr.msk.f32.mxu0 %vm11826_vm4, %v11827_v35  ;;  %10417 = vmatpush3.bf16.msra.mxu0 %v10416_v1 }
 0x9cc   : > { %10422 = vmatprep.subr.bf16.mxu0 %v11825_v34 }
 0x9ce   : > { %9457 = vmatmul.mubr.msk.f32.gmra.mrb[30].mxu0 %vm1838_vm3, %v12509_v29 }
 0x9cf   : > { %9484 = vmatprep.mubr.msk.f32.mxu0 %vm11826_vm4, %v11827_v35 }
 0x9d2   : > { %9485 = vmatmul.mubr.msk.f32.vlgmr.msra.gmra.mrb[32].mxu0 %vm1838_vm3, %v12483_v16 }
 0x9d3   : > { %9487 = vmatprep.mubr.msk.f32.mxu0 %vm11826_vm4, %v11827_v35 }
 0x9d6   : > { %9488 = vmatmul.mubr.msk.f32.gmra.mrb[34].mxu0 %vm1838_vm3, %v12493_v39 }
 0x9d7   : > { %9490 = vmatprep.mubr.msk.f32.mxu0 %vm11826_vm4, %v11827_v35 }
 0x9da   : > { %9491 = vmatmul.mubr.msk.f32.gmra.mrb[36].mxu0 %vm1838_vm3, %v12509_v29 }
 0x9db   : > { %9514 = vmatprep.mubr.msk.f32.mxu0 %vm11826_vm4, %v11827_v35 }
 0xa8d   : > { %v2742_v3 = vpop.f32.mrb[20].mxu0 }
 0xa8e   : > { %v2743_v4 = vadd.f32 %v2742_v3, %v12589_v2  ;;  %v9420_v5 = vpop.f32.mrb[21].mxu0 }
 0xa90   : > { %v2757_v7 = vsel %vm2756_vm8, %v2743_v4, -inf }
 0xa91   : > { %2758 = vmax.xlane.f32.xlu0 %v2757_v7  ;;  %v2747_v8 = vpop.f32.mrb[22].mxu0 }
 0xa92   : > { %v2748_v9 = vadd.f32 %v2747_v8, %v12592_v6  ;;  %v9423_v10 = vpop.f32.mrb[23].mxu0 }
 0xa94   : > { %v2760_v12 = vsel %vm2756_vm8, %v2748_v9, -inf }
 0xa95   : > { %2761 = vmax.xlane.f32.xlu1 %v2760_v12  ;;  %v2752_v13 = vpop.f32.mrb[24].mxu0 }
 0xa96   : > { %v2753_v14 = vadd.f32 %v2752_v13, %v12596_v11  ;;  %v9426_v15 = vpop.f32.mrb[25].mxu0 }
 0xa98   : > { %v2763_v17 = vsel %vm2756_vm8, %v2753_v14, -inf }
 0xa99   : > { %2764 = vmax.xlane.f32.xlu0 %v2763_v17  ;;  %v12601_v18 = vpop.f32.mrb[26].mxu0 }
 0xa9a   : > { %v9452_v19 = vpop.f32.mrb[27].mxu0 }
 0xa9d   : > { %v12603_v20 = vpop.f32.mrb[28].mxu0 }
 0xa9e   : > { %v9455_v21 = vpop.f32.mrb[29].mxu0 }
 0xaa1   : > { %v12605_v22 = vpop.f32.mrb[30].mxu0 }
 0xaa2   : > { %v9458_v23 = vpop.f32.mrb[31].mxu0 }
 0xaa5   : > { %v3128_v24 = vpop.f32.mrb[32].mxu0 }
 0xaa6   : > { %v9486_v25 = vpop.f32.mrb[33].mxu0 }
 0xaa9   : > { %v3133_v26 = vpop.f32.mrb[34].mxu0 }
 0xaaa   : > { %v10423_v27 = vpack.c.bf16 %v3133_v26, %v3128_v24  ;;  %v9489_v28 = vpop.f32.mrb[35].mxu0 }
 0xaac   : > { %10424 = vmatpush3.bf16.msra.mxu0 %v10423_v27 }
 0xaad   : > { %v3138_v31 = vpop.f32.mrb[36].mxu0  ;;  %9512 = vmatprep.subr.mxu0 %v11827_v35 }
 0xaae   : > { %v9492_v32 = vpop.f32.mrb[37].mxu0 }
 0xab0   : > { %9513 = vmatpush3.msra.mxu0 %v3138_v31 }
 0xab1   : > { %10437 = vmatprep.subr.bf16.mxu0 %v11825_v34 }
 0xb1e   : > { %v2759_v33 = vpop.xlane.xlu0 %2758 }
 0xb1f   : > { %v2766_v37 = vsub.f32 %v2743_v4, %v2759_v33 }
 0xb21   : > { %v2769_v38 = vmul.f32 1.442695, %v2766_v37 }
 0xb22   : > { %v2762_v40 = vpop.xlane.xlu1 %2761 }
 0xb23   : > { %10991 = vpow2.f32 %v2769_v38  ;;  %v2767_v41 = vsub.f32 %v2748_v9, %v2762_v40 }
 0xb25   : > { %v2771_v42 = vmul.f32 1.442695, %v2767_v41 }
 0xb26   : > { %v2765_v43 = vpop.xlane.xlu0 %2764 }
 0xb27   : > { %10993 = vpow2.f32 %v2771_v42  ;;  %v2768_v44 = vsub.f32 %v2753_v14, %v2765_v43 }
 0xb29   : > { %v2773_v45 = vmul.f32 1.442695, %v2768_v44 }
 0xb2b   : > { %10995 = vpow2.f32 %v2773_v45 }
 0xb2d   : > { %v10992_v46 = vpop.eup %10991 }
 0xb2e   : > { %v2775_v47 = vsel %vm2756_vm8, %v10992_v46, 0.0 }
 0xb2f   : > { %2776 = vadd.xlane.f32.xlu1 %v2775_v47 }
 0xb31   : > { %v10994_v48 = vpop.eup %10993 }
 0xb32   : > { %v2778_v49 = vsel %vm2756_vm8, %v10994_v48, 0.0 }
 0xb33   : > { %2779 = vadd.xlane.f32.xlu0 %v2778_v49 }
 0xb35   : > { %v10996_v50 = vpop.eup %10995 }
 0xb36   : > { %v2781_v52 = vsel %vm2756_vm8, %v10996_v50, 0.0 }
 0xb37   : > { %2782 = vadd.xlane.f32.xlu1 %v2781_v52 }
 0xbbc   : > { %v2777_v36 = vpop.xlane.xlu1 %2776 }
 0xbbd   : > { %10997 = vrcp.f32 %v2777_v36  ;;  %v8485_v36 = vld [vmem:[%s13681_s23 + $0x40] sm:$0xff] }
 0xbc0   : > { %v2780_v53 = vpop.xlane.xlu0 %2779 }
 0xbc1   : > { %10999 = vrcp.f32 %v2780_v53  ;;  %v8486_v53 = vld [vmem:[%s13681_s23 + $0x48] sm:$0xff] }
 0xbc2   : > { %v10426_v30 = vpack.c.bf16 %v8486_v53, %v8485_v36  ;;  %v8516_v36 = vld [vmem:[%s13677_s3 + $0x58] sm:$0xff] }
 0xbc4   : > { %v2783_v54 = vpop.xlane.xlu1 %2782 }
 0xbc5   : > { %11001 = vrcp.f32 %v2783_v54  ;;  %v8487_v54 = vld [vmem:[%s13681_s23 + $0x50] sm:$0xff] }
 0xbc7   : > { %v10998_v56 = vpop.eup %10997 }
 0xbc8   : > { %v2787_v58 = vmul.f32 %v10998_v56, %v10992_v46  ;;  %v10429_v56 = vpack.c.bf16 %v8488_v55, %v8487_v54 }
 0xbca   : > { %9434 = vmatmul.mubr.msk.f32.vlgmr.msra.gmra.mrb[16].mxu1 %vm2756_vm8, %v2787_v58  ;;  %v8490_v58 = vld [vmem:[%s13681_s23 + $0x68] sm:$0xff] }
 0xbcb   : > { %v11000_v61 = vpop.eup %10999  ;;  %9436 = vmatprep.mubr.msk.f32.mxu1 %vm11826_vm4, %v11827_v35  ;;  %10408 = vmatpush3.bf16.msra.mxu1 %v10407_v57  ;;  %v8489_v57 = vld [vmem:[%s13681_s23 + $0x60] sm:$0xff] }
 0xbcc   : > { %v2788_v63 = vmul.f32 %v11000_v61, %v10994_v48  ;;  %10409 = vmatprep.subr.bf16.mxu1 %v11825_v34  ;;  %v10432_v59 = vpack.c.bf16 %v8490_v58, %v8489_v57  ;;  %v8492_v61 = vld [vmem:[%s13681_s23 + $0x78] sm:$0xff] }
 0xbce   : > { %9437 = vmatmul.mubr.msk.f32.gmra.mrb[18].mxu1 %vm2756_vm8, %v2788_v63 }
 0xbcf   : > { %v11002_v0 = vpop.eup %11001  ;;  %9439 = vmatprep.mubr.msk.f32.mxu1 %vm11826_vm4, %v11827_v35  ;;  %10411 = vmatpush3.bf16.msra.mxu1 %v10410_v62  ;;  %v10435_v62 = vpack.c.bf16 %v8492_v61, %v8491_v60 }
 0xbd0   : > { %v2789_v1 = vmul.f32 %v11002_v0, %v10996_v50  ;;  %10418 = vmatprep.subr.bf16.mxu1 %v11825_v34 }
 0xbd2   : > { %9440 = vmatmul.mubr.msk.f32.gmra.mrb[20].mxu1 %vm2756_vm8, %v2789_v1 }
 0xbd3   : > { %9467 = vmatprep.mubr.msk.f32.mxu1 %vm11826_vm4, %v11827_v35 }
 0xbd6   : > { %9468 = vmatmul.mubr.msk.f32.vlgmr.msra.gmra.mrb[22].mxu1 %vm1838_vm3, %v12483_v16 }
 0xbd7   : > { %9470 = vmatprep.mubr.msk.f32.mxu1 %vm11826_vm4, %v11827_v35 }
 0xbda   : > { %9471 = vmatmul.mubr.msk.f32.gmra.mrb[24].mxu1 %vm1838_vm3, %v12493_v39 }
 0xbdb   : > { %9473 = vmatprep.mubr.msk.f32.mxu1 %vm11826_vm4, %v11827_v35 }
 0xbde   : > { %9474 = vmatmul.mubr.msk.f32.gmra.mrb[26].mxu1 %vm1838_vm3, %v12509_v29 }
 0xbdf   : > { %9499 = vmatprep.mubr.msk.f32.mxu1 %vm11826_vm4, %v11827_v35 }
 0xc9d   : > { %v12639_v3 = vpop.f32.mrb[16].mxu1 }
 0xc9e   : > { %v9435_v4 = vpop.f32.mrb[17].mxu1 }
 0xc9f   : > { %v2879_v4 = vld [vmem:[%s13681_s23] sm:$0xff] }
 0xca1   : > { %v12641_v5 = vpop.f32.mrb[18].mxu1 }
 0xca2   : > { %v9438_v7 = vpop.f32.mrb[19].mxu1 }
 0xca3   : > { %v2880_v7 = vld [vmem:[%s13681_s23 + $0x8] sm:$0xff] }
 0xca5   : > { %v12643_v8 = vpop.f32.mrb[20].mxu1 }
 0xca6   : > { %v9441_v9 = vpop.f32.mrb[21].mxu1 }
 0xca9   : > { %v3043_v10 = vpop.f32.mrb[22].mxu1 }
 0xcaa   : > { %v9469_v12 = vpop.f32.mrb[23].mxu1 }
 0xcad   : > { %v3048_v13 = vpop.f32.mrb[24].mxu1 }
 0xcae   : > { %v10419_v14 = vpack.c.bf16 %v3048_v13, %v3043_v10  ;;  %v9472_v15 = vpop.f32.mrb[25].mxu1  ;;  %v10438_v10 = vpack.c.bf16 %v2880_v7, %v2879_v4  ;;  %v2881_v13 = vld [vmem:[%s13681_s23 + $0x10] sm:$0xff] }
 0xcb0   : > { %10421 = vmatpush3.bf16.xpose.msk.msra.mxu1 %vm12535_vm7, %v10419_v14  ;;  %v2882_v14 = vld [vmem:[%s13681_s23 + $0x18] sm:$0xff] }
 0xcb1   : > { %v3053_v17 = vpop.f32.mrb[26].mxu1  ;;  %9497 = vmatprep.subr.mxu1 %v11827_v35 }
 0xcb2   : > { %v9475_v19 = vpop.f32.mrb[27].mxu1 }
 0xcb8   : > { %9498 = vmatpush3.xpose.msk.msra.mxu1 %vm2086_vm5, %v3053_v17  ;;  %v10441_v17 = vpack.c.bf16 %v2882_v14, %v2881_v13 }
 0xcb9   : > { %10425 = vmatprep.subr.bf16.mxu1 %v11825_v34 }
 0xcbb   : > { %9500 = vmatmul.mubr.msk.f32.vlgmr.msra.gmra.mrb[28].mxu1 %vm2086_vm5, %v12601_v18 }
 0xcbc   : > { %9502 = vmatprep.mubr.msk.f32.mxu1 %vm11826_vm4, %v11827_v35  ;;  %10427 = vmatpush3.bf16.msra.mxu1 %v10426_v30 }
 0xcbd   : > { %10428 = vmatprep.subr.bf16.mxu1 %v11825_v34 }
 0xcbf   : > { %9503 = vmatmul.mubr.msk.f32.gmra.mrb[30].mxu1 %vm2086_vm5, %v12603_v20 }
 0xcc0   : > { %9505 = vmatprep.mubr.msk.f32.mxu1 %vm11826_vm4, %v11827_v35  ;;  %10430 = vmatpush3.bf16.msra.mxu1 %v10429_v56 }
 0xcc1   : > { %10431 = vmatprep.subr.bf16.mxu1 %v11825_v34 }
 0xcc3   : > { %9506 = vmatmul.mubr.msk.f32.gmra.mrb[32].mxu1 %vm2086_vm5, %v12605_v22 }
 0xcc4   : > { %9539 = vmatprep.mubr.msk.f32.mxu1 %vm11826_vm4, %v11827_v35  ;;  %10433 = vmatpush3.bf16.msra.mxu1 %v10432_v59 }
 0xcc5   : > { %10434 = vmatprep.subr.bf16.mxu1 %v11825_v34 }
 0xcc8   : > { %10436 = vmatpush3.bf16.msra.mxu1 %v10435_v62 }
 0xcc9   : > { %10449 = vmatprep.subr.bf16.mxu1 %v11825_v34 }
 0xd8e   : > { %v3226_v21 = vpop.f32.mrb[28].mxu1 }
 0xd8f   : > { %v3227_v23 = vadd.f32 %v3226_v21, %v12589_v2  ;;  %v9501_v24 = vpop.f32.mrb[29].mxu1  ;;  %v2883_v21 = vld [vmem:[%s13681_s23 + $0x20] sm:$0xff] }
 0xd91   : > { %v3240_v18 = vsel %vm2756_vm8, %v3227_v23, -inf }
 0xd92   : > { %3241 = vmax.xlane.f32.xlu0 %v3240_v18  ;;  %v3231_v25 = vpop.f32.mrb[30].mxu1 }
 0xd93   : > { %v3232_v26 = vadd.f32 %v3231_v25, %v12592_v6  ;;  %v9504_v20 = vpop.f32.mrb[31].mxu1 }
 0xd94   : > { %v2886_v20 = vld [vmem:[%s13681_s23 + $0x38] sm:$0xff] }
 0xd95   : > { %v3243_v27 = vsel %vm2756_vm8, %v3232_v26, -inf }
 0xd96   : > { %3244 = vmax.xlane.f32.xlu1 %v3243_v27  ;;  %v3236_v28 = vpop.f32.mrb[32].mxu1 }
 0xd97   : > { %v3237_v22 = vadd.f32 %v3236_v28, %v12596_v11  ;;  %v9507_v31 = vpop.f32.mrb[33].mxu1  ;;  %v8506_v28 = vld [vmem:[%s13678_s9 + $0x40] sm:$0xff] }
 0xd99   : > { %v3246_v32 = vsel %vm2756_vm8, %v3237_v22, -inf }
 0xd9a   : > { %3247 = vmax.xlane.f32.xlu0 %v3246_v32  ;;  %v8508_v32 = vld [vmem:[%s13678_s9 + $0x50] sm:$0xff] }
 0xe1f   : > { %v3242_v33 = vpop.xlane.xlu0 %3241 }
 0xe20   : > { %v3249_v37 = vsub.f32 %v3227_v23, %v3242_v33  ;;  %v2884_v23 = vld [vmem:[%s13681_s23 + $0x28] sm:$0xff]  ;;  %v8509_v33 = vld [vmem:[%s13678_s9 + $0x58] sm:$0xff] }
 0xe21   : > { %v10444_v18 = vpack.c.bf16 %v2884_v23, %v2883_v21 }
 0xe22   : > { %v3252_v38 = vmul.f32 1.442695, %v3249_v37  ;;  %v10459_v37 = vpack.c.bf16 %v8509_v33, %v8508_v32 }
 0xe23   : > { %v3245_v40 = vpop.xlane.xlu1 %3244 }
 0xe24   : > { %11003 = vpow2.f32 %v3252_v38  ;;  %v3250_v41 = vsub.f32 %v3232_v26, %v3245_v40  ;;  %v2885_v26 = vld [vmem:[%s13681_s23 + $0x30] sm:$0xff]  ;;  %v8502_v40 = vld [vmem:[%s13676_s5 + $0x58] sm:$0xff] }
 0xe25   : > { %v10447_v27 = vpack.c.bf16 %v2886_v20, %v2885_v26  ;;  %v8501_v38 = vld [vmem:[%s13676_s5 + $0x50] sm:$0xff] }
 0xe26   : > { %v3254_v42 = vmul.f32 1.442695, %v3250_v41 }
 0xe27   : > { %v3248_v43 = vpop.xlane.xlu0 %3247 }
 0xe28   : > { %11005 = vpow2.f32 %v3254_v42  ;;  %v3251_v44 = vsub.f32 %v3237_v22, %v3248_v43  ;;  %v8507_v22 = vld [vmem:[%s13678_s9 + $0x48] sm:$0xff]  ;;  %v10453_v43 = vpack.c.bf16 %v8502_v40, %v8501_v38 }
 0xe29   : > { %v10456_v31 = vpack.c.bf16 %v8507_v22, %v8506_v28 }
 0xe2a   : > { %v3256_v45 = vmul.f32 1.442695, %v3251_v44 }
 0xe2c   : > { %11007 = vpow2.f32 %v3256_v45 }
 0xe2e   : > { %v11004_v46 = vpop.eup %11003 }
 0xe2f   : > { %v3258_v47 = vsel %vm2756_vm8, %v11004_v46, 0.0 }
 0xe30   : > { %3259 = vadd.xlane.f32.xlu1 %v3258_v47  ;;  %v8514_v47 = vld [vmem:[%s13677_s3 + $0x48] sm:$0xff] }
 0xe32   : > { %v11006_v48 = vpop.eup %11005 }
 0xe33   : > { %v3261_v49 = vsel %vm2756_vm8, %v11006_v48, 0.0 }
 0xe34   : > { %3262 = vadd.xlane.f32.xlu0 %v3261_v49 }
 0xe36   : > { %v11008_v50 = vpop.eup %11007 }
 0xe37   : > { %v3264_v52 = vsel %vm2756_vm8, %v11008_v50, 0.0 }
 0xe38   : > { %3265 = vadd.xlane.f32.xlu1 %v3264_v52  ;;  %v8515_v52 = vld [vmem:[%s13677_s3 + $0x50] sm:$0xff] }
 0xe39   : > { %v10465_v53 = vpack.c.bf16 %v8516_v36, %v8515_v52 }
 0xebd   : > { %v3260_v63 = vpop.xlane.xlu1 %3259 }
 0xebe   : > { %11009 = vrcp.f32 %v3260_v63 }
 0xec1   : > { %v3263_v0 = vpop.xlane.xlu0 %3262 }
 0xec2   : > { %11011 = vrcp.f32 %v3263_v0 }
 0xec5   : > { %v3266_v1 = vpop.xlane.xlu1 %3265 }
 0xec6   : > { %11013 = vrcp.f32 %v3266_v1 }
 0xec8   : > { %v11010_v9 = vpop.eup %11009 }
 0xec9   : > { %v3270_v12 = vmul.f32 %v11010_v9, %v11004_v46  ;;  %v8513_v46 = vld [vmem:[%s13677_s3 + $0x40] sm:$0xff] }
 0xecb   : > { %9515 = vmatmul.mubr.msk.f32.vlgmr.msra.gmra.mrb[38].mxu0 %vm2756_vm8, %v3270_v12 }
 0xecc   : > { %v11012_v15 = vpop.eup %11011  ;;  %10439 = vmatpush3.bf16.msra.mxu0 %v10438_v10  ;;  %9517 = vmatprep.mubr.msk.f32.mxu0 %vm11826_vm4, %v11827_v35 }
 0xecd   : > { %10440 = vmatprep.subr.bf16.mxu0 %v11825_v34  ;;  %v3271_v19 = vmul.f32 %v11012_v15, %v11006_v48 }
 0xecf   : > { %9518 = vmatmul.mubr.msk.f32.gmra.mrb[40].mxu0 %vm2756_vm8, %v3271_v19 }
 0xed0   : > { %v11014_v24 = vpop.eup %11013  ;;  %10442 = vmatpush3.bf16.msra.mxu0 %v10441_v17  ;;  %9520 = vmatprep.mubr.msk.f32.mxu0 %vm11826_vm4, %v11827_v35 }
 0xed1   : > { %10443 = vmatprep.subr.bf16.mxu0 %v11825_v34  ;;  %v3272_v25 = vmul.f32 %v11014_v24, %v11008_v50  ;;  %v10462_v50 = vpack.c.bf16 %v8514_v47, %v8513_v46 }
 0xed3   : > { %9521 = vmatmul.mubr.msk.f32.gmra.mrb[42].mxu0 %vm2756_vm8, %v3272_v25 }
 0xed4   : > { %10445 = vmatpush3.bf16.msra.mxu0 %v10444_v18  ;;  %9564 = vmatprep.mubr.msk.f32.mxu0 %vm11826_vm4, %v11827_v35 }
 0xed5   : > { %10446 = vmatprep.subr.bf16.mxu0 %v11825_v34 }
 0xed8   : > { %10448 = vmatpush3.bf16.msra.mxu0 %v10447_v27 }
 0xed9   : > { %10455 = vmatprep.subr.bf16.mxu0 %v11825_v34 }
 0xedb   : > { %9565 = vmatmul.mubr.msk.f32.vlgmr.msra.gmra.mrb[44].mxu0 %vm2086_vm5, %v12639_v3  ;;  %v8499_v3 = vld [vmem:[%s13676_s5 + $0x40] sm:$0xff] }
 0xedc   : > { %9567 = vmatprep.mubr.msk.f32.mxu0 %vm11826_vm4, %v11827_v35  ;;  %10457 = vmatpush3.bf16.msra.mxu0 %v10456_v31 }
 0xedd   : > { %10458 = vmatprep.subr.bf16.mxu0 %v11825_v34 }
 0xedf   : > { %9568 = vmatmul.mubr.msk.f32.gmra.mrb[46].mxu0 %vm2086_vm5, %v12641_v5  ;;  %v8500_v5 = vld [vmem:[%s13676_s5 + $0x48] sm:$0xff] }
 0xee0   : > { %9570 = vmatprep.mubr.msk.f32.mxu0 %vm11826_vm4, %v11827_v35  ;;  %10460 = vmatpush3.bf16.msra.mxu0 %v10459_v37 }
 0xee1   : > { %10467 = vmatprep.subr.bf16.mxu0 %v11825_v34 }
 0xee3   : > { %9571 = vmatmul.mubr.msk.f32.gmra.mrb[48].mxu0 %vm2086_vm5, %v12643_v8  ;;  %v10450_v8 = vpack.c.bf16 %v8500_v5, %v8499_v3 }
 0xee4   : > { %9598 = vmatprep.mubr.msk.f32.mxu0 %vm11826_vm4, %v11827_v35 }
 0xee7   : > { %9599 = vmatmul.mubr.msk.f32.vlgmr.msra.gmra.mrb[50].mxu0 %vm1838_vm3, %v12483_v16 }
 0xee8   : > { %9601 = vmatprep.mubr.msk.f32.mxu0 %vm11826_vm4, %v11827_v35 }
 0xeeb   : > { %9602 = vmatmul.mubr.msk.f32.gmra.mrb[52].mxu0 %vm1838_vm3, %v12493_v39 }
 0xeec   : > { %9604 = vmatprep.mubr.msk.f32.mxu0 %vm11826_vm4, %v11827_v35 }
 0xeef   : > { %9605 = vmatmul.mubr.msk.f32.gmra.mrb[54].mxu0 %vm1838_vm3, %v12509_v29 }
 0xef0   : > { %9630 = vmatprep.mubr.msk.f32.mxu0 %vm11826_vm4, %v11827_v35 }
 0xf9e   : > { %v3348_v41 = vpop.f32.mrb[38].mxu0 }
 0xf9f   : > { %v9516_v42 = vpop.f32.mrb[39].mxu0  ;;  %9540 = vmatmul.mubr.msk.f32.vlgmr.msra.gmra.mrb[34].mxu1 %vm2086_vm5, %v3348_v41 }
 0xfa0   : > { %9542 = vmatprep.mubr.msk.f32.mxu1 %vm11826_vm4, %v11827_v35  ;;  %10451 = vmatpush3.bf16.msra.mxu1 %v10450_v8 }
 0xfa1   : > { %10452 = vmatprep.subr.bf16.mxu1 %v11825_v34 }
 0xfa2   : > { %v3353_v44 = vpop.f32.mrb[40].mxu0 }
 0xfa3   : > { %v9519_v45 = vpop.f32.mrb[41].mxu0  ;;  %9543 = vmatmul.mubr.msk.f32.gmra.mrb[36].mxu1 %vm2086_vm5, %v3353_v44 }
 0xfa4   : > { %9545 = vmatprep.mubr.msk.f32.mxu1 %vm11826_vm4, %v11827_v35  ;;  %10454 = vmatpush3.bf16.msra.mxu1 %v10453_v43 }
 0xfa5   : > { %10461 = vmatprep.subr.bf16.mxu1 %v11825_v34 }
 0xfa6   : > { %v3358_v48 = vpop.f32.mrb[42].mxu0 }
 0xfa7   : > { %v9522_v49 = vpop.f32.mrb[43].mxu0  ;;  %9546 = vmatmul.mubr.msk.f32.gmra.mrb[38].mxu1 %vm2086_vm5, %v3358_v48 }
 0xfa8   : > { %9581 = vmatprep.mubr.msk.f32.mxu1 %vm11826_vm4, %v11827_v35 }
 0xfab   : > { %9582 = vmatmul.mubr.msk.f32.vlgmr.msra.gmra.mrb[40].mxu1 %vm1838_vm3, %v12483_v16 }
 0xfac   : > { %9584 = vmatprep.mubr.msk.f32.mxu1 %vm11826_vm4, %v11827_v35  ;;  %10463 = vmatpush3.bf16.msra.mxu1 %v10462_v50 }
 0xfad   : > { %10464 = vmatprep.subr.bf16.mxu1 %v11825_v34 }
 0xfae   : > { %v3535_v54 = vpop.f32.mrb[44].mxu0 }
 0xfaf   : > { %v9566_v30 = vpop.f32.mrb[45].mxu0  ;;  %9585 = vmatmul.mubr.msk.f32.gmra.mrb[42].mxu1 %vm1838_vm3, %v12493_v39 }
 0xfb0   : > { %9587 = vmatprep.mubr.msk.f32.mxu1 %vm11826_vm4, %v11827_v35  ;;  %10466 = vmatpush3.bf16.msra.mxu1 %v10465_v53 }
 0xfb1   : > { %10471 = vmatprep.subr.bf16.mxu1 %v11825_v34 }
 0xfb2   : > { %v3540_v55 = vpop.f32.mrb[46].mxu0 }
 0xfb3   : > { %v9569_v56 = vpop.f32.mrb[47].mxu0  ;;  %9588 = vmatmul.mubr.msk.f32.gmra.mrb[44].mxu1 %vm1838_vm3, %v12509_v29 }
 0xfb4   : > { %9615 = vmatprep.mubr.msk.f32.mxu1 %vm11826_vm4, %v11827_v35 }
 0xfb6   : > { %v3545_v57 = vpop.f32.mrb[48].mxu0 }
 0xfb7   : > { %v9572_v58 = vpop.f32.mrb[49].mxu0  ;;  %9616 = vmatmul.mubr.msk.f32.vlgmr.msra.gmra.mrb[46].mxu1 %vm1838_vm3, %v12483_v16 }
 0xfb8   : > { %9618 = vmatprep.mubr.msk.f32.mxu1 %vm11826_vm4, %v11827_v35 }
 0xfba   : > { %v3705_v59 = vpop.f32.mrb[50].mxu0 }
 0xfbb   : > { %v9600_v60 = vpop.f32.mrb[51].mxu0  ;;  %9619 = vmatmul.mubr.msk.f32.gmra.mrb[48].mxu1 %vm1838_vm3, %v12493_v39 }
 0xfbc   : > { %9621 = vmatprep.mubr.msk.f32.mxu1 %vm11826_vm4, %v11827_v35  ;;  %v8529_v60 = vld [vmem:[%s13681_s23 + $0x80] sm:$0xff] }
 0xfbe   : > { %v3710_v61 = vpop.f32.mrb[52].mxu0 }
 0xfbf   : > { %v10468_v62 = vpack.c.bf16 %v3710_v61, %v3705_v59  ;;  %v9603_v63 = vpop.f32.mrb[53].mxu0  ;;  %9622 = vmatmul.mubr.msk.f32.gmra.mrb[50].mxu1 %vm1838_vm3, %v12509_v29  ;;  %v8530_v61 = vld [vmem:[%s13681_s23 + $0x88] sm:$0xff] }
 0xfc0   : > { %9645 = vmatprep.mubr.msk.f32.mxu1 %vm11826_vm4, %v11827_v35  ;;  %v10475_v63 = vpack.c.bf16 %v8530_v61, %v8529_v60 }
 0xfc1   : > { %10470 = vmatpush3.bf16.xpose.msk.msra.mxu0 %vm12535_vm7, %v10468_v62  ;;  %v8531_v62 = vld [vmem:[%s13681_s23 + $0x90] sm:$0xff] }
 0xfc2   : > { %v3715_v0 = vpop.f32.mrb[54].mxu0  ;;  %9628 = vmatprep.subr.mxu0 %v11827_v35 }
 0xfc3   : > { %v9606_v1 = vpop.f32.mrb[55].mxu0 }
 0xfc9   : > { %9629 = vmatpush3.xpose.msk.msra.mxu0 %vm2086_vm5, %v3715_v0  ;;  %v8532_v0 = vld [vmem:[%s13681_s23 + $0x98] sm:$0xff] }
 0xfca   : > { %10474 = vmatprep.subr.bf16.mxu0 %v11825_v34  ;;  %v10478_v1 = vpack.c.bf16 %v8532_v0, %v8531_v62 }
0x1072   : > { %v3446_v4 = vpop.f32.mrb[34].mxu1 }
0x1073   : > { %v12784_v7 = vadd.f32 %v3535_v54, %v3446_v4  ;;  %v9541_v9 = vpop.f32.mrb[35].mxu1  ;;  %v8533_v4 = vld [vmem:[%s13681_s23 + $0xa0] sm:$0xff] }
0x1074   : > { %v8534_v9 = vld [vmem:[%s13681_s23 + $0xa8] sm:$0xff] }
0x1076   : > { %v3451_v10 = vpop.f32.mrb[36].mxu1 }
0x1077   : > { %v12786_v12 = vadd.f32 %v3540_v55, %v3451_v10  ;;  %v9544_v13 = vpop.f32.mrb[37].mxu1  ;;  %v10481_v10 = vpack.c.bf16 %v8534_v9, %v8533_v4 }
0x1078   : > { %v8535_v13 = vld [vmem:[%s13681_s23 + $0xb0] sm:$0xff] }
0x107a   : > { %v3456_v14 = vpop.f32.mrb[38].mxu1 }
0x107b   : > { %v12788_v15 = vadd.f32 %v3545_v57, %v3456_v14  ;;  %v9547_v17 = vpop.f32.mrb[39].mxu1  ;;  %v8536_v14 = vld [vmem:[%s13681_s23 + $0xb8] sm:$0xff] }
0x107c   : > { %v10484_v17 = vpack.c.bf16 %v8536_v14, %v8535_v13 }
0x107e   : > { %v3620_v19 = vpop.f32.mrb[40].mxu1 }
0x107f   : > { %v9583_v21 = vpop.f32.mrb[41].mxu1  ;;  %9631 = vmatmul.mubr.msk.f32.vlgmr.msra.gmra.mrb[56].mxu0 %vm2086_vm5, %v3620_v19 }
0x1080   : > { %9633 = vmatprep.mubr.msk.f32.mxu0 %vm11826_vm4, %v11827_v35  ;;  %10476 = vmatpush3.bf16.msra.mxu0 %v10475_v63 }
0x1081   : > { %10477 = vmatprep.subr.bf16.mxu0 %v11825_v34 }
0x1082   : > { %v3625_v23 = vpop.f32.mrb[42].mxu1 }
0x1083   : > { %v9586_v24 = vpop.f32.mrb[43].mxu1  ;;  %9634 = vmatmul.mubr.msk.f32.gmra.mrb[58].mxu0 %vm2086_vm5, %v3625_v23 }
0x1084   : > { %9636 = vmatprep.mubr.msk.f32.mxu0 %vm11826_vm4, %v11827_v35  ;;  %10479 = vmatpush3.bf16.msra.mxu0 %v10478_v1  ;;  %v8540_v24 = vld [vmem:[%s13676_s5 + $0x60] sm:$0xff] }
0x1085   : > { %10480 = vmatprep.subr.bf16.mxu0 %v11825_v34 }
0x1086   : > { %v3630_v18 = vpop.f32.mrb[44].mxu1 }
0x1087   : > { %v9589_v25 = vpop.f32.mrb[45].mxu1  ;;  %9637 = vmatmul.mubr.msk.f32.gmra.mrb[60].mxu0 %vm2086_vm5, %v3630_v18  ;;  %v8541_v18 = vld [vmem:[%s13676_s5 + $0x68] sm:$0xff] }
0x1088   : > { %9670 = vmatprep.mubr.msk.f32.mxu0 %vm11826_vm4, %v11827_v35  ;;  %10482 = vmatpush3.bf16.msra.mxu0 %v10481_v10 }
0x1089   : > { %10483 = vmatprep.subr.bf16.mxu0 %v11825_v34 }
0x108a   : > { %v3790_v26 = vpop.f32.mrb[46].mxu1 }
0x108b   : > { %v9617_v20 = vpop.f32.mrb[47].mxu1 }
0x108c   : > { %10485 = vmatpush3.bf16.msra.mxu0 %v10484_v17 }
0x108d   : > { %10498 = vmatprep.subr.bf16.mxu0 %v11825_v34 }
0x108e   : > { %v3795_v27 = vpop.f32.mrb[48].mxu1 }
0x108f   : > { %v10472_v28 = vpack.c.bf16 %v3795_v27, %v3790_v26  ;;  %v9620_v22 = vpop.f32.mrb[49].mxu1  ;;  %v10487_v26 = vpack.c.bf16 %v8541_v18, %v8540_v24  ;;  %v8542_v27 = vld [vmem:[%s13676_s5 + $0x70] sm:$0xff] }
0x1091   : > { %10473 = vmatpush3.bf16.msra.mxu1 %v10472_v28  ;;  %v8543_v28 = vld [vmem:[%s13676_s5 + $0x78] sm:$0xff] }
0x1092   : > { %v3800_v31 = vpop.f32.mrb[50].mxu1  ;;  %9643 = vmatprep.subr.mxu1 %v11827_v35 }
0x1093   : > { %v9623_v32 = vpop.f32.mrb[51].mxu1 }
0x1095   : > { %9644 = vmatpush3.msra.mxu1 %v3800_v31  ;;  %v10490_v31 = vpack.c.bf16 %v8543_v28, %v8542_v27 }
0x1096   : > { %10486 = vmatprep.subr.bf16.mxu1 %v11825_v34 }
0x1152   : > { %v3888_v33 = vpop.f32.mrb[56].mxu0 }
0x1153   : > { %v3889_v37 = vadd.f32 %v3888_v33, %v12589_v2  ;;  %v9632_v3 = vpop.f32.mrb[57].mxu0 }
0x1154   : > { %v8547_v3 = vld [vmem:[%s13678_s9 + $0x60] sm:$0xff] }
0x1155   : > { %v3902_v5 = vsel %vm2756_vm8, %v3889_v37, -inf }
0x1156   : > { %3903 = vmax.xlane.f32.xlu0 %v3902_v5  ;;  %v3893_v8 = vpop.f32.mrb[58].mxu0  ;;  %v8548_v5 = vld [vmem:[%s13678_s9 + $0x68] sm:$0xff] }
0x1157   : > { %v3894_v38 = vadd.f32 %v3893_v8, %v12592_v6  ;;  %v9635_v40 = vpop.f32.mrb[59].mxu0  ;;  %v10493_v8 = vpack.c.bf16 %v8548_v5, %v8547_v3 }
0x1158   : > { %v8550_v40 = vld [vmem:[%s13678_s9 + $0x78] sm:$0xff] }
0x1159   : > { %v3905_v41 = vsel %vm2756_vm8, %v3894_v38, -inf }
0x115a   : > { %3906 = vmax.xlane.f32.xlu1 %v3905_v41  ;;  %v3898_v42 = vpop.f32.mrb[60].mxu0 }
0x115b   : > { %v3899_v43 = vadd.f32 %v3898_v42, %v12596_v11  ;;  %v9638_v44 = vpop.f32.mrb[61].mxu0  ;;  %v8554_v42 = vld [vmem:[%s13677_s3 + $0x60] sm:$0xff] }
0x115d   : > { %v3908_v45 = vsel %vm2756_vm8, %v3899_v43, -inf }
0x115e   : > { %3909 = vmax.xlane.f32.xlu0 %v3908_v45  ;;  %v8556_v45 = vld [vmem:[%s13677_s3 + $0x70] sm:$0xff] }
0x11e3   : > { %v3904_v46 = vpop.xlane.xlu0 %3903 }
0x11e4   : > { %v3911_v47 = vsub.f32 %v3889_v37, %v3904_v46  ;;  %v8557_v46 = vld [vmem:[%s13677_s3 + $0x78] sm:$0xff] }
0x11e6   : > { %v3914_v48 = vmul.f32 1.442695, %v3911_v47 }
0x11e7   : > { %v3907_v49 = vpop.xlane.xlu1 %3906 }
0x11e8   : > { %11015 = vpow2.f32 %v3914_v48  ;;  %v3912_v50 = vsub.f32 %v3894_v38, %v3907_v49  ;;  %v8549_v38 = vld [vmem:[%s13678_s9 + $0x70] sm:$0xff]  ;;  %v10502_v49 = vpack.c.bf16 %v8557_v46, %v8556_v45 }
0x11e9   : > { %v10496_v41 = vpack.c.bf16 %v8550_v40, %v8549_v38 }
0x11ea   : > { %v3916_v52 = vmul.f32 1.442695, %v3912_v50 }
0x11eb   : > { %v3910_v36 = vpop.xlane.xlu0 %3909 }
0x11ec   : > { %11017 = vpow2.f32 %v3916_v52  ;;  %v3913_v53 = vsub.f32 %v3899_v43, %v3910_v36  ;;  %v8555_v43 = vld [vmem:[%s13677_s3 + $0x68] sm:$0xff] }
0x11ed   : > { %v10499_v44 = vpack.c.bf16 %v8555_v43, %v8554_v42 }
0x11ee   : > { %v3918_v54 = vmul.f32 1.442695, %v3913_v53 }
0x11f0   : > { %11019 = vpow2.f32 %v3918_v54 }
0x11f2   : > { %v11016_v30 = vpop.eup %11015 }
0x11f3   : > { %v3920_v55 = vsel %vm2756_vm8, %v11016_v30, 0.0 }
0x11f4   : > { %3921 = vadd.xlane.f32.xlu1 %v3920_v55 }
0x11f6   : > { %v11018_v56 = vpop.eup %11017 }
0x11f7   : > { %v3923_v57 = vsel %vm2756_vm8, %v11018_v56, 0.0 }
0x11f8   : > { %3924 = vadd.xlane.f32.xlu0 %v3923_v57 }
0x11fa   : > { %v11020_v58 = vpop.eup %11019 }
0x11fb   : > { %v3926_v59 = vsel %vm2756_vm8, %v11020_v58, 0.0 }
0x11fc   : > { %3927 = vadd.xlane.f32.xlu1 %v3926_v59 }
0x1281   : > { %v3922_v19 = vpop.xlane.xlu1 %3921 }
0x1282   : > { %11021 = vrcp.f32 %v3922_v19 }
0x1285   : > { %v3925_v21 = vpop.xlane.xlu0 %3924 }
0x1286   : > { %11023 = vrcp.f32 %v3925_v21 }
0x1289   : > { %v3928_v23 = vpop.xlane.xlu1 %3927 }
0x128a   : > { %11025 = vrcp.f32 %v3928_v23 }
0x128c   : > { %v11022_v25 = vpop.eup %11021 }
0x128d   : > { %v3932_v20 = vmul.f32 %v11022_v25, %v11016_v30 }
0x128f   : > { %9646 = vmatmul.mubr.msk.f32.vlgmr.msra.gmra.mrb[52].mxu1 %vm2756_vm8, %v3932_v20 }
0x1290   : > { %v11024_v22 = vpop.eup %11023  ;;  %9648 = vmatprep.mubr.msk.f32.mxu1 %vm11826_vm4, %v11827_v35  ;;  %10488 = vmatpush3.bf16.msra.mxu1 %v10487_v26 }
0x1291   : > { %v3933_v32 = vmul.f32 %v11024_v22, %v11018_v56  ;;  %10489 = vmatprep.subr.bf16.mxu1 %v11825_v34 }
0x1293   : > { %9649 = vmatmul.mubr.msk.f32.gmra.mrb[54].mxu1 %vm2756_vm8, %v3933_v32 }
0x1294   : > { %v11026_v33 = vpop.eup %11025  ;;  %9651 = vmatprep.mubr.msk.f32.mxu1 %vm11826_vm4, %v11827_v35  ;;  %10491 = vmatpush3.bf16.msra.mxu1 %v10490_v31 }
0x1295   : > { %v3934_v37 = vmul.f32 %v11026_v33, %v11020_v58  ;;  %10492 = vmatprep.subr.bf16.mxu1 %v11825_v34 }
0x1297   : > { %9652 = vmatmul.mubr.msk.f32.gmra.mrb[56].mxu1 %vm2756_vm8, %v3934_v37 }
0x1298   : > { %9687 = vmatprep.mubr.msk.f32.mxu1 %vm11826_vm4, %v11827_v35 }
0x129b   : > { %9688 = vmatmul.mubr.msk.f32.vlgmr.msra.gmra.mrb[58].mxu1 %vm1838_vm3, %v12483_v16 }
0x129c   : > { %9690 = vmatprep.mubr.msk.f32.mxu1 %vm11826_vm4, %v11827_v35  ;;  %10494 = vmatpush3.bf16.msra.mxu1 %v10493_v8 }
0x129d   : > { %10495 = vmatprep.subr.bf16.mxu1 %v11825_v34 }
0x129f   : > { %9691 = vmatmul.mubr.msk.f32.gmra.mrb[60].mxu1 %vm1838_vm3, %v12493_v39 }
0x12a0   : > { %9693 = vmatprep.mubr.msk.f32.mxu1 %vm11826_vm4, %v11827_v35  ;;  %10497 = vmatpush3.bf16.msra.mxu1 %v10496_v41 }
0x12a1   : > { %10504 = vmatprep.subr.bf16.mxu1 %v11825_v34 }
0x12a3   : > { %9694 = vmatmul.mubr.msk.f32.gmra.mrb[62].mxu1 %vm1838_vm3, %v12509_v29 }
0x12a4   : > { %9704 = vmatprep.mubr.msk.f32.mxu1 %vm11826_vm4, %v11827_v35 }
0x12a7   : > { %9705 = vmatmul.mubr.msk.f32.vlgmr.msra.gmra.mrb[64].mxu1 %vm1838_vm3, %v12483_v16 }
0x12a8   : > { %9707 = vmatprep.mubr.msk.f32.mxu1 %vm11826_vm4, %v11827_v35 }
0x12ab   : > { %9708 = vmatmul.mubr.msk.f32.gmra.mrb[66].mxu1 %vm1838_vm3, %v12493_v39 }
0x12ac   : > { %9710 = vmatprep.mubr.msk.f32.mxu1 %vm11826_vm4, %v11827_v35 }
0x12af   : > { %9711 = vmatmul.mubr.msk.f32.gmra.mrb[68].mxu1 %vm1838_vm3, %v12509_v29 }
0x12b0   : > { %9736 = vmatprep.mubr.msk.f32.mxu1 %vm11826_vm4, %v11827_v35 }
0x1362   : > { %v4010_v47 = vpop.f32.mrb[52].mxu1 }
0x1363   : > { %v9647_v48 = vpop.f32.mrb[53].mxu1  ;;  %9671 = vmatmul.mubr.msk.f32.vlgmr.msra.gmra.mrb[62].mxu0 %vm2086_vm5, %v4010_v47 }
0x1364   : > { %9673 = vmatprep.mubr.msk.f32.mxu0 %vm11826_vm4, %v11827_v35  ;;  %10500 = vmatpush3.bf16.msra.mxu0 %v10499_v44 }
0x1365   : > { %10501 = vmatprep.subr.bf16.mxu0 %v11825_v34 }
0x1366   : > { %v4015_v50 = vpop.f32.mrb[54].mxu1 }
0x1367   : > { %v9650_v52 = vpop.f32.mrb[55].mxu1  ;;  %9674 = vmatmul.mubr.msk.f32.gmra.mrb[64].mxu0 %vm2086_vm5, %v4015_v50 }
0x1368   : > { %9676 = vmatprep.mubr.msk.f32.mxu0 %vm11826_vm4, %v11827_v35  ;;  %10503 = vmatpush3.bf16.msra.mxu0 %v10502_v49 }
0x1369   : > { %10508 = vmatprep.subr.bf16.mxu0 %v11825_v34 }
0x136a   : > { %v4020_v36 = vpop.f32.mrb[56].mxu1 }
0x136b   : > { %v9653_v53 = vpop.f32.mrb[57].mxu1  ;;  %9677 = vmatmul.mubr.msk.f32.gmra.mrb[66].mxu0 %vm2086_vm5, %v4020_v36  ;;  %v8570_v36 = vld [vmem:[%s13681_s23 + $0xc0] sm:$0xff] }
0x136c   : > { %9721 = vmatprep.mubr.msk.f32.mxu0 %vm11826_vm4, %v11827_v35  ;;  %v8571_v53 = vld [vmem:[%s13681_s23 + $0xc8] sm:$0xff] }
0x136e   : > { %v4196_v54 = vpop.f32.mrb[58].mxu1 }
0x136f   : > { %v9689_v30 = vpop.f32.mrb[59].mxu1  ;;  %9722 = vmatmul.mubr.msk.f32.vlgmr.msra.gmra.mrb[68].mxu0 %vm1838_vm3, %v12483_v16 }
0x1370   : > { %9724 = vmatprep.mubr.msk.f32.mxu0 %vm11826_vm4, %v11827_v35  ;;  %v10512_v30 = vpack.c.bf16 %v8571_v53, %v8570_v36  ;;  %v4773_v36 = vld [vmem:[%s13683_s10] sm:$0xff]  ;;  %v4774_v53 = vld [vmem:[%s13683_s10 + $0x8] sm:$0xff] }
0x1372   : > { %v4201_v55 = vpop.f32.mrb[60].mxu1 }
0x1373   : > { %v9692_v56 = vpop.f32.mrb[61].mxu1  ;;  %9725 = vmatmul.mubr.msk.f32.gmra.mrb[70].mxu0 %vm1838_vm3, %v12493_v39 }
0x1374   : > { %9727 = vmatprep.mubr.msk.f32.mxu0 %vm11826_vm4, %v11827_v35 }
0x1376   : > { %v4206_v57 = vpop.f32.mrb[62].mxu1 }
0x1377   : > { %v9695_v58 = vpop.f32.mrb[63].mxu1  ;;  %9728 = vmatmul.mubr.msk.f32.gmra.mrb[72].mxu0 %vm1838_vm3, %v12509_v29 }
0x1378   : > { %9751 = vmatprep.mubr.msk.f32.mxu0 %vm11826_vm4, %v11827_v35  ;;  %v8575_v58 = vld [vmem:[%s13681_s23 + $0xe8] sm:$0xff] }
0x137a   : > { %v4281_v59 = vpop.f32.mrb[64].mxu1 }
0x137b   : > { %v9706_v60 = vpop.f32.mrb[65].mxu1 }
0x137c   : > { %v8576_v60 = vld [vmem:[%s13681_s23 + $0xf0] sm:$0xff] }
0x137e   : > { %v4286_v61 = vpop.f32.mrb[66].mxu1 }
0x137f   : > { %v10505_v62 = vpack.c.bf16 %v4286_v61, %v4281_v59  ;;  %v9709_v63 = vpop.f32.mrb[67].mxu1  ;;  %v8577_v61 = vld [vmem:[%s13681_s23 + $0xf8] sm:$0xff] }
0x1381   : > { %10507 = vmatpush3.bf16.xpose.msk.msra.mxu1 %vm12535_vm7, %v10505_v62  ;;  %v10521_v62 = vpack.c.bf16 %v8577_v61, %v8576_v60 }
0x1382   : > { %v4291_v0 = vpop.f32.mrb[68].mxu1  ;;  %9734 = vmatprep.subr.mxu1 %v11827_v35 }
0x1383   : > { %v9712_v1 = vpop.f32.mrb[69].mxu1 }
0x1389   : > { %9735 = vmatpush3.xpose.msk.msra.mxu1 %vm2086_vm5, %v4291_v0 }
0x138a   : > { %10511 = vmatprep.subr.bf16.mxu1 %v11825_v34 }
0x138c   : > { %9737 = vmatmul.mubr.msk.f32.vlgmr.msra.gmra.mrb[70].mxu1 %vm2086_vm5, %v4196_v54  ;;  %v8572_v54 = vld [vmem:[%s13681_s23 + $0xd0] sm:$0xff] }
0x138d   : > { %9739 = vmatprep.mubr.msk.f32.mxu1 %vm11826_vm4, %v11827_v35  ;;  %10513 = vmatpush3.bf16.msra.mxu1 %v10512_v30  ;;  %v4775_v30 = vld [vmem:[%s13683_s10 + $0x10] sm:$0xff] }
0x138e   : > { %10514 = vmatprep.subr.bf16.mxu1 %v11825_v34 }
0x1390   : > { %9740 = vmatmul.mubr.msk.f32.gmra.mrb[72].mxu1 %vm2086_vm5, %v4201_v55  ;;  %v8573_v55 = vld [vmem:[%s13681_s23 + $0xd8] sm:$0xff] }
0x1391   : > { %9742 = vmatprep.mubr.msk.f32.mxu1 %vm11826_vm4, %v11827_v35  ;;  %v10515_v56 = vpack.c.bf16 %v8573_v55, %v8572_v54  ;;  %v10524_v54 = vpack.c.bf16 %v4774_v53, %v4773_v36  ;;  %v4776_v55 = vld [vmem:[%s13683_s10 + $0x18] sm:$0xff] }
0x1393   : > { %10516 = vmatpush3.bf16.msra.mxu1 %v10515_v56  ;;  %v10527_v56 = vpack.c.bf16 %v4776_v55, %v4775_v30 }
0x1394   : > { %9743 = vmatmul.mubr.msk.f32.gmra.mrb[74].mxu1 %vm2086_vm5, %v4206_v57  ;;  %v8574_v57 = vld [vmem:[%s13681_s23 + $0xe0] sm:$0xff]  ;;  %10517 = vmatprep.subr.bf16.mxu1 %v11825_v34 }
0x1395   : > { %9776 = vmatprep.mubr.msk.f32.mxu1 %vm11826_vm4, %v11827_v35  ;;  %v10518_v59 = vpack.c.bf16 %v8575_v58, %v8574_v57 }
0x1397   : > { %10519 = vmatpush3.bf16.msra.mxu1 %v10518_v59 }
0x1398   : > { %10520 = vmatprep.subr.bf16.mxu1 %v11825_v34 }
0x139b   : > { %10522 = vmatpush3.bf16.msra.mxu1 %v10521_v62 }
0x139c   : > { %10535 = vmatprep.subr.bf16.mxu1 %v11825_v34 }
0x1436   : > { %v4108_v4 = vpop.f32.mrb[62].mxu0 }
0x1437   : > { %v12909_v9 = vadd.f32 %v4108_v4, %v12784_v7  ;;  %v9672_v10 = vpop.f32.mrb[63].mxu0 }
0x143a   : > { %v4113_v13 = vpop.f32.mrb[64].mxu0 }
0x143b   : > { %v12912_v14 = vadd.f32 %v4113_v13, %v12786_v12  ;;  %v9675_v17 = vpop.f32.mrb[65].mxu0 }
0x143e   : > { %v4118_v19 = vpop.f32.mrb[66].mxu0 }
0x143f   : > { %v12915_v21 = vadd.f32 %v4118_v19, %v12788_v15  ;;  %v9678_v23 = vpop.f32.mrb[67].mxu0 }
0x1442   : > { %v4366_v24 = vpop.f32.mrb[68].mxu0 }
0x1443   : > { %v9723_v18 = vpop.f32.mrb[69].mxu0 }
0x1446   : > { %v4371_v25 = vpop.f32.mrb[70].mxu0 }
0x1447   : > { %v10509_v26 = vpack.c.bf16 %v4371_v25, %v4366_v24  ;;  %v9726_v20 = vpop.f32.mrb[71].mxu0 }
0x1449   : > { %10510 = vmatpush3.bf16.msra.mxu0 %v10509_v26 }
0x144a   : > { %v4376_v27 = vpop.f32.mrb[72].mxu0  ;;  %9749 = vmatprep.subr.mxu0 %v11827_v35 }
0x144b   : > { %v9729_v7 = vpop.f32.mrb[73].mxu0 }
0x144d   : > { %9750 = vmatpush3.msra.mxu0 %v4376_v27 }
0x144e   : > { %10523 = vmatprep.subr.bf16.mxu0 %v11825_v34 }
0x145f   : > { %v4464_v12 = vpop.f32.mrb[70].mxu1 }
0x1460   : > { %v4465_v28 = vadd.f32 %v4464_v12, %v12589_v2  ;;  %v9738_v22 = vpop.f32.mrb[71].mxu1  ;;  %v8581_v12 = vld [vmem:[%s13682_s11] ss:$0 sm:$0xff] }
0x1462   : > { %v4478_v15 = vsel %vm2756_vm8, %v4465_v28, -inf }
0x1463   : > { %4479 = vmax.xlane.f32.xlu0 %v4478_v15  ;;  %v4469_v31 = vpop.f32.mrb[72].mxu1 }
0x1464   : > { %v4470_v32 = vadd.f32 %v4469_v31, %v12592_v6  ;;  %v9741_v33 = vpop.f32.mrb[73].mxu1 }
0x1466   : > { %v4481_v37 = vsel %vm2756_vm8, %v4470_v32, -inf }
0x1467   : > { %4482 = vmax.xlane.f32.xlu1 %v4481_v37  ;;  %v4474_v3 = vpop.f32.mrb[74].mxu1 }
0x1468   : > { %v4475_v5 = vadd.f32 %v4474_v3, %v12596_v11  ;;  %v9744_v8 = vpop.f32.mrb[75].mxu1 }
0x146a   : > { %v4484_v38 = vsel %vm2756_vm8, %v4475_v5, -inf }
0x146b   : > { %4485 = vmax.xlane.f32.xlu0 %v4484_v38 }
0x14f0   : > { %v4480_v40 = vpop.xlane.xlu0 %4479 }
0x14f1   : > { %v4487_v2 = vsub.f32 %v4465_v28, %v4480_v40 }
0x14f3   : > { %v4490_v41 = vmul.f32 1.442695, %v4487_v2 }
0x14f4   : > { %v4483_v42 = vpop.xlane.xlu1 %4482 }
0x14f5   : > { %11027 = vpow2.f32 %v4490_v41  ;;  %v4488_v43 = vsub.f32 %v4470_v32, %v4483_v42 }
0x14f7   : > { %v4492_v44 = vmul.f32 1.442695, %v4488_v43 }
0x14f8   : > { %v4486_v6 = vpop.xlane.xlu0 %4485 }
0x14f9   : > { %11029 = vpow2.f32 %v4492_v44  ;;  %v4489_v45 = vsub.f32 %v4475_v5, %v4486_v6 }
0x14fb   : > { %v4494_v46 = vmul.f32 1.442695, %v4489_v45 }
0x14fd   : > { %11031 = vpow2.f32 %v4494_v46 }
0x14ff   : > { %v11028_v11 = vpop.eup %11027 }
0x1500   : > { %v4496_v47 = vsel %vm2756_vm8, %v11028_v11, 0.0 }
0x1501   : > { %4497 = vadd.xlane.f32.xlu1 %v4496_v47 }
0x1503   : > { %v11030_v48 = vpop.eup %11029 }
0x1504   : > { %v4499_v49 = vsel %vm2756_vm8, %v11030_v48, 0.0 }
0x1505   : > { %4500 = vadd.xlane.f32.xlu0 %v4499_v49 }
0x1507   : > { %v11032_v50 = vpop.eup %11031 }
0x1508   : > { %v4502_v52 = vsel %vm2756_vm8, %v11032_v50, 0.0 }
0x1509   : > { %4503 = vadd.xlane.f32.xlu1 %v4502_v52 }
0x158e   : > { %v4498_v63 = vpop.xlane.xlu1 %4497 }
0x158f   : > { %11033 = vrcp.f32 %v4498_v63 }
0x1592   : > { %v4501_v0 = vpop.xlane.xlu0 %4500 }
0x1593   : > { %11035 = vrcp.f32 %v4501_v0 }
0x1596   : > { %v4504_v1 = vpop.xlane.xlu1 %4503 }
0x1597   : > { %11037 = vrcp.f32 %v4504_v1 }
0x1599   : > { %v11034_v4 = vpop.eup %11033 }
0x159a   : > { %v4508_v10 = vmul.f32 %v11034_v4, %v11028_v11 }
0x159c   : > { %9752 = vmatmul.mubr.msk.f32.vlgmr.msra.gmra.mrb[74].mxu0 %vm2756_vm8, %v4508_v10  ;;  %v8582_v10 = vld [vmem:[#allocation22] ss:$0 sm:$0xff] }
0x159d   : > { %v11036_v13 = vpop.eup %11035  ;;  %9754 = vmatprep.mubr.msk.f32.mxu0 %vm11826_vm4, %v11827_v35  ;;  %10525 = vmatpush3.bf16.msra.mxu0 %v10524_v54 }
0x159e   : > { %v4509_v17 = vmul.f32 %v11036_v13, %v11030_v48  ;;  %10526 = vmatprep.subr.bf16.mxu0 %v11825_v34 }
0x15a0   : > { %9755 = vmatmul.mubr.msk.f32.gmra.mrb[76].mxu0 %vm2756_vm8, %v4509_v17  ;;  %v8583_v17 = vld [vmem:[#allocation24] ss:$0 sm:$0xff] }
0x15a1   : > { %v11038_v19 = vpop.eup %11037  ;;  %9757 = vmatprep.mubr.msk.f32.mxu0 %vm11826_vm4, %v11827_v35  ;;  %10528 = vmatpush3.bf16.msra.mxu0 %v10527_v56 }
0x15a2   : > { %v4510_v23 = vmul.f32 %v11038_v19, %v11032_v50  ;;  %10529 = vmatprep.subr.bf16.mxu0 %v11825_v34 }
0x15a4   : > { %9758 = vmatmul.mubr.msk.f32.gmra.mrb[78].mxu0 %vm2756_vm8, %v4510_v23 }
0x15a5   : > { %9793 = vmatprep.mubr.msk.f32.mxu0 %vm11826_vm4, %v11827_v35 }
0x166f   : > { %v4586_v24 = vpop.f32.mrb[74].mxu0 }
0x1670   : > { %v9753_v18 = vpop.f32.mrb[75].mxu0  ;;  %9777 = vmatmul.mubr.msk.f32.vlgmr.msra.gmra.mrb[76].mxu1 %vm2086_vm5, %v4586_v24 }
0x1671   : > { %9779 = vmatprep.mubr.msk.f32.mxu1 %vm11826_vm4, %v11827_v35 }
0x1673   : > { %v4591_v25 = vpop.f32.mrb[76].mxu0 }
0x1674   : > { %v9756_v26 = vpop.f32.mrb[77].mxu0  ;;  %9780 = vmatmul.mubr.msk.f32.gmra.mrb[78].mxu1 %vm2086_vm5, %v4591_v25 }
0x1675   : > { %9782 = vmatprep.mubr.msk.f32.mxu1 %vm11826_vm4, %v11827_v35 }
0x1677   : > { %v4596_v20 = vpop.f32.mrb[78].mxu0 }
0x1678   : > { %v9759_v27 = vpop.f32.mrb[79].mxu0  ;;  %9783 = vmatmul.mubr.msk.f32.gmra.mrb[80].mxu1 %vm2086_vm5, %v4596_v20 }
0x1679   : > { %9827 = vmatprep.mubr.msk.f32.mxu1 %vm11826_vm4, %v11827_v35 }
0x1743   : > { %v4684_v7 = vpop.f32.mrb[76].mxu1 }
0x1744   : > { %v4698_v28 = vadd.f32 %v4684_v7, %v12909_v9  ;;  %v9778_v22 = vpop.f32.mrb[77].mxu1 }
0x1745   : > { %v4901_v22 = vld [vmem:[%s13684_s18 + $0x8] sm:$0xff] }
0x1746   : > { %v4708_v15 = vadd.f32 %v8581_v12, %v4698_v28  ;;  %v4900_v28 = vld [vmem:[%s13684_s18] sm:$0xff] }
0x1747   : > { %v4689_v31 = vpop.f32.mrb[78].mxu1 }
0x1748   : > { %v4699_v32 = vadd.f32 %v4689_v31, %v12912_v14  ;;  %v9781_v33 = vpop.f32.mrb[79].mxu1  ;;  %v4711_v37 = vadd.f32 %v4708_v15, %v12483_v16  ;;  %v10530_v15 = vpack.c.bf16 %v4901_v22, %v4900_v28  ;;  %v4902_v31 = vld [vmem:[%s13684_s18 + $0x10] sm:$0xff] }
0x174a   : > { %v4709_v3 = vadd.f32 %v8581_v12, %v4699_v32  ;;  %v4716_v5 = vsel %vm1838_vm3, %v4711_v37, 0.0  ;;  %v4903_v32 = vld [vmem:[%s13684_s18 + $0x18] sm:$0xff] }
0x174b   : > { %4717 = vadd.xlane.f32.xlu0 %v4716_v5  ;;  %v4694_v8 = vpop.f32.mrb[80].mxu1  ;;  %v10533_v33 = vpack.c.bf16 %v4903_v32, %v4902_v31 }
0x174c   : > { %v4700_v38 = vadd.f32 %v4694_v8, %v12915_v21  ;;  %v9784_v40 = vpop.f32.mrb[81].mxu1  ;;  %v4712_v2 = vadd.f32 %v4709_v3, %v12493_v39 }
0x174e   : > { %v4710_v41 = vadd.f32 %v8581_v12, %v4700_v38  ;;  %v4719_v9 = vsel %vm1838_vm3, %v4712_v2, 0.0 }
0x174f   : > { %4720 = vadd.xlane.f32.xlu1 %v4719_v9 }
0x1750   : > { %v4713_v42 = vadd.f32 %v4710_v41, %v12509_v29 }
0x1752   : > { %v4722_v14 = vsel %vm1838_vm3, %v4713_v42, 0.0 }
0x1753   : > { %4723 = vadd.xlane.f32.xlu0 %v4722_v14 }
0x17d8   : > { %v4718_v16 = vpop.xlane.xlu0 %4717 }
0x17d9   : > { %v4725_v43 = vmul.f32 0.03125, %v4718_v16 }
0x17db   : > { %v4728_v44 = vsub.f32 %v4711_v37, %v4725_v43  ;;  %v8584_v37 = vld [vmem:[#allocation25] ss:$0 sm:$0xff] }
0x17dc   : > { %v4721_v6 = vpop.xlane.xlu1 %4720 }
0x17dd   : > { %v4726_v45 = vmul.f32 0.03125, %v4721_v6  ;;  %v4731_v21 = vmul.f32 %v4728_v44, %v4728_v44 }
0x17df   : > { %v4729_v46 = vsub.f32 %v4712_v2, %v4726_v45  ;;  %v4734_v39 = vsel %vm1838_vm3, %v4731_v21, 0.0 }
0x17e0   : > { %4735 = vadd.xlane.f32.xlu1 %v4734_v39  ;;  %v4724_v11 = vpop.xlane.xlu0 %4723 }
0x17e1   : > { %v4727_v47 = vmul.f32 0.03125, %v4724_v11  ;;  %v4732_v29 = vmul.f32 %v4729_v46, %v4729_v46 }
0x17e3   : > { %v4730_v48 = vsub.f32 %v4713_v42, %v4727_v47  ;;  %v4737_v49 = vsel %vm1838_vm3, %v4732_v29, 0.0 }
0x17e4   : > { %4738 = vadd.xlane.f32.xlu0 %v4737_v49 }
0x17e5   : > { %v4733_v50 = vmul.f32 %v4730_v48, %v4730_v48 }
0x17e7   : > { %v4740_v52 = vsel %vm1838_vm3, %v4733_v50, 0.0 }
0x17e8   : > { %4741 = vadd.xlane.f32.xlu1 %v4740_v52 }
0x186d   : > { %v4736_v57 = vpop.xlane.xlu1 %4735 }
0x186e   : > { %v4743_v58 = vmul.f32 0.03125, %v4736_v57 }
0x1870   : > { %v4746_v59 = vadd.f32 1e-06, %v4743_v58 }
0x1871   : > { %v4739_v60 = vpop.xlane.xlu0 %4738 }
0x1872   : > { %11039 = vrsqrt.f32 %v4746_v59  ;;  %v4744_v61 = vmul.f32 0.03125, %v4739_v60 }
0x1874   : > { %v4747_v62 = vadd.f32 1e-06, %v4744_v61 }
0x1875   : > { %v4742_v63 = vpop.xlane.xlu1 %4741 }
0x1876   : > { %11041 = vrsqrt.f32 %v4747_v62  ;;  %v4745_v0 = vmul.f32 0.03125, %v4742_v63  ;;  %v8588_v62 = vld [vmem:[#allocation27] ss:$0 sm:$0xff] }
0x1878   : > { %v4748_v1 = vadd.f32 1e-06, %v4745_v0 }
0x187a   : > { %11043 = vrsqrt.f32 %v4748_v1 }
0x187c   : > { %v11040_v4 = vpop.eup %11039 }
0x187d   : > { %v4752_v13 = vmul.f32 %v11040_v4, %v4728_v44 }
0x187f   : > { %v4761_v19 = vmul.f32 %v8582_v10, %v4752_v13 }
0x1880   : > { %v11042_v23 = vpop.eup %11041 }
0x1881   : > { %v12977_v24 = vadd.f32 %v8583_v17, %v4761_v19  ;;  %v4753_v18 = vmul.f32 %v11042_v23, %v4729_v46 }
0x1883   : > { %9794 = vmatmul.mubr.msk.f32.vlgmr.msra.gmra.mrb[80].mxu0 %vm1838_vm3, %v12977_v24  ;;  %v4762_v25 = vmul.f32 %v8582_v10, %v4753_v18 }
0x1884   : > { %v11044_v26 = vpop.eup %11043  ;;  %9796 = vmatprep.mubr.msk.f32.mxu0 %vm11826_vm4, %v11827_v35  ;;  %10531 = vmatpush3.bf16.msra.mxu0 %v10530_v15 }
0x1885   : > { %v12983_v20 = vadd.f32 %v8583_v17, %v4762_v25  ;;  %v4754_v27 = vmul.f32 %v11044_v26, %v4730_v48  ;;  %10532 = vmatprep.subr.bf16.mxu0 %v11825_v34 }
0x1887   : > { %9797 = vmatmul.mubr.msk.f32.gmra.mrb[82].mxu0 %vm1838_vm3, %v12983_v20  ;;  %v4763_v7 = vmul.f32 %v8582_v10, %v4754_v27 }
0x1888   : > { %9799 = vmatprep.mubr.msk.f32.mxu0 %vm11826_vm4, %v11827_v35  ;;  %10534 = vmatpush3.bf16.msra.mxu0 %v10533_v33 }
0x1889   : > { %v12989_v12 = vadd.f32 %v8583_v17, %v4763_v7  ;;  %10541 = vmatprep.subr.bf16.mxu0 %v11825_v34 }
0x188b   : > { %9800 = vmatmul.mubr.msk.f32.gmra.mrb[84].mxu0 %vm1838_vm3, %v12989_v12 }
0x188c   : > { %9810 = vmatprep.mubr.msk.f32.mxu0 %vm11826_vm4, %v11827_v35 }
0x1956   : > { %v4859_v3 = vpop.f32.mrb[80].mxu0 }
0x1957   : > { %v4860_v5 = vadd.f32 %v8584_v37, %v4859_v3  ;;  %v9795_v8 = vpop.f32.mrb[81].mxu0 }
0x1959   : > { %v4876_v38 = vmul.f32 0.044715, %v4860_v5  ;;  %v4873_v36 = vmul.f32 0.5, %v4860_v5 }
0x195a   : > { %v4864_v40 = vpop.f32.mrb[82].mxu0 }
0x195b   : > { %v4879_v2 = vmul.f32 %v4876_v38, %v4860_v5  ;;  %v4865_v41 = vadd.f32 %v8584_v37, %v4864_v40  ;;  %v9798_v9 = vpop.f32.mrb[83].mxu0 }
0x195c   : > { %v8595_v9 = vld [vmem:[%s13676_s5 + $0x88] sm:$0xff] }
0x195d   : > { %v4882_v42 = vmul.f32 %v4879_v2, %v4860_v5  ;;  %v4877_v14 = vmul.f32 0.044715, %v4865_v41  ;;  %v4874_v55 = vmul.f32 0.5, %v4865_v41 }
0x195e   : > { %v4869_v16 = vpop.f32.mrb[84].mxu0 }
0x195f   : > { %v4885_v43 = vadd.f32 %v4882_v42, %v4860_v5  ;;  %v4880_v44 = vmul.f32 %v4877_v14, %v4865_v41  ;;  %v4870_v6 = vadd.f32 %v8584_v37, %v4869_v16  ;;  %v9801_v45 = vpop.f32.mrb[85].mxu0  ;;  %v8601_v42 = vld [vmem:[%s13678_s9 + $0x80] sm:$0xff]  ;;  %v8602_v16 = vld [vmem:[%s13678_s9 + $0x88] sm:$0xff] }
0x1960   : > { %v8603_v45 = vld [vmem:[%s13678_s9 + $0x90] sm:$0xff] }
0x1961   : > { %v4888_v21 = vmul.f32 0.7978846, %v4885_v43  ;;  %v4883_v46 = vmul.f32 %v4880_v44, %v4865_v41  ;;  %v4878_v39 = vmul.f32 0.044715, %v4870_v6  ;;  %v4875_v59 = vmul.f32 0.5, %v4870_v6  ;;  %v8596_v44 = vld [vmem:[%s13676_s5 + $0x90] sm:$0xff] }
0x1962   : > { %v10542_v43 = vpack.c.bf16 %v8602_v16, %v8601_v42  ;;  %v8635_v42 = vld [vmem:[%s13676_s5 + $0xb8] sm:$0xff] }
0x1963   : > { %11045 = vtanh.f32 %v4888_v21  ;;  %v4886_v11 = vadd.f32 %v4883_v46, %v4865_v41  ;;  %v4881_v47 = vmul.f32 %v4878_v39, %v4870_v6  ;;  %v8594_v41 = vld [vmem:[%s13676_s5 + $0x80] sm:$0xff]  ;;  %v8604_v46 = vld [vmem:[%s13678_s9 + $0x98] sm:$0xff] }
0x1964   : > { %v10536_v14 = vpack.c.bf16 %v8595_v9, %v8594_v41  ;;  %v10545_v39 = vpack.c.bf16 %v8604_v46, %v8603_v45  ;;  %v8634_v9 = vld [vmem:[%s13676_s5 + $0xb0] sm:$0xff]  ;;  %v8649_v46 = vld [vmem:[%s13677_s3 + $0xb8] sm:$0xff] }
0x1965   : > { %v4884_v29 = vmul.f32 %v4881_v47, %v4870_v6  ;;  %v4889_v48 = vmul.f32 0.7978846, %v4886_v11  ;;  %v10564_v16 = vpack.c.bf16 %v8635_v42, %v8634_v9  ;;  %v8640_v9 = vld [vmem:[%s13678_s9 + $0xa8] sm:$0xff] }
0x1966   : > { %10537 = vmatpush3.bf16.msra.mxu1 %v10536_v14 }
0x1967   : > { %v4887_v49 = vadd.f32 %v4884_v29, %v4870_v6  ;;  %11047 = vtanh.f32 %v4889_v48  ;;  %10538 = vmatprep.subr.bf16.mxu1 %v11825_v34  ;;  %v8597_v6 = vld [vmem:[%s13676_s5 + $0x98] sm:$0xff] }
0x1968   : > { %v10539_v21 = vpack.c.bf16 %v8597_v6, %v8596_v44  ;;  %v8646_v44 = vld [vmem:[%s13677_s3 + $0xa0] sm:$0xff]  ;;  %v8647_v6 = vld [vmem:[%s13677_s3 + $0xa8] sm:$0xff] }
0x1969   : > { %v4890_v50 = vmul.f32 0.7978846, %v4887_v49  ;;  %v10573_v45 = vpack.c.bf16 %v8647_v6, %v8646_v44  ;;  %v8642_v44 = vld [vmem:[%s13678_s9 + $0xb8] sm:$0xff] }
0x196a   : > { %10540 = vmatpush3.bf16.msra.mxu1 %v10539_v21  ;;  %v8648_v21 = vld [vmem:[%s13677_s3 + $0xb0] sm:$0xff] }
0x196b   : > { %11049 = vtanh.f32 %v4890_v50  ;;  %10547 = vmatprep.subr.bf16.mxu1 %v11825_v34 }
0x196d   : > { %v11046_v52 = vpop.eup %11045 }
0x196e   : > { %v4894_v53 = vadd.f32 1.0, %v11046_v52 }
0x1970   : > { %v4897_v54 = vmul.f32 %v4894_v53, %v4873_v36 }
0x1971   : > { %v11048_v30 = vpop.eup %11047 }
0x1972   : > { %9811 = vmatmul.mubr.msk.f32.vlgmr.msra.gmra.mrb[86].mxu0 %vm1838_vm3, %v4897_v54  ;;  %v4895_v56 = vadd.f32 1.0, %v11048_v30  ;;  %v8592_v30 = vld [vmem:[#allocation28] ss:$0 sm:$0xff] }
0x1973   : > { %9813 = vmatprep.mubr.msk.f32.mxu0 %vm11826_vm4, %v11827_v35  ;;  %10543 = vmatpush3.bf16.msra.mxu0 %v10542_v43 }
0x1974   : > { %v4898_v57 = vmul.f32 %v4895_v56, %v4874_v55  ;;  %10544 = vmatprep.subr.bf16.mxu0 %v11825_v34  ;;  %v8593_v56 = vld [vmem:[#allocation30] ss:$0 sm:$0xff] }
0x1975   : > { %v11050_v58 = vpop.eup %11049 }
0x1976   : > { %9814 = vmatmul.mubr.msk.f32.gmra.mrb[88].mxu0 %vm1838_vm3, %v4898_v57  ;;  %v4896_v60 = vadd.f32 1.0, %v11050_v58  ;;  %v8608_v57 = vld [vmem:[%s13677_s3 + $0x80] sm:$0xff]  ;;  %v8609_v58 = vld [vmem:[%s13677_s3 + $0x88] sm:$0xff] }
0x1977   : > { %9816 = vmatprep.mubr.msk.f32.mxu0 %vm11826_vm4, %v11827_v35  ;;  %10546 = vmatpush3.bf16.msra.mxu0 %v10545_v39  ;;  %v10576_v39 = vpack.c.bf16 %v8649_v46, %v8648_v21 }
0x1978   : > { %v4899_v61 = vmul.f32 %v4896_v60, %v4875_v59  ;;  %10553 = vmatprep.subr.bf16.mxu0 %v11825_v34 }
0x197a   : > { %9817 = vmatmul.mubr.msk.f32.gmra.mrb[90].mxu0 %vm1838_vm3, %v4899_v61 }
0x197b   : > { %9844 = vmatprep.mubr.msk.f32.mxu0 %vm11826_vm4, %v11827_v35 }
0x1a45   : > { %v4986_v63 = vpop.f32.mrb[86].mxu0 }
0x1a46   : > { %v4987_v0 = vadd.f32 %v8588_v62, %v4986_v63  ;;  %v9812_v1 = vpop.f32.mrb[87].mxu0  ;;  %v10548_v63 = vpack.c.bf16 %v8609_v58, %v8608_v57 }
0x1a47   : > { %v8611_v1 = vld [vmem:[%s13677_s3 + $0x98] sm:$0xff] }
0x1a48   : > { %v5000_v4 = vadd.f32 %v4987_v0, %v12977_v24  ;;  %v8610_v0 = vld [vmem:[%s13677_s3 + $0x90] sm:$0xff] }
0x1a49   : > { %v4991_v10 = vpop.f32.mrb[88].mxu0 }
0x1a4a   : > { %v4992_v13 = vadd.f32 %v8588_v62, %v4991_v10  ;;  %v9815_v17 = vpop.f32.mrb[89].mxu0  ;;  %v5005_v19 = vsel %vm1838_vm3, %v5000_v4, 0.0 }
0x1a4b   : > { %5006 = vadd.xlane.f32.xlu0 %v5005_v19  ;;  %v10551_v19 = vpack.c.bf16 %v8611_v1, %v8610_v0 }
0x1a4c   : > { %v5001_v23 = vadd.f32 %v4992_v13, %v12983_v20 }
0x1a4d   : > { %v4996_v18 = vpop.f32.mrb[90].mxu0 }
0x1a4e   : > { %v4997_v25 = vadd.f32 %v8588_v62, %v4996_v18  ;;  %v9818_v26 = vpop.f32.mrb[91].mxu0  ;;  %v5008_v27 = vsel %vm1838_vm3, %v5001_v23, 0.0 }
0x1a4f   : > { %5009 = vadd.xlane.f32.xlu1 %v5008_v27 }
0x1a50   : > { %v5002_v7 = vadd.f32 %v4997_v25, %v12989_v12 }
0x1a52   : > { %v5011_v28 = vsel %vm1838_vm3, %v5002_v7, 0.0 }
0x1a53   : > { %5012 = vadd.xlane.f32.xlu0 %v5011_v28 }
0x1ad8   : > { %v5007_v24 = vpop.xlane.xlu0 %5006 }
0x1ad9   : > { %v5014_v22 = vmul.f32 0.03125, %v5007_v24 }
0x1adb   : > { %v5017_v15 = vsub.f32 %v5000_v4, %v5014_v22 }
0x1adc   : > { %v5010_v31 = vpop.xlane.xlu1 %5009 }
0x1add   : > { %v5015_v32 = vmul.f32 0.03125, %v5010_v31  ;;  %v5020_v20 = vmul.f32 %v5017_v15, %v5017_v15 }
0x1adf   : > { %v5018_v33 = vsub.f32 %v5001_v23, %v5015_v32  ;;  %v5023_v37 = vsel %vm1838_vm3, %v5020_v20, 0.0 }
0x1ae0   : > { %5024 = vadd.xlane.f32.xlu1 %v5023_v37  ;;  %v5013_v3 = vpop.xlane.xlu0 %5012 }
0x1ae1   : > { %v5016_v5 = vmul.f32 0.03125, %v5013_v3  ;;  %v5021_v12 = vmul.f32 %v5018_v33, %v5018_v33 }
0x1ae3   : > { %v5019_v8 = vsub.f32 %v5002_v7, %v5016_v5  ;;  %v5026_v38 = vsel %vm1838_vm3, %v5021_v12, 0.0  ;;  %v8632_v12 = vld [vmem:[%s13676_s5 + $0xa0] sm:$0xff] }
0x1ae4   : > { %5027 = vadd.xlane.f32.xlu0 %v5026_v38 }
0x1ae5   : > { %v5022_v40 = vmul.f32 %v5019_v8, %v5019_v8 }
0x1ae7   : > { %v5029_v2 = vsel %vm1838_vm3, %v5022_v40, 0.0 }
0x1ae8   : > { %5030 = vadd.xlane.f32.xlu1 %v5029_v2 }
0x1b6d   : > { %v5025_v11 = vpop.xlane.xlu1 %5024 }
0x1b6e   : > { %v5032_v47 = vmul.f32 0.03125, %v5025_v11 }
0x1b70   : > { %v5035_v29 = vadd.f32 1e-06, %v5032_v47  ;;  %v13131_v47 = vld [vmem:[#allocation21] sm:$0xff] }
0x1b71   : > { %v5028_v48 = vpop.xlane.xlu0 %5027 }
0x1b72   : > { %11051 = vrsqrt.f32 %v5035_v29  ;;  %v5033_v49 = vmul.f32 0.03125, %v5028_v48 }
0x1b74   : > { %v5036_v50 = vadd.f32 1e-06, %v5033_v49 }
0x1b75   : > { %v5031_v52 = vpop.xlane.xlu1 %5030 }
0x1b76   : > { %11053 = vrsqrt.f32 %v5036_v50  ;;  %v5034_v36 = vmul.f32 0.03125, %v5031_v52  ;;  %v13135_v52 = vld [vmem:[#allocation21 + $0x8] sm:$0xff] }
0x1b78   : > { %v5037_v53 = vadd.f32 1e-06, %v5034_v36 }
0x1b7a   : > { %11055 = vrsqrt.f32 %v5037_v53 }
0x1b7c   : > { %v11052_v54 = vpop.eup %11051 }
0x1b7d   : > { %v5041_v55 = vmul.f32 %v11052_v54, %v5017_v15 }
0x1b7f   : > { %v5050_v59 = vmul.f32 %v8592_v30, %v5041_v55  ;;  %v13139_v55 = vld [vmem:[#allocation21 + $0x10] sm:$0xff] }
0x1b80   : > { %v11054_v60 = vpop.eup %11053 }
0x1b81   : > { %v13033_v61 = vadd.f32 %v8593_v56, %v5050_v59  ;;  %v5042_v62 = vmul.f32 %v11054_v60, %v5018_v33 }
0x1b83   : > { %v5051_v4 = vmul.f32 %v8592_v30, %v5042_v62  ;;  %9828 = vmatmul.mubr.msk.f32.vlgmr.msra.gmra.mrb[82].mxu1 %vm1838_vm3, %v13033_v61  ;;  %9845 = vmatmul.mubr.msk.f32.vlgmr.msra.gmra.mrb[92].mxu0 %vm1838_vm3, %v13033_v61 }
0x1b84   : > { %v11056_v10 = vpop.eup %11055  ;;  %9830 = vmatprep.mubr.msk.f32.mxu1 %vm11826_vm4, %v11827_v35  ;;  %9847 = vmatprep.mubr.msk.f32.mxu0 %vm11826_vm4, %v11827_v35 }
0x1b85   : > { %v13045_v13 = vadd.f32 %v8593_v56, %v5051_v4  ;;  %v5043_v17 = vmul.f32 %v11056_v10, %v5019_v8  ;;  %10549 = vmatpush3.bf16.msra.mxu1 %v10548_v63  ;;  %v8633_v8 = vld [vmem:[%s13676_s5 + $0xa8] sm:$0xff] }
0x1b86   : > { %10550 = vmatprep.subr.bf16.mxu1 %v11825_v34  ;;  %v10561_v40 = vpack.c.bf16 %v8633_v8, %v8632_v12 }
0x1b87   : > { %v5052_v23 = vmul.f32 %v8592_v30, %v5043_v17  ;;  %9831 = vmatmul.mubr.msk.f32.gmra.mrb[84].mxu1 %vm1838_vm3, %v13045_v13  ;;  %9848 = vmatmul.mubr.msk.f32.gmra.mrb[94].mxu0 %vm1838_vm3, %v13045_v13 }
0x1b88   : > { %9833 = vmatprep.mubr.msk.f32.mxu1 %vm11826_vm4, %v11827_v35  ;;  %9850 = vmatprep.mubr.msk.f32.mxu0 %vm11826_vm4, %v11827_v35 }
0x1b89   : > { %v13056_v18 = vadd.f32 %v8593_v56, %v5052_v23  ;;  %10552 = vmatpush3.bf16.msra.mxu1 %v10551_v19 }
0x1b8a   : > { %10557 = vmatprep.subr.bf16.mxu1 %v11825_v34 }
0x1b8b   : > { %9834 = vmatmul.mubr.msk.f32.gmra.mrb[86].mxu1 %vm1838_vm3, %v13056_v18  ;;  %9851 = vmatmul.mubr.msk.f32.gmra.mrb[96].mxu0 %vm1838_vm3, %v13056_v18 }
0x1b8c   : > { %9861 = vmatprep.mubr.msk.f32.mxu1 %vm11826_vm4, %v11827_v35  ;;  %9876 = vmatprep.mubr.msk.f32.mxu0 %vm11826_vm4, %v11827_v35 }
0x1b8f   : > { %9862 = vmatmul.mubr.msk.f32.vlgmr.msra.gmra.mrb[88].mxu1 %vm1838_vm3, %v13033_v61 }
0x1b90   : > { %9864 = vmatprep.mubr.msk.f32.mxu1 %vm11826_vm4, %v11827_v35 }
0x1b93   : > { %9865 = vmatmul.mubr.msk.f32.gmra.mrb[90].mxu1 %vm1838_vm3, %v13045_v13 }
0x1b94   : > { %9867 = vmatprep.mubr.msk.f32.mxu1 %vm11826_vm4, %v11827_v35 }
0x1b97   : > { %9868 = vmatmul.mubr.msk.f32.gmra.mrb[92].mxu1 %vm1838_vm3, %v13056_v18 }
0x1b98   : > { %9891 = vmatprep.mubr.msk.f32.mxu1 %vm11826_vm4, %v11827_v35 }
0x1c56   : > { %v5142_v25 = vpop.f32.mrb[82].mxu1  ;;  %v5227_v26 = vpop.f32.mrb[92].mxu0 }
0x1c57   : > { %v9829_v27 = vpop.f32.mrb[83].mxu1  ;;  %v9846_v7 = vpop.f32.mrb[93].mxu0 }
0x1c5a   : > { %v5147_v28 = vpop.f32.mrb[84].mxu1  ;;  %v5232_v24 = vpop.f32.mrb[94].mxu0 }
0x1c5b   : > { %v10554_v22 = vpack.c.bf16 %v5232_v24, %v5227_v26  ;;  %v9832_v15 = vpop.f32.mrb[85].mxu1  ;;  %v9849_v31 = vpop.f32.mrb[95].mxu0 }
0x1c5d   : > { %10556 = vmatpush3.bf16.xpose.msk.msra.mxu0 %vm12535_vm7, %v10554_v22 }
0x1c5e   : > { %v5152_v32 = vpop.f32.mrb[86].mxu1  ;;  %v5237_v20 = vpop.f32.mrb[96].mxu0  ;;  %9874 = vmatprep.subr.mxu0 %v11827_v35 }
0x1c5f   : > { %v9835_v33 = vpop.f32.mrb[87].mxu1  ;;  %v9852_v37 = vpop.f32.mrb[97].mxu0 }
0x1c62   : > { %v5312_v3 = vpop.f32.mrb[88].mxu1 }
0x1c63   : > { %v9863_v5 = vpop.f32.mrb[89].mxu1 }
0x1c65   : > { %9875 = vmatpush3.xpose.msk.msra.mxu0 %vm2086_vm5, %v5237_v20 }
0x1c66   : > { %v5317_v38 = vpop.f32.mrb[90].mxu1  ;;  %10560 = vmatprep.subr.bf16.mxu0 %v11825_v34 }
0x1c67   : > { %v10558_v2 = vpack.c.bf16 %v5317_v38, %v5312_v3  ;;  %v9866_v41 = vpop.f32.mrb[91].mxu1 }
0x1c68   : > { %9877 = vmatmul.mubr.msk.f32.vlgmr.msra.gmra.mrb[98].mxu0 %vm2086_vm5, %v5142_v25  ;;  %v8639_v41 = vld [vmem:[%s13678_s9 + $0xa0] sm:$0xff] }
0x1c69   : > { %10559 = vmatpush3.bf16.msra.mxu1 %v10558_v2  ;;  %9879 = vmatprep.mubr.msk.f32.mxu0 %vm11826_vm4, %v11827_v35 }
0x1c6a   : > { %v5322_v14 = vpop.f32.mrb[92].mxu1  ;;  %9889 = vmatprep.subr.mxu1 %v11827_v35  ;;  %10562 = vmatpush3.bf16.msra.mxu0 %v10561_v40 }
0x1c6b   : > { %v9869_v43 = vpop.f32.mrb[93].mxu1  ;;  %10563 = vmatprep.subr.bf16.mxu0 %v11825_v34 }
0x1c6c   : > { %9880 = vmatmul.mubr.msk.f32.gmra.mrb[100].mxu0 %vm2086_vm5, %v5147_v28  ;;  %v8641_v43 = vld [vmem:[%s13678_s9 + $0xb0] sm:$0xff] }
0x1c6d   : > { %9890 = vmatpush3.msra.mxu1 %v5322_v14  ;;  %9882 = vmatprep.mubr.msk.f32.mxu0 %vm11826_vm4, %v11827_v35  ;;  %v10567_v14 = vpack.c.bf16 %v8640_v9, %v8639_v41  ;;  %v8665_v9 = vld [vmem:[%s13681_s23 + $0x158] sm:$0xff] }
0x1c6e   : > { %10565 = vmatpush3.bf16.msra.mxu0 %v10564_v16  ;;  %10566 = vmatprep.subr.bf16.mxu1 %v11825_v34 }
0x1c6f   : > { %10572 = vmatprep.subr.bf16.mxu0 %v11825_v34 }
0x1c70   : > { %9883 = vmatmul.mubr.msk.f32.gmra.mrb[102].mxu0 %vm2086_vm5, %v5152_v32 }
0x1c71   : > { %9908 = vmatprep.mubr.msk.f32.mxu0 %vm11826_vm4, %v11827_v35 }
0x1c74   : > { %9909 = vmatmul.mubr.msk.f32.vlgmr.msra.gmra.mrb[104].mxu0 %vm1838_vm3, %v13033_v61 }
0x1c75   : > { %9911 = vmatprep.mubr.msk.f32.mxu0 %vm11826_vm4, %v11827_v35  ;;  %10574 = vmatpush3.bf16.msra.mxu0 %v10573_v45  ;;  %v10570_v45 = vpack.c.bf16 %v8642_v44, %v8641_v43  ;;  %v8668_v44 = vld [vmem:[%s13681_s23 + $0x170] sm:$0xff] }
0x1c76   : > { %10575 = vmatprep.subr.bf16.mxu0 %v11825_v34 }
0x1c78   : > { %9912 = vmatmul.mubr.msk.f32.gmra.mrb[106].mxu0 %vm1838_vm3, %v13045_v13 }
0x1c79   : > { %9914 = vmatprep.mubr.msk.f32.mxu0 %vm11826_vm4, %v11827_v35  ;;  %10577 = vmatpush3.bf16.msra.mxu0 %v10576_v39 }
0x1c7a   : > { %10582 = vmatprep.subr.bf16.mxu0 %v11825_v34 }
0x1c7c   : > { %9915 = vmatmul.mubr.msk.f32.gmra.mrb[108].mxu0 %vm1838_vm3, %v13056_v18 }
0x1c7d   : > { %9942 = vmatprep.mubr.msk.f32.mxu0 %vm11826_vm4, %v11827_v35 }
0x1c80   : > { %9943 = vmatmul.mubr.msk.f32.vlgmr.msra.gmra.mrb[110].mxu0 %vm1838_vm3, %v13033_v61 }
0x1c81   : > { %9945 = vmatprep.mubr.msk.f32.mxu0 %vm11826_vm4, %v11827_v35 }
0x1c84   : > { %9946 = vmatmul.mubr.msk.f32.gmra.mrb[112].mxu0 %vm1838_vm3, %v13045_v13 }
0x1c85   : > { %9948 = vmatprep.mubr.msk.f32.mxu0 %vm11826_vm4, %v11827_v35 }
0x1c88   : > { %9949 = vmatmul.mubr.msk.f32.gmra.mrb[114].mxu0 %vm1838_vm3, %v13056_v18 }
0x1c89   : > { %9972 = vmatprep.mubr.msk.f32.mxu0 %vm11826_vm4, %v11827_v35 }
0x1d3b   : > { %v5410_v11 = vpop.f32.mrb[98].mxu0 }
0x1d3c   : > { %v5411_v29 = vadd.f32 %v13131_v47, %v5410_v11  ;;  %v9878_v48 = vpop.f32.mrb[99].mxu0 }
0x1d3e   : > { %v5424_v49 = vsel %vm2756_vm8, %v5411_v29, -inf }
0x1d3f   : > { %5425 = vmax.xlane.f32.xlu0 %v5424_v49  ;;  %v5415_v50 = vpop.f32.mrb[100].mxu0 }
0x1d40   : > { %v5416_v36 = vadd.f32 %v13135_v52, %v5415_v50  ;;  %v9881_v53 = vpop.f32.mrb[101].mxu0 }
0x1d42   : > { %v5427_v54 = vsel %vm2756_vm8, %v5416_v36, -inf }
0x1d43   : > { %5428 = vmax.xlane.f32.xlu1 %v5427_v54  ;;  %v5420_v30 = vpop.f32.mrb[102].mxu0 }
0x1d44   : > { %v5421_v56 = vadd.f32 %v13139_v55, %v5420_v30  ;;  %v9884_v57 = vpop.f32.mrb[103].mxu0 }
0x1d46   : > { %v5430_v58 = vsel %vm2756_vm8, %v5421_v56, -inf }
0x1d47   : > { %5431 = vmax.xlane.f32.xlu0 %v5430_v58  ;;  %v13143_v59 = vpop.f32.mrb[104].mxu0 }
0x1d48   : > { %v9910_v60 = vpop.f32.mrb[105].mxu0 }
0x1d4b   : > { %v13145_v62 = vpop.f32.mrb[106].mxu0 }
0x1d4c   : > { %v9913_v63 = vpop.f32.mrb[107].mxu0 }
0x1d4f   : > { %v13147_v0 = vpop.f32.mrb[108].mxu0 }
0x1d50   : > { %v9916_v1 = vpop.f32.mrb[109].mxu0 }
0x1d53   : > { %v5796_v4 = vpop.f32.mrb[110].mxu0 }
0x1d54   : > { %v9944_v10 = vpop.f32.mrb[111].mxu0 }
0x1d57   : > { %v5801_v17 = vpop.f32.mrb[112].mxu0 }
0x1d58   : > { %v10583_v19 = vpack.c.bf16 %v5801_v17, %v5796_v4  ;;  %v9947_v23 = vpop.f32.mrb[113].mxu0 }
0x1d5a   : > { %10584 = vmatpush3.bf16.msra.mxu0 %v10583_v19 }
0x1d5b   : > { %v5806_v25 = vpop.f32.mrb[114].mxu0  ;;  %9970 = vmatprep.subr.mxu0 %v11827_v35 }
0x1d5c   : > { %v9950_v26 = vpop.f32.mrb[115].mxu0 }
0x1d5e   : > { %9971 = vmatpush3.msra.mxu0 %v5806_v25 }
0x1d5f   : > { %10597 = vmatprep.subr.bf16.mxu0 %v11825_v34 }
0x1dcc   : > { %v5426_v27 = vpop.xlane.xlu0 %5425 }
0x1dcd   : > { %v5433_v7 = vsub.f32 %v5411_v29, %v5426_v27 }
0x1dcf   : > { %v5436_v28 = vmul.f32 1.442695, %v5433_v7 }
0x1dd0   : > { %v5429_v24 = vpop.xlane.xlu1 %5428 }
0x1dd1   : > { %11057 = vpow2.f32 %v5436_v28  ;;  %v5434_v22 = vsub.f32 %v5416_v36, %v5429_v24 }
0x1dd3   : > { %v5438_v15 = vmul.f32 1.442695, %v5434_v22 }
0x1dd4   : > { %v5432_v31 = vpop.xlane.xlu0 %5431 }
0x1dd5   : > { %11059 = vpow2.f32 %v5438_v15  ;;  %v5435_v32 = vsub.f32 %v5421_v56, %v5432_v31 }
0x1dd7   : > { %v5440_v20 = vmul.f32 1.442695, %v5435_v32 }
0x1dd9   : > { %11061 = vpow2.f32 %v5440_v20 }
0x1ddb   : > { %v11058_v33 = vpop.eup %11057 }
0x1ddc   : > { %v5442_v37 = vsel %vm2756_vm8, %v11058_v33, 0.0 }
0x1ddd   : > { %5443 = vadd.xlane.f32.xlu1 %v5442_v37 }
0x1ddf   : > { %v11060_v3 = vpop.eup %11059 }
0x1de0   : > { %v5445_v5 = vsel %vm2756_vm8, %v11060_v3, 0.0 }
0x1de1   : > { %5446 = vadd.xlane.f32.xlu0 %v5445_v5 }
0x1de3   : > { %v11062_v12 = vpop.eup %11061 }
0x1de4   : > { %v5448_v8 = vsel %vm2756_vm8, %v11062_v12, 0.0 }
0x1de5   : > { %5449 = vadd.xlane.f32.xlu1 %v5448_v8 }
0x1e6a   : > { %v5444_v38 = vpop.xlane.xlu1 %5443 }
0x1e6b   : > { %11063 = vrcp.f32 %v5444_v38  ;;  %v8662_v38 = vld [vmem:[%s13681_s23 + $0x140] sm:$0xff] }
0x1e6e   : > { %v5447_v40 = vpop.xlane.xlu0 %5446 }
0x1e6f   : > { %11065 = vrcp.f32 %v5447_v40  ;;  %v8663_v40 = vld [vmem:[%s13681_s23 + $0x148] sm:$0xff] }
0x1e70   : > { %v10586_v41 = vpack.c.bf16 %v8663_v40, %v8662_v38  ;;  %v8693_v38 = vld [vmem:[%s13677_s3 + $0xd8] sm:$0xff] }
0x1e72   : > { %v5450_v2 = vpop.xlane.xlu1 %5449 }
0x1e73   : > { %11067 = vrcp.f32 %v5450_v2  ;;  %v8664_v2 = vld [vmem:[%s13681_s23 + $0x150] sm:$0xff] }
0x1e75   : > { %v11064_v42 = vpop.eup %11063 }
0x1e76   : > { %v5454_v16 = vmul.f32 %v11064_v42, %v11058_v33  ;;  %v10589_v42 = vpack.c.bf16 %v8665_v9, %v8664_v2 }
0x1e78   : > { %9892 = vmatmul.mubr.msk.f32.vlgmr.msra.gmra.mrb[94].mxu1 %vm2756_vm8, %v5454_v16  ;;  %v8667_v16 = vld [vmem:[%s13681_s23 + $0x168] sm:$0xff] }
0x1e79   : > { %v11066_v6 = vpop.eup %11065  ;;  %9894 = vmatprep.mubr.msk.f32.mxu1 %vm11826_vm4, %v11827_v35  ;;  %10568 = vmatpush3.bf16.msra.mxu1 %v10567_v14  ;;  %v8666_v14 = vld [vmem:[%s13681_s23 + $0x160] sm:$0xff] }
0x1e7a   : > { %v5455_v21 = vmul.f32 %v11066_v6, %v11060_v3  ;;  %10569 = vmatprep.subr.bf16.mxu1 %v11825_v34  ;;  %v10592_v43 = vpack.c.bf16 %v8667_v16, %v8666_v14  ;;  %v8669_v6 = vld [vmem:[%s13681_s23 + $0x178] sm:$0xff] }
0x1e7c   : > { %9895 = vmatmul.mubr.msk.f32.gmra.mrb[96].mxu1 %vm2756_vm8, %v5455_v21 }
0x1e7d   : > { %v11068_v46 = vpop.eup %11067  ;;  %9897 = vmatprep.mubr.msk.f32.mxu1 %vm11826_vm4, %v11827_v35  ;;  %10571 = vmatpush3.bf16.msra.mxu1 %v10570_v45  ;;  %v10595_v45 = vpack.c.bf16 %v8669_v6, %v8668_v44 }
0x1e7e   : > { %v5456_v39 = vmul.f32 %v11068_v46, %v11062_v12  ;;  %10578 = vmatprep.subr.bf16.mxu1 %v11825_v34 }
0x1e80   : > { %9898 = vmatmul.mubr.msk.f32.gmra.mrb[98].mxu1 %vm2756_vm8, %v5456_v39 }
0x1e81   : > { %9925 = vmatprep.mubr.msk.f32.mxu1 %vm11826_vm4, %v11827_v35 }
0x1e84   : > { %9926 = vmatmul.mubr.msk.f32.vlgmr.msra.gmra.mrb[100].mxu1 %vm1838_vm3, %v13033_v61 }
0x1e85   : > { %9928 = vmatprep.mubr.msk.f32.mxu1 %vm11826_vm4, %v11827_v35 }
0x1e88   : > { %9929 = vmatmul.mubr.msk.f32.gmra.mrb[102].mxu1 %vm1838_vm3, %v13045_v13 }
0x1e89   : > { %9931 = vmatprep.mubr.msk.f32.mxu1 %vm11826_vm4, %v11827_v35 }
0x1e8c   : > { %9932 = vmatmul.mubr.msk.f32.gmra.mrb[104].mxu1 %vm1838_vm3, %v13056_v18 }
0x1e8d   : > { %9957 = vmatprep.mubr.msk.f32.mxu1 %vm11826_vm4, %v11827_v35 }
0x1f4b   : > { %v13181_v11 = vpop.f32.mrb[94].mxu1 }
0x1f4c   : > { %v9893_v29 = vpop.f32.mrb[95].mxu1 }
0x1f4d   : > { %v8624_v29 = vld [vmem:[%s13681_s23 + $0x100] sm:$0xff] }
0x1f4f   : > { %v13183_v48 = vpop.f32.mrb[96].mxu1 }
0x1f50   : > { %v9896_v49 = vpop.f32.mrb[97].mxu1 }
0x1f51   : > { %v8625_v49 = vld [vmem:[%s13681_s23 + $0x108] sm:$0xff] }
0x1f53   : > { %v13185_v50 = vpop.f32.mrb[98].mxu1 }
0x1f54   : > { %v9899_v36 = vpop.f32.mrb[99].mxu1 }
0x1f57   : > { %v5711_v53 = vpop.f32.mrb[100].mxu1 }
0x1f58   : > { %v9927_v54 = vpop.f32.mrb[101].mxu1 }
0x1f5b   : > { %v5716_v30 = vpop.f32.mrb[102].mxu1 }
0x1f5c   : > { %v10579_v56 = vpack.c.bf16 %v5716_v30, %v5711_v53  ;;  %v9930_v57 = vpop.f32.mrb[103].mxu1  ;;  %v10598_v53 = vpack.c.bf16 %v8625_v49, %v8624_v29  ;;  %v8626_v30 = vld [vmem:[%s13681_s23 + $0x110] sm:$0xff] }
0x1f5e   : > { %10581 = vmatpush3.bf16.xpose.msk.msra.mxu1 %vm12535_vm7, %v10579_v56  ;;  %v8627_v56 = vld [vmem:[%s13681_s23 + $0x118] sm:$0xff] }
0x1f5f   : > { %v5721_v58 = vpop.f32.mrb[104].mxu1  ;;  %9955 = vmatprep.subr.mxu1 %v11827_v35 }
0x1f60   : > { %v9933_v60 = vpop.f32.mrb[105].mxu1 }
0x1f66   : > { %9956 = vmatpush3.xpose.msk.msra.mxu1 %vm2086_vm5, %v5721_v58  ;;  %v10601_v58 = vpack.c.bf16 %v8627_v56, %v8626_v30 }
0x1f67   : > { %10585 = vmatprep.subr.bf16.mxu1 %v11825_v34 }
0x1f69   : > { %9958 = vmatmul.mubr.msk.f32.vlgmr.msra.gmra.mrb[106].mxu1 %vm2086_vm5, %v13143_v59 }
0x1f6a   : > { %9960 = vmatprep.mubr.msk.f32.mxu1 %vm11826_vm4, %v11827_v35  ;;  %10587 = vmatpush3.bf16.msra.mxu1 %v10586_v41 }
0x1f6b   : > { %10588 = vmatprep.subr.bf16.mxu1 %v11825_v34 }
0x1f6d   : > { %9961 = vmatmul.mubr.msk.f32.gmra.mrb[108].mxu1 %vm2086_vm5, %v13145_v62 }
0x1f6e   : > { %9963 = vmatprep.mubr.msk.f32.mxu1 %vm11826_vm4, %v11827_v35  ;;  %10590 = vmatpush3.bf16.msra.mxu1 %v10589_v42 }
0x1f6f   : > { %10591 = vmatprep.subr.bf16.mxu1 %v11825_v34 }
0x1f71   : > { %9964 = vmatmul.mubr.msk.f32.gmra.mrb[110].mxu1 %vm2086_vm5, %v13147_v0 }
0x1f72   : > { %9997 = vmatprep.mubr.msk.f32.mxu1 %vm11826_vm4, %v11827_v35  ;;  %10593 = vmatpush3.bf16.msra.mxu1 %v10592_v43 }
0x1f73   : > { %10594 = vmatprep.subr.bf16.mxu1 %v11825_v34 }
0x1f76   : > { %10596 = vmatpush3.bf16.msra.mxu1 %v10595_v45 }
0x1f77   : > { %10609 = vmatprep.subr.bf16.mxu1 %v11825_v34 }
0x203c   : > { %v5894_v63 = vpop.f32.mrb[106].mxu1 }
0x203d   : > { %v5895_v1 = vadd.f32 %v13131_v47, %v5894_v63  ;;  %v9959_v4 = vpop.f32.mrb[107].mxu1  ;;  %v8628_v63 = vld [vmem:[%s13681_s23 + $0x120] sm:$0xff] }
0x203f   : > { %v5908_v59 = vsel %vm2756_vm8, %v5895_v1, -inf }
0x2040   : > { %5909 = vmax.xlane.f32.xlu0 %v5908_v59  ;;  %v5899_v10 = vpop.f32.mrb[108].mxu1 }
0x2041   : > { %v5900_v17 = vadd.f32 %v13135_v52, %v5899_v10  ;;  %v9962_v62 = vpop.f32.mrb[109].mxu1 }
0x2042   : > { %v8631_v62 = vld [vmem:[%s13681_s23 + $0x138] sm:$0xff] }
0x2043   : > { %v5911_v19 = vsel %vm2756_vm8, %v5900_v17, -inf }
0x2044   : > { %5912 = vmax.xlane.f32.xlu1 %v5911_v19  ;;  %v5904_v23 = vpop.f32.mrb[110].mxu1 }
0x2045   : > { %v5905_v0 = vadd.f32 %v13139_v55, %v5904_v23  ;;  %v9965_v25 = vpop.f32.mrb[111].mxu1  ;;  %v8683_v23 = vld [vmem:[%s13678_s9 + $0xc0] sm:$0xff] }
0x2047   : > { %v5914_v26 = vsel %vm2756_vm8, %v5905_v0, -inf }
0x2048   : > { %5915 = vmax.xlane.f32.xlu0 %v5914_v26  ;;  %v8685_v26 = vld [vmem:[%s13678_s9 + $0xd0] sm:$0xff] }
0x20cd   : > { %v5910_v27 = vpop.xlane.xlu0 %5909 }
0x20ce   : > { %v5917_v7 = vsub.f32 %v5895_v1, %v5910_v27  ;;  %v8629_v1 = vld [vmem:[%s13681_s23 + $0x128] sm:$0xff]  ;;  %v8686_v27 = vld [vmem:[%s13678_s9 + $0xd8] sm:$0xff] }
0x20cf   : > { %v10604_v59 = vpack.c.bf16 %v8629_v1, %v8628_v63 }
0x20d0   : > { %v5920_v28 = vmul.f32 1.442695, %v5917_v7  ;;  %v10619_v7 = vpack.c.bf16 %v8686_v27, %v8685_v26 }
0x20d1   : > { %v5913_v24 = vpop.xlane.xlu1 %5912 }
0x20d2   : > { %11069 = vpow2.f32 %v5920_v28  ;;  %v5918_v22 = vsub.f32 %v5900_v17, %v5913_v24  ;;  %v8630_v17 = vld [vmem:[%s13681_s23 + $0x130] sm:$0xff]  ;;  %v8679_v24 = vld [vmem:[%s13676_s5 + $0xd8] sm:$0xff] }
0x20d3   : > { %v10607_v19 = vpack.c.bf16 %v8631_v62, %v8630_v17  ;;  %v8678_v28 = vld [vmem:[%s13676_s5 + $0xd0] sm:$0xff] }
0x20d4   : > { %v5922_v15 = vmul.f32 1.442695, %v5918_v22 }
0x20d5   : > { %v5916_v31 = vpop.xlane.xlu0 %5915 }
0x20d6   : > { %11071 = vpow2.f32 %v5922_v15  ;;  %v5919_v32 = vsub.f32 %v5905_v0, %v5916_v31  ;;  %v8684_v0 = vld [vmem:[%s13678_s9 + $0xc8] sm:$0xff]  ;;  %v10613_v31 = vpack.c.bf16 %v8679_v24, %v8678_v28 }
0x20d7   : > { %v10616_v25 = vpack.c.bf16 %v8684_v0, %v8683_v23 }
0x20d8   : > { %v5924_v20 = vmul.f32 1.442695, %v5919_v32 }
0x20da   : > { %11073 = vpow2.f32 %v5924_v20 }
0x20dc   : > { %v11070_v33 = vpop.eup %11069 }
0x20dd   : > { %v5926_v37 = vsel %vm2756_vm8, %v11070_v33, 0.0 }
0x20de   : > { %5927 = vadd.xlane.f32.xlu1 %v5926_v37  ;;  %v8691_v37 = vld [vmem:[%s13677_s3 + $0xc8] sm:$0xff] }
0x20e0   : > { %v11072_v3 = vpop.eup %11071 }
0x20e1   : > { %v5929_v5 = vsel %vm2756_vm8, %v11072_v3, 0.0 }
0x20e2   : > { %5930 = vadd.xlane.f32.xlu0 %v5929_v5 }
0x20e4   : > { %v11074_v12 = vpop.eup %11073 }
0x20e5   : > { %v5932_v8 = vsel %vm2756_vm8, %v11074_v12, 0.0 }
0x20e6   : > { %5933 = vadd.xlane.f32.xlu1 %v5932_v8  ;;  %v8692_v8 = vld [vmem:[%s13677_s3 + $0xd0] sm:$0xff] }
0x20e7   : > { %v10625_v40 = vpack.c.bf16 %v8693_v38, %v8692_v8 }
0x216b   : > { %v5928_v21 = vpop.xlane.xlu1 %5927 }
0x216c   : > { %11075 = vrcp.f32 %v5928_v21 }
0x216f   : > { %v5931_v46 = vpop.xlane.xlu0 %5930 }
0x2170   : > { %11077 = vrcp.f32 %v5931_v46 }
0x2173   : > { %v5934_v39 = vpop.xlane.xlu1 %5933 }
0x2174   : > { %11079 = vrcp.f32 %v5934_v39 }
0x2176   : > { %v11076_v36 = vpop.eup %11075 }
0x2177   : > { %v5938_v54 = vmul.f32 %v11076_v36, %v11070_v33  ;;  %v8690_v33 = vld [vmem:[%s13677_s3 + $0xc0] sm:$0xff] }
0x2179   : > { %9973 = vmatmul.mubr.msk.f32.vlgmr.msra.gmra.mrb[116].mxu0 %vm2756_vm8, %v5938_v54 }
0x217a   : > { %v11078_v57 = vpop.eup %11077  ;;  %10599 = vmatpush3.bf16.msra.mxu0 %v10598_v53  ;;  %9975 = vmatprep.mubr.msk.f32.mxu0 %vm11826_vm4, %v11827_v35 }
0x217b   : > { %10600 = vmatprep.subr.bf16.mxu0 %v11825_v34  ;;  %v5939_v60 = vmul.f32 %v11078_v57, %v11072_v3 }
0x217d   : > { %9976 = vmatmul.mubr.msk.f32.gmra.mrb[118].mxu0 %vm2756_vm8, %v5939_v60 }
0x217e   : > { %v11080_v4 = vpop.eup %11079  ;;  %10602 = vmatpush3.bf16.msra.mxu0 %v10601_v58  ;;  %9978 = vmatprep.mubr.msk.f32.mxu0 %vm11826_vm4, %v11827_v35 }
0x217f   : > { %10603 = vmatprep.subr.bf16.mxu0 %v11825_v34  ;;  %v5940_v10 = vmul.f32 %v11080_v4, %v11074_v12  ;;  %v10622_v12 = vpack.c.bf16 %v8691_v37, %v8690_v33 }
0x2181   : > { %9979 = vmatmul.mubr.msk.f32.gmra.mrb[120].mxu0 %vm2756_vm8, %v5940_v10 }
0x2182   : > { %10605 = vmatpush3.bf16.msra.mxu0 %v10604_v59  ;;  %10022 = vmatprep.mubr.msk.f32.mxu0 %vm11826_vm4, %v11827_v35 }
0x2183   : > { %10606 = vmatprep.subr.bf16.mxu0 %v11825_v34 }
0x2186   : > { %10608 = vmatpush3.bf16.msra.mxu0 %v10607_v19 }
0x2187   : > { %10615 = vmatprep.subr.bf16.mxu0 %v11825_v34 }
0x2189   : > { %10023 = vmatmul.mubr.msk.f32.vlgmr.msra.gmra.mrb[122].mxu0 %vm2086_vm5, %v13181_v11  ;;  %v8676_v11 = vld [vmem:[%s13676_s5 + $0xc0] sm:$0xff] }
0x218a   : > { %10025 = vmatprep.mubr.msk.f32.mxu0 %vm11826_vm4, %v11827_v35  ;;  %10617 = vmatpush3.bf16.msra.mxu0 %v10616_v25 }
0x218b   : > { %10618 = vmatprep.subr.bf16.mxu0 %v11825_v34 }
0x218d   : > { %10026 = vmatmul.mubr.msk.f32.gmra.mrb[124].mxu0 %vm2086_vm5, %v13183_v48  ;;  %v8677_v48 = vld [vmem:[%s13676_s5 + $0xc8] sm:$0xff] }
0x218e   : > { %10028 = vmatprep.mubr.msk.f32.mxu0 %vm11826_vm4, %v11827_v35  ;;  %10620 = vmatpush3.bf16.msra.mxu0 %v10619_v7 }
0x218f   : > { %10627 = vmatprep.subr.bf16.mxu0 %v11825_v34 }
0x2191   : > { %10029 = vmatmul.mubr.msk.f32.gmra.mrb[126].mxu0 %vm2086_vm5, %v13185_v50  ;;  %v10610_v50 = vpack.c.bf16 %v8677_v48, %v8676_v11 }
0x2192   : > { %10056 = vmatprep.mubr.msk.f32.mxu0 %vm11826_vm4, %v11827_v35 }
0x2195   : > { %10057 = vmatmul.mubr.msk.f32.vlgmr.msra.gmra.mrb[128].mxu0 %vm1838_vm3, %v13033_v61 }
0x2196   : > { %10059 = vmatprep.mubr.msk.f32.mxu0 %vm11826_vm4, %v11827_v35 }
0x2199   : > { %10060 = vmatmul.mubr.msk.f32.gmra.mrb[130].mxu0 %vm1838_vm3, %v13045_v13 }
0x219a   : > { %10062 = vmatprep.mubr.msk.f32.mxu0 %vm11826_vm4, %v11827_v35 }
0x219d   : > { %10063 = vmatmul.mubr.msk.f32.gmra.mrb[132].mxu0 %vm1838_vm3, %v13056_v18 }
0x219e   : > { %10088 = vmatprep.mubr.msk.f32.mxu0 %vm11826_vm4, %v11827_v35 }
0x224c   : > { %v6016_v22 = vpop.f32.mrb[116].mxu0 }
0x224d   : > { %v9974_v15 = vpop.f32.mrb[117].mxu0  ;;  %9998 = vmatmul.mubr.msk.f32.vlgmr.msra.gmra.mrb[112].mxu1 %vm2086_vm5, %v6016_v22 }
0x224e   : > { %10000 = vmatprep.mubr.msk.f32.mxu1 %vm11826_vm4, %v11827_v35  ;;  %10611 = vmatpush3.bf16.msra.mxu1 %v10610_v50 }
0x224f   : > { %10612 = vmatprep.subr.bf16.mxu1 %v11825_v34 }
0x2250   : > { %v6021_v32 = vpop.f32.mrb[118].mxu0 }
0x2251   : > { %v9977_v20 = vpop.f32.mrb[119].mxu0  ;;  %10001 = vmatmul.mubr.msk.f32.gmra.mrb[114].mxu1 %vm2086_vm5, %v6021_v32 }
0x2252   : > { %10003 = vmatprep.mubr.msk.f32.mxu1 %vm11826_vm4, %v11827_v35  ;;  %10614 = vmatpush3.bf16.msra.mxu1 %v10613_v31 }
0x2253   : > { %10621 = vmatprep.subr.bf16.mxu1 %v11825_v34 }
0x2254   : > { %v6026_v3 = vpop.f32.mrb[120].mxu0 }
0x2255   : > { %v9980_v5 = vpop.f32.mrb[121].mxu0  ;;  %10004 = vmatmul.mubr.msk.f32.gmra.mrb[116].mxu1 %vm2086_vm5, %v6026_v3 }
0x2256   : > { %10039 = vmatprep.mubr.msk.f32.mxu1 %vm11826_vm4, %v11827_v35 }
0x2259   : > { %10040 = vmatmul.mubr.msk.f32.vlgmr.msra.gmra.mrb[118].mxu1 %vm1838_vm3, %v13033_v61 }
0x225a   : > { %10042 = vmatprep.mubr.msk.f32.mxu1 %vm11826_vm4, %v11827_v35  ;;  %10623 = vmatpush3.bf16.msra.mxu1 %v10622_v12 }
0x225b   : > { %10624 = vmatprep.subr.bf16.mxu1 %v11825_v34 }
0x225c   : > { %v6203_v2 = vpop.f32.mrb[122].mxu0 }
0x225d   : > { %v10024_v41 = vpop.f32.mrb[123].mxu0  ;;  %10043 = vmatmul.mubr.msk.f32.gmra.mrb[120].mxu1 %vm1838_vm3, %v13045_v13 }
0x225e   : > { %10045 = vmatprep.mubr.msk.f32.mxu1 %vm11826_vm4, %v11827_v35  ;;  %10626 = vmatpush3.bf16.msra.mxu1 %v10625_v40 }
0x225f   : > { %10631 = vmatprep.subr.bf16.mxu1 %v11825_v34 }
0x2260   : > { %v6208_v9 = vpop.f32.mrb[124].mxu0 }
0x2261   : > { %v10027_v42 = vpop.f32.mrb[125].mxu0  ;;  %10046 = vmatmul.mubr.msk.f32.gmra.mrb[122].mxu1 %vm1838_vm3, %v13056_v18 }
0x2262   : > { %10073 = vmatprep.mubr.msk.f32.mxu1 %vm11826_vm4, %v11827_v35 }
0x2264   : > { %v6213_v14 = vpop.f32.mrb[126].mxu0 }
0x2265   : > { %v10030_v16 = vpop.f32.mrb[127].mxu0  ;;  %10074 = vmatmul.mubr.msk.f32.vlgmr.msra.gmra.mrb[124].mxu1 %vm1838_vm3, %v13033_v61 }
0x2266   : > { %10076 = vmatprep.mubr.msk.f32.mxu1 %vm11826_vm4, %v11827_v35 }
0x2268   : > { %v6373_v43 = vpop.f32.mrb[128].mxu0 }
0x2269   : > { %v10058_v44 = vpop.f32.mrb[129].mxu0  ;;  %10077 = vmatmul.mubr.msk.f32.gmra.mrb[126].mxu1 %vm1838_vm3, %v13045_v13 }
0x226a   : > { %10079 = vmatprep.mubr.msk.f32.mxu1 %vm11826_vm4, %v11827_v35  ;;  %v8706_v44 = vld [vmem:[%s13681_s23 + $0x180] sm:$0xff] }
0x226c   : > { %v6378_v6 = vpop.f32.mrb[130].mxu0 }
0x226d   : > { %v10628_v45 = vpack.c.bf16 %v6378_v6, %v6373_v43  ;;  %v10061_v21 = vpop.f32.mrb[131].mxu0  ;;  %10080 = vmatmul.mubr.msk.f32.gmra.mrb[128].mxu1 %vm1838_vm3, %v13056_v18  ;;  %v8707_v6 = vld [vmem:[%s13681_s23 + $0x188] sm:$0xff] }
0x226e   : > { %10103 = vmatprep.mubr.msk.f32.mxu1 %vm11826_vm4, %v11827_v35  ;;  %v10635_v21 = vpack.c.bf16 %v8707_v6, %v8706_v44 }
0x226f   : > { %10630 = vmatpush3.bf16.xpose.msk.msra.mxu0 %vm12535_vm7, %v10628_v45  ;;  %v8708_v45 = vld [vmem:[%s13681_s23 + $0x190] sm:$0xff] }
0x2270   : > { %v6383_v46 = vpop.f32.mrb[132].mxu0  ;;  %10086 = vmatprep.subr.mxu0 %v11827_v35 }
0x2271   : > { %v10064_v39 = vpop.f32.mrb[133].mxu0 }
0x2277   : > { %10087 = vmatpush3.xpose.msk.msra.mxu0 %vm2086_vm5, %v6383_v46  ;;  %v8709_v46 = vld [vmem:[%s13681_s23 + $0x198] sm:$0xff] }
0x2278   : > { %10634 = vmatprep.subr.bf16.mxu0 %v11825_v34  ;;  %v10638_v39 = vpack.c.bf16 %v8709_v46, %v8708_v45 }
0x2320   : > { %v6114_v29 = vpop.f32.mrb[112].mxu1 }
0x2321   : > { %v13326_v49 = vadd.f32 %v6203_v2, %v6114_v29  ;;  %v9999_v36 = vpop.f32.mrb[113].mxu1  ;;  %v8710_v29 = vld [vmem:[%s13681_s23 + $0x1a0] sm:$0xff] }
0x2322   : > { %v8711_v36 = vld [vmem:[%s13681_s23 + $0x1a8] sm:$0xff] }
0x2324   : > { %v6119_v53 = vpop.f32.mrb[114].mxu1 }
0x2325   : > { %v13328_v54 = vadd.f32 %v6208_v9, %v6119_v53  ;;  %v10002_v30 = vpop.f32.mrb[115].mxu1  ;;  %v10641_v53 = vpack.c.bf16 %v8711_v36, %v8710_v29 }
0x2326   : > { %v8712_v30 = vld [vmem:[%s13681_s23 + $0x1b0] sm:$0xff] }
0x2328   : > { %v6124_v56 = vpop.f32.mrb[116].mxu1 }
0x2329   : > { %v13330_v57 = vadd.f32 %v6213_v14, %v6124_v56  ;;  %v10005_v58 = vpop.f32.mrb[117].mxu1  ;;  %v8713_v56 = vld [vmem:[%s13681_s23 + $0x1b8] sm:$0xff] }
0x232a   : > { %v10644_v58 = vpack.c.bf16 %v8713_v56, %v8712_v30 }
0x232c   : > { %v6288_v60 = vpop.f32.mrb[118].mxu1 }
0x232d   : > { %v10041_v63 = vpop.f32.mrb[119].mxu1  ;;  %10089 = vmatmul.mubr.msk.f32.vlgmr.msra.gmra.mrb[134].mxu0 %vm2086_vm5, %v6288_v60 }
0x232e   : > { %10091 = vmatprep.mubr.msk.f32.mxu0 %vm11826_vm4, %v11827_v35  ;;  %10636 = vmatpush3.bf16.msra.mxu0 %v10635_v21 }
0x232f   : > { %10637 = vmatprep.subr.bf16.mxu0 %v11825_v34 }
0x2330   : > { %v6293_v1 = vpop.f32.mrb[120].mxu1 }
0x2331   : > { %v10044_v4 = vpop.f32.mrb[121].mxu1  ;;  %10092 = vmatmul.mubr.msk.f32.gmra.mrb[136].mxu0 %vm2086_vm5, %v6293_v1 }
0x2332   : > { %10094 = vmatprep.mubr.msk.f32.mxu0 %vm11826_vm4, %v11827_v35  ;;  %10639 = vmatpush3.bf16.msra.mxu0 %v10638_v39  ;;  %v8717_v4 = vld [vmem:[%s13676_s5 + $0xe0] sm:$0xff] }
0x2333   : > { %10640 = vmatprep.subr.bf16.mxu0 %v11825_v34 }
0x2334   : > { %v6298_v59 = vpop.f32.mrb[122].mxu1 }
0x2335   : > { %v10047_v10 = vpop.f32.mrb[123].mxu1  ;;  %10095 = vmatmul.mubr.msk.f32.gmra.mrb[138].mxu0 %vm2086_vm5, %v6298_v59  ;;  %v8718_v59 = vld [vmem:[%s13676_s5 + $0xe8] sm:$0xff] }
0x2336   : > { %10128 = vmatprep.mubr.msk.f32.mxu0 %vm11826_vm4, %v11827_v35  ;;  %10642 = vmatpush3.bf16.msra.mxu0 %v10641_v53 }
0x2337   : > { %10643 = vmatprep.subr.bf16.mxu0 %v11825_v34 }
0x2338   : > { %v6458_v17 = vpop.f32.mrb[124].mxu1 }
0x2339   : > { %v10075_v62 = vpop.f32.mrb[125].mxu1 }
0x233a   : > { %10645 = vmatpush3.bf16.msra.mxu0 %v10644_v58 }
0x233b   : > { %10658 = vmatprep.subr.bf16.mxu0 %v11825_v34 }
0x233c   : > { %v6463_v19 = vpop.f32.mrb[126].mxu1 }
0x233d   : > { %v10632_v23 = vpack.c.bf16 %v6463_v19, %v6458_v17  ;;  %v10078_v0 = vpop.f32.mrb[127].mxu1  ;;  %v10647_v17 = vpack.c.bf16 %v8718_v59, %v8717_v4  ;;  %v8719_v19 = vld [vmem:[%s13676_s5 + $0xf0] sm:$0xff] }
0x233f   : > { %10633 = vmatpush3.bf16.msra.mxu1 %v10632_v23  ;;  %v8720_v23 = vld [vmem:[%s13676_s5 + $0xf8] sm:$0xff] }
0x2340   : > { %v6468_v25 = vpop.f32.mrb[128].mxu1  ;;  %10101 = vmatprep.subr.mxu1 %v11827_v35 }
0x2341   : > { %v10081_v26 = vpop.f32.mrb[129].mxu1 }
0x2343   : > { %10102 = vmatpush3.msra.mxu1 %v6468_v25  ;;  %v10650_v25 = vpack.c.bf16 %v8720_v23, %v8719_v19 }
0x2344   : > { %10646 = vmatprep.subr.bf16.mxu1 %v11825_v34 }
0x2400   : > { %v6556_v27 = vpop.f32.mrb[134].mxu0 }
0x2401   : > { %v6557_v7 = vadd.f32 %v13131_v47, %v6556_v27  ;;  %v10090_v11 = vpop.f32.mrb[135].mxu0 }
0x2402   : > { %v8724_v11 = vld [vmem:[%s13678_s9 + $0xe0] sm:$0xff] }
0x2403   : > { %v6570_v48 = vsel %vm2756_vm8, %v6557_v7, -inf }
0x2404   : > { %6571 = vmax.xlane.f32.xlu0 %v6570_v48  ;;  %v6561_v50 = vpop.f32.mrb[136].mxu0  ;;  %v8725_v48 = vld [vmem:[%s13678_s9 + $0xe8] sm:$0xff] }
0x2405   : > { %v6562_v28 = vadd.f32 %v13135_v52, %v6561_v50  ;;  %v10093_v24 = vpop.f32.mrb[137].mxu0  ;;  %v10653_v50 = vpack.c.bf16 %v8725_v48, %v8724_v11 }
0x2406   : > { %v8727_v24 = vld [vmem:[%s13678_s9 + $0xf8] sm:$0xff] }
0x2407   : > { %v6573_v22 = vsel %vm2756_vm8, %v6562_v28, -inf }
0x2408   : > { %6574 = vmax.xlane.f32.xlu1 %v6573_v22  ;;  %v6566_v15 = vpop.f32.mrb[138].mxu0 }
0x2409   : > { %v6567_v31 = vadd.f32 %v13139_v55, %v6566_v15  ;;  %v10096_v32 = vpop.f32.mrb[139].mxu0  ;;  %v8731_v15 = vld [vmem:[%s13677_s3 + $0xe0] sm:$0xff] }
0x240b   : > { %v6576_v20 = vsel %vm2756_vm8, %v6567_v31, -inf }
0x240c   : > { %6577 = vmax.xlane.f32.xlu0 %v6576_v20  ;;  %v8733_v20 = vld [vmem:[%s13677_s3 + $0xf0] sm:$0xff] }
0x2491   : > { %v6572_v33 = vpop.xlane.xlu0 %6571 }
0x2492   : > { %v6579_v37 = vsub.f32 %v6557_v7, %v6572_v33  ;;  %v8734_v33 = vld [vmem:[%s13677_s3 + $0xf8] sm:$0xff] }
0x2494   : > { %v6582_v3 = vmul.f32 1.442695, %v6579_v37 }
0x2495   : > { %v6575_v5 = vpop.xlane.xlu1 %6574 }
0x2496   : > { %11081 = vpow2.f32 %v6582_v3  ;;  %v6580_v12 = vsub.f32 %v6562_v28, %v6575_v5  ;;  %v8726_v28 = vld [vmem:[%s13678_s9 + $0xf0] sm:$0xff]  ;;  %v10662_v5 = vpack.c.bf16 %v8734_v33, %v8733_v20 }
0x2497   : > { %v10656_v22 = vpack.c.bf16 %v8727_v24, %v8726_v28 }
0x2498   : > { %v6584_v8 = vmul.f32 1.442695, %v6580_v12 }
0x2499   : > { %v6578_v38 = vpop.xlane.xlu0 %6577 }
0x249a   : > { %11083 = vpow2.f32 %v6584_v8  ;;  %v6581_v40 = vsub.f32 %v6567_v31, %v6578_v38  ;;  %v8732_v31 = vld [vmem:[%s13677_s3 + $0xe8] sm:$0xff] }
0x249b   : > { %v10659_v32 = vpack.c.bf16 %v8732_v31, %v8731_v15 }
0x249c   : > { %v6586_v2 = vmul.f32 1.442695, %v6581_v40 }
0x249e   : > { %11085 = vpow2.f32 %v6586_v2 }
0x24a0   : > { %v11082_v41 = vpop.eup %11081 }
0x24a1   : > { %v6588_v9 = vsel %vm2756_vm8, %v11082_v41, 0.0 }
0x24a2   : > { %6589 = vadd.xlane.f32.xlu1 %v6588_v9 }
0x24a4   : > { %v11084_v42 = vpop.eup %11083 }
0x24a5   : > { %v6591_v14 = vsel %vm2756_vm8, %v11084_v42, 0.0 }
0x24a6   : > { %6592 = vadd.xlane.f32.xlu0 %v6591_v14 }
0x24a8   : > { %v11086_v16 = vpop.eup %11085 }
0x24a9   : > { %v6594_v43 = vsel %vm2756_vm8, %v11086_v16, 0.0 }
0x24aa   : > { %6595 = vadd.xlane.f32.xlu1 %v6594_v43 }
0x252f   : > { %v6590_v60 = vpop.xlane.xlu1 %6589 }
0x2530   : > { %11087 = vrcp.f32 %v6590_v60 }
0x2533   : > { %v6593_v63 = vpop.xlane.xlu0 %6592 }
0x2534   : > { %11089 = vrcp.f32 %v6593_v63 }
0x2537   : > { %v6596_v1 = vpop.xlane.xlu1 %6595 }
0x2538   : > { %11091 = vrcp.f32 %v6596_v1 }
0x253a   : > { %v11088_v10 = vpop.eup %11087 }
0x253b   : > { %v6600_v62 = vmul.f32 %v11088_v10, %v11082_v41 }
0x253d   : > { %10104 = vmatmul.mubr.msk.f32.vlgmr.msra.gmra.mrb[130].mxu1 %vm2756_vm8, %v6600_v62 }
0x253e   : > { %v11090_v0 = vpop.eup %11089  ;;  %10106 = vmatprep.mubr.msk.f32.mxu1 %vm11826_vm4, %v11827_v35  ;;  %10648 = vmatpush3.bf16.msra.mxu1 %v10647_v17 }
0x253f   : > { %v6601_v26 = vmul.f32 %v11090_v0, %v11084_v42  ;;  %10649 = vmatprep.subr.bf16.mxu1 %v11825_v34 }
0x2541   : > { %10107 = vmatmul.mubr.msk.f32.gmra.mrb[132].mxu1 %vm2756_vm8, %v6601_v26 }
0x2542   : > { %v11092_v27 = vpop.eup %11091  ;;  %10109 = vmatprep.mubr.msk.f32.mxu1 %vm11826_vm4, %v11827_v35  ;;  %10651 = vmatpush3.bf16.msra.mxu1 %v10650_v25 }
0x2543   : > { %v6602_v7 = vmul.f32 %v11092_v27, %v11086_v16  ;;  %10652 = vmatprep.subr.bf16.mxu1 %v11825_v34 }
0x2545   : > { %10110 = vmatmul.mubr.msk.f32.gmra.mrb[134].mxu1 %vm2756_vm8, %v6602_v7 }
0x2546   : > { %10145 = vmatprep.mubr.msk.f32.mxu1 %vm11826_vm4, %v11827_v35 }
0x2549   : > { %10146 = vmatmul.mubr.msk.f32.vlgmr.msra.gmra.mrb[136].mxu1 %vm1838_vm3, %v13033_v61 }
0x254a   : > { %10148 = vmatprep.mubr.msk.f32.mxu1 %vm11826_vm4, %v11827_v35  ;;  %10654 = vmatpush3.bf16.msra.mxu1 %v10653_v50 }
0x254b   : > { %10655 = vmatprep.subr.bf16.mxu1 %v11825_v34 }
0x254d   : > { %10149 = vmatmul.mubr.msk.f32.gmra.mrb[138].mxu1 %vm1838_vm3, %v13045_v13 }
0x254e   : > { %10151 = vmatprep.mubr.msk.f32.mxu1 %vm11826_vm4, %v11827_v35  ;;  %10657 = vmatpush3.bf16.msra.mxu1 %v10656_v22 }
0x254f   : > { %10664 = vmatprep.subr.bf16.mxu1 %v11825_v34 }
0x2551   : > { %10152 = vmatmul.mubr.msk.f32.gmra.mrb[140].mxu1 %vm1838_vm3, %v13056_v18 }
0x2552   : > { %10162 = vmatprep.mubr.msk.f32.mxu1 %vm11826_vm4, %v11827_v35 }
0x2555   : > { %10163 = vmatmul.mubr.msk.f32.vlgmr.msra.gmra.mrb[142].mxu1 %vm1838_vm3, %v13033_v61 }
0x2556   : > { %10165 = vmatprep.mubr.msk.f32.mxu1 %vm11826_vm4, %v11827_v35 }
0x2559   : > { %10166 = vmatmul.mubr.msk.f32.gmra.mrb[144].mxu1 %vm1838_vm3, %v13045_v13 }
0x255a   : > { %10168 = vmatprep.mubr.msk.f32.mxu1 %vm11826_vm4, %v11827_v35 }
0x255d   : > { %10169 = vmatmul.mubr.msk.f32.gmra.mrb[146].mxu1 %vm1838_vm3, %v13056_v18 }
0x255e   : > { %10194 = vmatprep.mubr.msk.f32.mxu1 %vm11826_vm4, %v11827_v35 }
0x2610   : > { %v6678_v37 = vpop.f32.mrb[130].mxu1 }
0x2611   : > { %v10105_v3 = vpop.f32.mrb[131].mxu1  ;;  %10129 = vmatmul.mubr.msk.f32.vlgmr.msra.gmra.mrb[140].mxu0 %vm2086_vm5, %v6678_v37 }
0x2612   : > { %10131 = vmatprep.mubr.msk.f32.mxu0 %vm11826_vm4, %v11827_v35  ;;  %10660 = vmatpush3.bf16.msra.mxu0 %v10659_v32 }
0x2613   : > { %10661 = vmatprep.subr.bf16.mxu0 %v11825_v34 }
0x2614   : > { %v6683_v12 = vpop.f32.mrb[132].mxu1 }
0x2615   : > { %v10108_v8 = vpop.f32.mrb[133].mxu1  ;;  %10132 = vmatmul.mubr.msk.f32.gmra.mrb[142].mxu0 %vm2086_vm5, %v6683_v12 }
0x2616   : > { %10134 = vmatprep.mubr.msk.f32.mxu0 %vm11826_vm4, %v11827_v35  ;;  %10663 = vmatpush3.bf16.msra.mxu0 %v10662_v5  ;;  %v8747_v8 = vld [vmem:[%s13681_s23 + $0x1c0] sm:$0xff] }
0x2617   : > { %10668 = vmatprep.subr.bf16.mxu0 %v11825_v34 }
0x2618   : > { %v6688_v38 = vpop.f32.mrb[134].mxu1 }
0x2619   : > { %v10111_v40 = vpop.f32.mrb[135].mxu1  ;;  %10135 = vmatmul.mubr.msk.f32.gmra.mrb[144].mxu0 %vm2086_vm5, %v6688_v38  ;;  %v8748_v38 = vld [vmem:[%s13681_s23 + $0x1c8] sm:$0xff] }
0x261a   : > { %10179 = vmatprep.mubr.msk.f32.mxu0 %vm11826_vm4, %v11827_v35  ;;  %v8749_v40 = vld [vmem:[%s13681_s23 + $0x1d0] sm:$0xff] }
0x261c   : > { %v6864_v2 = vpop.f32.mrb[136].mxu1 }
0x261d   : > { %v10147_v41 = vpop.f32.mrb[137].mxu1  ;;  %10180 = vmatmul.mubr.msk.f32.vlgmr.msra.gmra.mrb[146].mxu0 %vm1838_vm3, %v13033_v61 }
0x261e   : > { %10182 = vmatprep.mubr.msk.f32.mxu0 %vm11826_vm4, %v11827_v35  ;;  %v8750_v41 = vld [vmem:[%s13681_s23 + $0x1d8] sm:$0xff] }
0x2620   : > { %v6869_v9 = vpop.f32.mrb[138].mxu1 }
0x2621   : > { %v10150_v42 = vpop.f32.mrb[139].mxu1  ;;  %10183 = vmatmul.mubr.msk.f32.gmra.mrb[148].mxu0 %vm1838_vm3, %v13045_v13 }
0x2622   : > { %10185 = vmatprep.mubr.msk.f32.mxu0 %vm11826_vm4, %v11827_v35  ;;  %v8751_v42 = vld [vmem:[%s13681_s23 + $0x1e0] sm:$0xff] }
0x2624   : > { %v6874_v14 = vpop.f32.mrb[140].mxu1 }
0x2625   : > { %v10153_v16 = vpop.f32.mrb[141].mxu1  ;;  %10186 = vmatmul.mubr.msk.f32.gmra.mrb[150].mxu0 %vm1838_vm3, %v13056_v18 }
0x2626   : > { %10209 = vmatprep.mubr.msk.f32.mxu0 %vm11826_vm4, %v11827_v35 }
0x2628   : > { %v6949_v43 = vpop.f32.mrb[142].mxu1 }
0x2629   : > { %v10164_v44 = vpop.f32.mrb[143].mxu1 }
0x262a   : > { %v8754_v44 = vld [vmem:[%s13681_s23 + $0x1f8] sm:$0xff] }
0x262c   : > { %v6954_v6 = vpop.f32.mrb[144].mxu1 }
0x262d   : > { %v10665_v45 = vpack.c.bf16 %v6954_v6, %v6949_v43  ;;  %v10167_v21 = vpop.f32.mrb[145].mxu1  ;;  %v8753_v43 = vld [vmem:[%s13681_s23 + $0x1f0] sm:$0xff] }
0x262e   : > { %v10681_v6 = vpack.c.bf16 %v8754_v44, %v8753_v43 }
0x262f   : > { %10667 = vmatpush3.bf16.xpose.msk.msra.mxu1 %vm12535_vm7, %v10665_v45 }
0x2630   : > { %v6959_v46 = vpop.f32.mrb[146].mxu1  ;;  %10192 = vmatprep.subr.mxu1 %v11827_v35 }
0x2631   : > { %v10170_v39 = vpop.f32.mrb[147].mxu1 }
0x2637   : > { %10193 = vmatpush3.xpose.msk.msra.mxu1 %vm2086_vm5, %v6959_v46 }
0x2638   : > { %10671 = vmatprep.subr.bf16.mxu1 %v11825_v34 }
0x263a   : > { %10195 = vmatmul.mubr.msk.f32.vlgmr.msra.gmra.mrb[148].mxu1 %vm2086_vm5, %v6864_v2  ;;  %v10672_v2 = vpack.c.bf16 %v8748_v38, %v8747_v8  ;;  %v8763_v8 = vld [vmem:[%s13683_s10 + $0x28] sm:$0xff] }
0x263b   : > { %10197 = vmatprep.mubr.msk.f32.mxu1 %vm11826_vm4, %v11827_v35 }
0x263c   : > { %10673 = vmatpush3.bf16.msra.mxu1 %v10672_v2  ;;  %v8765_v2 = vld [vmem:[%s13683_s10 + $0x38] sm:$0xff] }
0x263d   : > { %10674 = vmatprep.subr.bf16.mxu1 %v11825_v34 }
0x263e   : > { %10198 = vmatmul.mubr.msk.f32.gmra.mrb[150].mxu1 %vm2086_vm5, %v6869_v9  ;;  %v10675_v9 = vpack.c.bf16 %v8750_v41, %v8749_v40  ;;  %v8764_v40 = vld [vmem:[%s13683_s10 + $0x30] sm:$0xff] }
0x263f   : > { %10200 = vmatprep.mubr.msk.f32.mxu1 %vm11826_vm4, %v11827_v35  ;;  %v10687_v41 = vpack.c.bf16 %v8765_v2, %v8764_v40 }
0x2640   : > { %10676 = vmatpush3.bf16.msra.mxu1 %v10675_v9 }
0x2641   : > { %10677 = vmatprep.subr.bf16.mxu1 %v11825_v34 }
0x2642   : > { %10201 = vmatmul.mubr.msk.f32.gmra.mrb[152].mxu1 %vm2086_vm5, %v6874_v14  ;;  %v8752_v14 = vld [vmem:[%s13681_s23 + $0x1e8] sm:$0xff] }
0x2643   : > { %10234 = vmatprep.mubr.msk.f32.mxu1 %vm11826_vm4, %v11827_v35  ;;  %v10678_v16 = vpack.c.bf16 %v8752_v14, %v8751_v42 }
0x2645   : > { %10679 = vmatpush3.bf16.msra.mxu1 %v10678_v16 }
0x2646   : > { %10680 = vmatprep.subr.bf16.mxu1 %v11825_v34 }
0x2649   : > { %10682 = vmatpush3.bf16.msra.mxu1 %v10681_v6 }
0x264a   : > { %10695 = vmatprep.subr.bf16.mxu1 %v11825_v34 }
0x26e4   : > { %v6776_v51 = vpop.f32.mrb[140].mxu0 }
0x26e5   : > { %v13451_v29 = vadd.f32 %v6776_v51, %v13326_v49  ;;  %v10130_v36 = vpop.f32.mrb[141].mxu0 }
0x26e8   : > { %v6781_v53 = vpop.f32.mrb[142].mxu0 }
0x26e9   : > { %v13454_v30 = vadd.f32 %v6781_v53, %v13328_v54  ;;  %v10133_v56 = vpop.f32.mrb[143].mxu0 }
0x26ec   : > { %v6786_v58 = vpop.f32.mrb[144].mxu0 }
0x26ed   : > { %v13457_v60 = vadd.f32 %v6786_v58, %v13330_v57  ;;  %v10136_v63 = vpop.f32.mrb[145].mxu0 }
0x26f0   : > { %v7034_v1 = vpop.f32.mrb[146].mxu0 }
0x26f1   : > { %v10181_v4 = vpop.f32.mrb[147].mxu0 }
0x26f4   : > { %v7039_v59 = vpop.f32.mrb[148].mxu0 }
0x26f5   : > { %v10669_v10 = vpack.c.bf16 %v7039_v59, %v7034_v1  ;;  %v10184_v17 = vpop.f32.mrb[149].mxu0 }
0x26f7   : > { %10670 = vmatpush3.bf16.msra.mxu0 %v10669_v10 }
0x26f8   : > { %v7044_v62 = vpop.f32.mrb[150].mxu0  ;;  %10207 = vmatprep.subr.mxu0 %v11827_v35 }
0x26f9   : > { %v10187_v49 = vpop.f32.mrb[151].mxu0 }
0x26fa   : > { %v8759_v49 = vld [vmem:[%s13682_s11 + $0x1] ss:$0 sm:$0xff] }
0x26fb   : > { %10208 = vmatpush3.msra.mxu0 %v7044_v62 }
0x26fc   : > { %10683 = vmatprep.subr.bf16.mxu0 %v11825_v34 }
0x270d   : > { %v7132_v54 = vpop.f32.mrb[148].mxu1 }
0x270e   : > { %v7133_v19 = vadd.f32 %v13131_v47, %v7132_v54  ;;  %v10196_v23 = vpop.f32.mrb[149].mxu1 }
0x2710   : > { %v7146_v57 = vsel %vm2756_vm8, %v7133_v19, -inf }
0x2711   : > { %7147 = vmax.xlane.f32.xlu0 %v7146_v57  ;;  %v7137_v0 = vpop.f32.mrb[150].mxu1 }
0x2712   : > { %v7138_v25 = vadd.f32 %v13135_v52, %v7137_v0  ;;  %v10199_v26 = vpop.f32.mrb[151].mxu1 }
0x2714   : > { %v7149_v27 = vsel %vm2756_vm8, %v7138_v25, -inf }
0x2715   : > { %7150 = vmax.xlane.f32.xlu1 %v7149_v27  ;;  %v7142_v7 = vpop.f32.mrb[152].mxu1 }
0x2716   : > { %v7143_v11 = vadd.f32 %v13139_v55, %v7142_v7  ;;  %v10202_v48 = vpop.f32.mrb[153].mxu1 }
0x2718   : > { %v7152_v50 = vsel %vm2756_vm8, %v7143_v11, -inf }
0x2719   : > { %7153 = vmax.xlane.f32.xlu0 %v7152_v50 }
0x279e   : > { %v7148_v28 = vpop.xlane.xlu0 %7147 }
0x279f   : > { %v7155_v47 = vsub.f32 %v7133_v19, %v7148_v28 }
0x27a1   : > { %v7158_v24 = vmul.f32 1.442695, %v7155_v47 }
0x27a2   : > { %v7151_v22 = vpop.xlane.xlu1 %7150 }
0x27a3   : > { %11093 = vpow2.f32 %v7158_v24  ;;  %v7156_v15 = vsub.f32 %v7138_v25, %v7151_v22 }
0x27a5   : > { %v7160_v31 = vmul.f32 1.442695, %v7156_v15 }
0x27a6   : > { %v7154_v52 = vpop.xlane.xlu0 %7153 }
0x27a7   : > { %11095 = vpow2.f32 %v7160_v31  ;;  %v7157_v32 = vsub.f32 %v7143_v11, %v7154_v52 }
0x27a9   : > { %v7162_v20 = vmul.f32 1.442695, %v7157_v32 }
0x27ab   : > { %11097 = vpow2.f32 %v7162_v20 }
0x27ad   : > { %v11094_v55 = vpop.eup %11093 }
0x27ae   : > { %v7164_v33 = vsel %vm2756_vm8, %v11094_v55, 0.0 }
0x27af   : > { %7165 = vadd.xlane.f32.xlu1 %v7164_v33 }
0x27b1   : > { %v11096_v37 = vpop.eup %11095 }
0x27b2   : > { %v7167_v3 = vsel %vm2756_vm8, %v11096_v37, 0.0 }
0x27b3   : > { %7168 = vadd.xlane.f32.xlu0 %v7167_v3 }
0x27b5   : > { %v11098_v5 = vpop.eup %11097 }
0x27b6   : > { %v7170_v12 = vsel %vm2756_vm8, %v11098_v5, 0.0 }
0x27b7   : > { %7171 = vadd.xlane.f32.xlu1 %v7170_v12  ;;  %v8762_v12 = vld [vmem:[%s13683_s10 + $0x20] sm:$0xff] }
0x27b8   : > { %v10684_v38 = vpack.c.bf16 %v8763_v8, %v8762_v12 }
0x283c   : > { %v7166_v45 = vpop.xlane.xlu1 %7165 }
0x283d   : > { %11099 = vrcp.f32 %v7166_v45 }
0x2840   : > { %v7169_v21 = vpop.xlane.xlu0 %7168 }
0x2841   : > { %11101 = vrcp.f32 %v7169_v21 }
0x2844   : > { %v7172_v46 = vpop.xlane.xlu1 %7171 }
0x2845   : > { %11103 = vrcp.f32 %v7172_v46 }
0x2847   : > { %v11100_v39 = vpop.eup %11099 }
0x2848   : > { %v7176_v51 = vmul.f32 %v11100_v39, %v11094_v55  ;;  %v8760_v39 = vld [vmem:[#allocation22 + $0x1] ss:$0 sm:$0xff] }
0x284a   : > { %10210 = vmatmul.mubr.msk.f32.vlgmr.msra.gmra.mrb[152].mxu0 %vm2756_vm8, %v7176_v51 }
0x284b   : > { %v11102_v36 = vpop.eup %11101  ;;  %10212 = vmatprep.mubr.msk.f32.mxu0 %vm11826_vm4, %v11827_v35  ;;  %10685 = vmatpush3.bf16.msra.mxu0 %v10684_v38 }
0x284c   : > { %v7177_v53 = vmul.f32 %v11102_v36, %v11096_v37  ;;  %10686 = vmatprep.subr.bf16.mxu0 %v11825_v34  ;;  %v8761_v36 = vld [vmem:[#allocation24 + $0x1] ss:$0 sm:$0xff] }
0x284e   : > { %10213 = vmatmul.mubr.msk.f32.gmra.mrb[154].mxu0 %vm2756_vm8, %v7177_v53 }
0x284f   : > { %v11104_v56 = vpop.eup %11103  ;;  %10215 = vmatprep.mubr.msk.f32.mxu0 %vm11826_vm4, %v11827_v35  ;;  %10688 = vmatpush3.bf16.msra.mxu0 %v10687_v41 }
0x2850   : > { %v7178_v58 = vmul.f32 %v11104_v56, %v11098_v5  ;;  %10689 = vmatprep.subr.bf16.mxu0 %v11825_v34 }
0x2852   : > { %10216 = vmatmul.mubr.msk.f32.gmra.mrb[156].mxu0 %vm2756_vm8, %v7178_v58 }
0x2853   : > { %10251 = vmatprep.mubr.msk.f32.mxu0 %vm11826_vm4, %v11827_v35 }
0x291d   : > { %v7254_v63 = vpop.f32.mrb[152].mxu0 }
0x291e   : > { %v10211_v1 = vpop.f32.mrb[153].mxu0  ;;  %10235 = vmatmul.mubr.msk.f32.vlgmr.msra.gmra.mrb[154].mxu1 %vm2086_vm5, %v7254_v63 }
0x291f   : > { %10237 = vmatprep.mubr.msk.f32.mxu1 %vm11826_vm4, %v11827_v35 }
0x2921   : > { %v7259_v4 = vpop.f32.mrb[154].mxu0 }
0x2922   : > { %v10214_v59 = vpop.f32.mrb[155].mxu0  ;;  %10238 = vmatmul.mubr.msk.f32.gmra.mrb[156].mxu1 %vm2086_vm5, %v7259_v4 }
0x2923   : > { %10240 = vmatprep.mubr.msk.f32.mxu1 %vm11826_vm4, %v11827_v35 }
0x2925   : > { %v7264_v10 = vpop.f32.mrb[156].mxu0 }
0x2926   : > { %v10217_v17 = vpop.f32.mrb[157].mxu0  ;;  %10241 = vmatmul.mubr.msk.f32.gmra.mrb[158].mxu1 %vm2086_vm5, %v7264_v10 }
0x2927   : > { %10283 = vmatprep.mubr.msk.f32.mxu1 %vm11826_vm4, %v11827_v35 }
0x29f1   : > { %v7352_v62 = vpop.f32.mrb[154].mxu1 }
0x29f2   : > { %v7366_v54 = vadd.f32 %v7352_v62, %v13451_v29  ;;  %v10236_v19 = vpop.f32.mrb[155].mxu1 }
0x29f4   : > { %v7377_v23 = vadd.f32 %v8759_v49, %v7366_v54  ;;  %v8771_v54 = vld [vmem:[%s13684_s18 + $0x28] sm:$0xff] }
0x29f5   : > { %v7357_v57 = vpop.f32.mrb[156].mxu1 }
0x29f6   : > { %v7367_v0 = vadd.f32 %v7357_v57, %v13454_v30  ;;  %v10239_v25 = vpop.f32.mrb[157].mxu1  ;;  %v7380_v26 = vadd.f32 %v7377_v23, %v13033_v61  ;;  %v8772_v23 = vld [vmem:[%s13684_s18 + $0x30] sm:$0xff]  ;;  %v8773_v57 = vld [vmem:[%s13684_s18 + $0x38] sm:$0xff] }
0x29f7   : > { %v8766_v25 = vld [vmem:[#allocation25 + $0x1] ss:$0 sm:$0xff] }
0x29f8   : > { %v7378_v27 = vadd.f32 %v8759_v49, %v7367_v0  ;;  %v7387_v7 = vsel %vm1838_vm3, %v7380_v26, 0.0  ;;  %v10693_v0 = vpack.c.bf16 %v8773_v57, %v8772_v23 }
0x29f9   : > { %7388 = vadd.xlane.f32.xlu0 %v7387_v7  ;;  %v7362_v11 = vpop.f32.mrb[158].mxu1 }
0x29fa   : > { %v7368_v48 = vadd.f32 %v7362_v11, %v13457_v60  ;;  %v10242_v50 = vpop.f32.mrb[159].mxu1  ;;  %v7381_v28 = vadd.f32 %v7378_v27, %v13045_v13 }
0x29fc   : > { %v7379_v47 = vadd.f32 %v8759_v49, %v7368_v48  ;;  %v7390_v29 = vsel %vm1838_vm3, %v7381_v28, 0.0  ;;  %v8770_v49 = vld [vmem:[%s13684_s18 + $0x20] sm:$0xff] }
0x29fd   : > { %7391 = vadd.xlane.f32.xlu1 %v7390_v29  ;;  %v10690_v19 = vpack.c.bf16 %v8771_v54, %v8770_v49 }
0x29fe   : > { %v7382_v24 = vadd.f32 %v7379_v47, %v13056_v18 }
0x2a00   : > { %v7393_v30 = vsel %vm1838_vm3, %v7382_v24, 0.0 }
0x2a01   : > { %7394 = vadd.xlane.f32.xlu0 %v7393_v30 }
0x2a86   : > { %v7389_v61 = vpop.xlane.xlu0 %7388 }
0x2a87   : > { %v7396_v22 = vmul.f32 0.03125, %v7389_v61 }
0x2a89   : > { %v7399_v15 = vsub.f32 %v7380_v26, %v7396_v22 }
0x2a8a   : > { %v7392_v31 = vpop.xlane.xlu1 %7391 }
0x2a8b   : > { %v7397_v52 = vmul.f32 0.03125, %v7392_v31  ;;  %v7402_v60 = vmul.f32 %v7399_v15, %v7399_v15 }
0x2a8d   : > { %v7400_v32 = vsub.f32 %v7381_v28, %v7397_v52  ;;  %v7405_v13 = vsel %vm1838_vm3, %v7402_v60, 0.0 }
0x2a8e   : > { %7406 = vadd.xlane.f32.xlu1 %v7405_v13  ;;  %v7395_v20 = vpop.xlane.xlu0 %7394 }
0x2a8f   : > { %v7398_v55 = vmul.f32 0.03125, %v7395_v20  ;;  %v7403_v18 = vmul.f32 %v7400_v32, %v7400_v32 }
0x2a91   : > { %v7401_v33 = vsub.f32 %v7382_v24, %v7398_v55  ;;  %v7408_v37 = vsel %vm1838_vm3, %v7403_v18, 0.0 }
0x2a92   : > { %7409 = vadd.xlane.f32.xlu0 %v7408_v37 }
0x2a93   : > { %v7404_v3 = vmul.f32 %v7401_v33, %v7401_v33 }
0x2a95   : > { %v7411_v5 = vsel %vm1838_vm3, %v7404_v3, 0.0 }
0x2a96   : > { %7412 = vadd.xlane.f32.xlu1 %v7411_v5 }
0x2b1b   : > { %v7407_v9 = vpop.xlane.xlu1 %7406 }
0x2b1c   : > { %v7414_v42 = vmul.f32 0.03125, %v7407_v9 }
0x2b1e   : > { %v7417_v14 = vadd.f32 1e-06, %v7414_v42 }
0x2b1f   : > { %v7410_v16 = vpop.xlane.xlu0 %7409 }
0x2b20   : > { %11105 = vrsqrt.f32 %v7417_v14  ;;  %v7415_v43 = vmul.f32 0.03125, %v7410_v16 }
0x2b22   : > { %v7418_v44 = vadd.f32 1e-06, %v7415_v43  ;;  %v8774_v43 = vld [vmem:[#allocation27 + $0x1] ss:$0 sm:$0xff] }
0x2b23   : > { %v7413_v6 = vpop.xlane.xlu1 %7412 }
0x2b24   : > { %11107 = vrsqrt.f32 %v7418_v44  ;;  %v7416_v45 = vmul.f32 0.03125, %v7413_v6 }
0x2b26   : > { %v7419_v21 = vadd.f32 1e-06, %v7416_v45 }
0x2b28   : > { %11109 = vrsqrt.f32 %v7419_v21 }
0x2b2a   : > { %v11106_v46 = vpop.eup %11105 }
0x2b2b   : > { %v7423_v51 = vmul.f32 %v11106_v46, %v7399_v15 }
0x2b2d   : > { %v7432_v53 = vmul.f32 %v8760_v39, %v7423_v51 }
0x2b2e   : > { %v11108_v56 = vpop.eup %11107 }
0x2b2f   : > { %v13519_v58 = vadd.f32 %v8761_v36, %v7432_v53  ;;  %v7424_v63 = vmul.f32 %v11108_v56, %v7400_v32 }
0x2b31   : > { %10252 = vmatmul.mubr.msk.f32.vlgmr.msra.gmra.mrb[158].mxu0 %vm1838_vm3, %v13519_v58  ;;  %v7433_v1 = vmul.f32 %v8760_v39, %v7424_v63 }
0x2b32   : > { %v11110_v4 = vpop.eup %11109  ;;  %10254 = vmatprep.mubr.msk.f32.mxu0 %vm11826_vm4, %v11827_v35  ;;  %10691 = vmatpush3.bf16.msra.mxu0 %v10690_v19 }
0x2b33   : > { %v13525_v59 = vadd.f32 %v8761_v36, %v7433_v1  ;;  %v7425_v10 = vmul.f32 %v11110_v4, %v7401_v33  ;;  %10692 = vmatprep.subr.bf16.mxu0 %v11825_v34 }
0x2b35   : > { %10255 = vmatmul.mubr.msk.f32.gmra.mrb[160].mxu0 %vm1838_vm3, %v13525_v59  ;;  %v7434_v17 = vmul.f32 %v8760_v39, %v7425_v10 }
0x2b36   : > { %10257 = vmatprep.mubr.msk.f32.mxu0 %vm11826_vm4, %v11827_v35  ;;  %10694 = vmatpush3.bf16.msra.mxu0 %v10693_v0 }
0x2b37   : > { %v13531_v62 = vadd.f32 %v8761_v36, %v7434_v17  ;;  %10701 = vmatprep.subr.bf16.mxu0 %v11825_v34 }
0x2b39   : > { %10258 = vmatmul.mubr.msk.f32.gmra.mrb[162].mxu0 %vm1838_vm3, %v13531_v62 }
0x2b3a   : > { %10268 = vmatprep.mubr.msk.f32.mxu0 %vm11826_vm4, %v11827_v35 }
0x2c04   : > { %v7532_v26 = vpop.f32.mrb[158].mxu0 }
0x2c05   : > { %v7533_v27 = vadd.f32 %v8766_v25, %v7532_v26  ;;  %v10253_v7 = vpop.f32.mrb[159].mxu0 }
0x2c07   : > { %v7549_v11 = vmul.f32 0.044715, %v7533_v27  ;;  %v7546_v5 = vmul.f32 0.5, %v7533_v27 }
0x2c08   : > { %v7537_v48 = vpop.f32.mrb[160].mxu0 }
0x2c09   : > { %v7552_v50 = vmul.f32 %v7549_v11, %v7533_v27  ;;  %v7538_v28 = vadd.f32 %v8766_v25, %v7537_v48  ;;  %v10256_v47 = vpop.f32.mrb[161].mxu0 }
0x2c0b   : > { %v7555_v29 = vmul.f32 %v7552_v50, %v7533_v27  ;;  %v7550_v24 = vmul.f32 0.044715, %v7538_v28  ;;  %v7547_v40 = vmul.f32 0.5, %v7538_v28  ;;  %v7893_v50 = vld [vmem:[#allocation33 + $0x20] sm:$0xff] }
0x2c0c   : > { %v7542_v30 = vpop.f32.mrb[162].mxu0 }
0x2c0d   : > { %v7558_v61 = vadd.f32 %v7555_v29, %v7533_v27  ;;  %v7553_v22 = vmul.f32 %v7550_v24, %v7538_v28  ;;  %v7543_v15 = vadd.f32 %v8766_v25, %v7542_v30  ;;  %v10259_v31 = vpop.f32.mrb[163].mxu0 }
0x2c0f   : > { %v7561_v52 = vmul.f32 0.7978846, %v7558_v61  ;;  %v7556_v60 = vmul.f32 %v7553_v22, %v7538_v28  ;;  %v7551_v32 = vmul.f32 0.044715, %v7543_v15  ;;  %v7548_v42 = vmul.f32 0.5, %v7543_v15 }
0x2c11   : > { %11111 = vtanh.f32 %v7561_v52  ;;  %v7559_v13 = vadd.f32 %v7556_v60, %v7538_v28  ;;  %v7554_v20 = vmul.f32 %v7551_v32, %v7543_v15  ;;  %v7894_v28 = vld [vmem:[#allocation33 + $0x28] sm:$0xff] }
0x2c12   : > { %v10702_v47 = vpack.c.bf16 %v7894_v28, %v7893_v50 }
0x2c13   : > { %v7557_v55 = vmul.f32 %v7554_v20, %v7543_v15  ;;  %v7562_v18 = vmul.f32 0.7978846, %v7559_v13  ;;  %v8778_v20 = vld [vmem:[#allocation28 + $0x1] ss:$0 sm:$0xff] }
0x2c15   : > { %v7560_v33 = vadd.f32 %v7557_v55, %v7543_v15  ;;  %11113 = vtanh.f32 %v7562_v18 }
0x2c17   : > { %v7563_v37 = vmul.f32 0.7978846, %v7560_v33 }
0x2c19   : > { %11115 = vtanh.f32 %v7563_v37  ;;  %v8779_v37 = vld [vmem:[#allocation30 + $0x1] ss:$0 sm:$0xff] }
0x2c1b   : > { %v11112_v3 = vpop.eup %11111 }
0x2c1c   : > { %v7567_v12 = vadd.f32 1.0, %v11112_v3 }
0x2c1e   : > { %v7570_v8 = vmul.f32 %v7567_v12, %v7546_v5 }
0x2c1f   : > { %v11114_v38 = vpop.eup %11113 }
0x2c20   : > { %10269 = vmatmul.mubr.msk.f32.vlgmr.msra.gmra.mrb[164].mxu0 %vm1838_vm3, %v7570_v8  ;;  %v7568_v2 = vadd.f32 1.0, %v11114_v38 }
0x2c21   : > { %10271 = vmatprep.mubr.msk.f32.mxu0 %vm11826_vm4, %v11827_v35  ;;  %10703 = vmatpush3.bf16.msra.mxu0 %v10702_v47 }
0x2c22   : > { %v7571_v41 = vmul.f32 %v7568_v2, %v7547_v40  ;;  %10704 = vmatprep.subr.bf16.mxu0 %v11825_v34 }
0x2c23   : > { %v11116_v9 = vpop.eup %11115 }
0x2c24   : > { %10272 = vmatmul.mubr.msk.f32.gmra.mrb[166].mxu0 %vm1838_vm3, %v7571_v41  ;;  %v7569_v14 = vadd.f32 1.0, %v11116_v9  ;;  %v7739_v9 = vld [vmem:[#allocation31] sm:$0x1] }
0x2c25   : > { %10274 = vmatprep.mubr.msk.f32.mxu0 %vm11826_vm4, %v11827_v35 }
0x2c26   : > { %v7572_v16 = vmul.f32 %v7569_v14, %v7548_v42  ;;  %v7818_v42 = vld [vmem:[#allocation31 + $0x1] sm:$0x1]  ;;  %v7895_v14 = vld [vmem:[#allocation33 + $0x30] sm:$0xff] }
0x2c28   : > { %10275 = vmatmul.mubr.msk.f32.gmra.mrb[168].mxu0 %vm1838_vm3, %v7572_v16  ;;  %v7896_v16 = vld [vmem:[#allocation33 + $0x38] sm:$0xff] }
0x2c29   : > { %10303 = vmatprep.mubr.msk.f32.mxu0 %vm11826_vm4, %v11827_v35 }
0x2cf3   : > { %v7661_v44 = vpop.f32.mrb[164].mxu0 }
0x2cf4   : > { %v7662_v6 = vadd.f32 %v8774_v43, %v7661_v44  ;;  %v10270_v45 = vpop.f32.mrb[165].mxu0 }
0x2cf5   : > { %v7813_v45 = vld [vmem:[#allocation33] sm:$0xff] }
0x2cf6   : > { %v7675_v21 = vadd.f32 %v7662_v6, %v13519_v58 }
0x2cf7   : > { %v7666_v46 = vpop.f32.mrb[166].mxu0 }
0x2cf8   : > { %v7667_v39 = vadd.f32 %v8774_v43, %v7666_v46  ;;  %v10273_v51 = vpop.f32.mrb[167].mxu0  ;;  %v7682_v36 = vsel %vm1838_vm3, %v7675_v21, 0.0 }
0x2cf9   : > { %7683 = vadd.xlane.f32.xlu0 %v7682_v36  ;;  %v7816_v51 = vld [vmem:[#allocation33 + $0x18] sm:$0xff] }
0x2cfa   : > { %v7676_v53 = vadd.f32 %v7667_v39, %v13525_v59  ;;  %v7815_v39 = vld [vmem:[#allocation33 + $0x10] sm:$0xff] }
0x2cfb   : > { %v7671_v56 = vpop.f32.mrb[168].mxu0 }
0x2cfc   : > { %v7672_v63 = vadd.f32 %v8774_v43, %v7671_v56  ;;  %v10276_v1 = vpop.f32.mrb[169].mxu0  ;;  %v7685_v4 = vsel %vm1838_vm3, %v7676_v53, 0.0  ;;  %v10705_v43 = vpack.c.bf16 %v7896_v16, %v7895_v14  ;;  %v10711_v56 = vpack.c.bf16 %v7816_v51, %v7815_v39 }
0x2cfd   : > { %7686 = vadd.xlane.f32.xlu1 %v7685_v4 }
0x2cfe   : > { %v7677_v10 = vadd.f32 %v7672_v63, %v13531_v62  ;;  %10706 = vmatpush3.bf16.msra.mxu0 %v10705_v43  ;;  %v8043_v63 = vlaneseq }
0x2cff   : > { %10707 = vmatprep.subr.bf16.mxu0 %v11825_v34 }
0x2d00   : > { %v7688_v17 = vsel %vm1838_vm3, %v7677_v10, 0.0  ;;  %v8044_v1 = vshrl.u32 %v8043_v63, 7 }
0x2d01   : > { %7689 = vadd.xlane.f32.xlu0 %v7688_v17 }
0x2d02   : > { %v8045_v4 = vsub.s32 0, %v8044_v1 }
0x2d86   : > { %v7684_v58 = vpop.xlane.xlu0 %7683 }
0x2d87   : > { %v7691_v49 = vmul.f32 0.03125, %v7684_v58 }
0x2d89   : > { %v7694_v54 = vsub.f32 %v7675_v21, %v7691_v49  ;;  %v7814_v21 = vld [vmem:[#allocation33 + $0x8] sm:$0xff] }
0x2d8a   : > { %v7687_v19 = vpop.xlane.xlu1 %7686  ;;  %v10708_v46 = vpack.c.bf16 %v7814_v21, %v7813_v45 }
0x2d8b   : > { %v7692_v23 = vmul.f32 0.03125, %v7687_v19  ;;  %v7697_v57 = vmul.f32 %v7694_v54, %v7694_v54 }
0x2d8d   : > { %v7695_v0 = vsub.f32 %v7676_v53, %v7692_v23  ;;  %v7700_v59 = vsel %vm1838_vm3, %v7697_v57, 0.0 }
0x2d8e   : > { %7701 = vadd.xlane.f32.xlu1 %v7700_v59  ;;  %v7690_v25 = vpop.xlane.xlu0 %7689 }
0x2d8f   : > { %v7693_v26 = vmul.f32 0.03125, %v7690_v25  ;;  %v7698_v27 = vmul.f32 %v7695_v0, %v7695_v0 }
0x2d91   : > { %v7696_v7 = vsub.f32 %v7677_v10, %v7693_v26  ;;  %v7703_v11 = vsel %vm1838_vm3, %v7698_v27, 0.0 }
0x2d92   : > { %7704 = vadd.xlane.f32.xlu0 %v7703_v11 }
0x2d93   : > { %v7699_v62 = vmul.f32 %v7696_v7, %v7696_v7 }
0x2d95   : > { %v7706_v48 = vsel %vm1838_vm3, %v7699_v62, 0.0 }
0x2d96   : > { %7707 = vadd.xlane.f32.xlu1 %v7706_v48 }
0x2e1b   : > { %v7702_v29 = vpop.xlane.xlu1 %7701 }
0x2e1c   : > { %v7709_v24 = vmul.f32 0.03125, %v7702_v29 }
0x2e1e   : > { %v7712_v30 = vadd.f32 1e-06, %v7709_v24 }
0x2e1f   : > { %v7705_v61 = vpop.xlane.xlu0 %7704 }
0x2e20   : > { %11117 = vrsqrt.f32 %v7712_v30  ;;  %v7710_v22 = vmul.f32 0.03125, %v7705_v61 }
0x2e22   : > { %v7713_v15 = vadd.f32 1e-06, %v7710_v22 }
0x2e23   : > { %v7708_v31 = vpop.xlane.xlu1 %7707 }
0x2e24   : > { %11119 = vrsqrt.f32 %v7713_v15  ;;  %v7711_v52 = vmul.f32 0.03125, %v7708_v31 }
0x2e26   : > { %v7714_v60 = vadd.f32 1e-06, %v7711_v52 }
0x2e28   : > { %11121 = vrsqrt.f32 %v7714_v60 }
0x2e2a   : > { %v11118_v32 = vpop.eup %11117 }
0x2e2b   : > { %v7718_v13 = vmul.f32 %v11118_v32, %v7694_v54 }
0x2e2d   : > { %v7727_v33 = vmul.f32 %v8778_v20, %v7718_v13 }
0x2e2e   : > { %v11120_v55 = vpop.eup %11119 }
0x2e2f   : > { %v7719_v18 = vmul.f32 %v11120_v55, %v7695_v0  ;;  %v7736_v12 = vadd.f32 %v8779_v37, %v7727_v33 }
0x2e31   : > { %v7728_v3 = vmul.f32 %v8778_v20, %v7719_v18 }
0x2e32   : > { %v11122_v5 = vpop.eup %11121 }
0x2e33   : > { %v7737_v8 = vadd.f32 %v8779_v37, %v7728_v3  ;;  %v7720_v38 = vmul.f32 %v11122_v5, %v7696_v7 }
0x2e35   : > { %v10696_v40 = vpack.c.bf16 %v7737_v8, %v7736_v12  ;;  %v7729_v2 = vmul.f32 %v8778_v20, %v7720_v38 }
0x2e37   : > { %10697 = vmatpush3.bf16.msra.mxu1 %v10696_v40  ;;  %v7738_v41 = vadd.f32 %v8779_v37, %v7729_v2 }
0x2e38   : > { %10281 = vmatprep.subr.mxu1 %v11827_v35 }
0x2e3b   : > { %10282 = vmatpush3.msra.mxu1 %v7738_v41 }
0x2e3c   : > { %10698 = vmatprep.subr.bf16.mxu1 %v11825_v34  ;;  %10284 = vmatmul.mubr.msk.f32.vlgmr.msra.gmra.mrb[160].mxu1 %vm2756_vm8, %v7739_v9 }
0x2e3d   : > { %10700 = vmatpush3.bf16.msra.mxu1 %v10696_v40  ;;  %10292 = vmatprep.mubr.msk.f32.mxu1 %vm11826_vm4, %v11827_v35 }
0x2e3e   : > { %10290 = vmatprep.subr.mxu1 %v11827_v35 }
0x2e41   : > { %10291 = vmatpush3.msra.mxu1 %v7738_v41 }
0x2e42   : > { %10293 = vmatmul.mubr.msk.f32.vlgmr.msra.gmra.mrb[162].mxu1 %vm2756_vm8, %v7818_v42 }
0x2f0f   : > { %v7809_v44 = vpop.f32.mrb[160].mxu1 }
0x2f10   : > { %v10285_v6 = vpop.f32.mrb[161].mxu1 }
0x2f15   : > { %v7888_v36 = vpop.f32.mrb[162].mxu1 }
0x2f16   : > { %10304 = vmatmul.mubr.msk.f32.vlgmr.msra.gmra.mrb[170].mxu0 %vm1838_vm3, %v7888_v36  ;;  %v10294_v53 = vpop.f32.mrb[163].mxu1 }
0x2f17   : > { %10709 = vmatpush3.bf16.msra.mxu0 %v10708_v46  ;;  %10314 = vmatprep.mubr.msk.f32.mxu0 %vm11826_vm4, %v11827_v35 }
0x2f18   : > { %10710 = vmatprep.subr.bf16.mxu0 %v11825_v34 }
0x2f1b   : > { %10712 = vmatpush3.bf16.msra.mxu0 %v10711_v56 }
0x2f1e   : > { %10315 = vmatmul.mubr.msk.f32.vlgmr.msra.gmra.mrb[170].mxu0 %vm1838_vm3, %v7809_v44 }
0x2ff1   : > { %v8039_v10 = vpop.f32.mrb[170].mxu0 }
0x2ff2   : > { %v8046_v17 = vrot.slane %v8039_v10, %v8045_v4  ;;  %v10316_v58 = vpop.f32.mrb[171].mxu0 }
0x2ff4   : > { %8047 = vst [vmem:[%s1295_s1] sm:$0xff] %v8046_v17 }
0x2ff5 PF: > { %s86_s28 = sadd.s32 1, %s11764_s28  }
0x2ff6   : > { %p83_p13 = scmp.ge.s32.totalorder %s86_s28, 4  }
0x2ff8   :  { %85 = sbr.rel (!%p83_p13) target bundleno = 67 (0x43), region = 342 }
0x2fff   :  { %8067 = vsyncpa [#allocation3], 1 }
0x3000   :  { %8069 = vsyncpa [#allocation3 + $0x1], 1 }
0x3001   :  { %8070 = vsyncpa [#allocation5], 1 }
0x3002   :  { %8071 = vsyncpa [#allocation8], 1 }
0x3003   :  { %8072 = vsyncpa [#allocation11], 1 }
0x3004   :  { %8073 = vsyncpa [#allocation14], 1 }
0x3005   :  { %8074 = vsyncpa [#allocation17], 1 }
0x3006   :  { %8075 = vsyncpa [#allocation20], 1 }
0x3007   :  { %8076 = vsyncpa [#allocation23], 1 }
0x3008   :  { %8077 = vsyncpa [#allocation26], 1 }
0x3009   :  { %8078 = vsyncpa [#allocation29], 1 }
0x300a   :  { %8079 = vsyncpa [#allocation32], 1 }

</bundles_post_ra>
